<compile_context>
chip_gen: v7x
topology: tpu7x:2x2x1
jax: 0.10.0
libtpu: 0.0.40
codegen_flags: <defaults>
</compile_context>

<pallas_src>
import functools

import jax
import jax.numpy as jnp
from jax.experimental import pallas as pl
from jax.experimental.pallas import tpu as pltpu

EPS = 1e-5
LANE = 128
SUBLANE = 8
INPUT_DIM = 784
H_SIZES = [256, 128, 64, 64]
TARGET_ROWS = 256          # MXU row-fill target (multiple of 128 -> good on v5e/v6e/v7x)


def _round_up(n, m):
    return ((n + m - 1) // m) * m


D_IN_PAD = _round_up(INPUT_DIM, LANE)            # 896
H_PAD = [_round_up(h, LANE) for h in H_SIZES]    # [256, 128, 128, 128]


def _packed_layout(out_pad):
    """Static 128-aligned slots for [b, gamma, beta] x 4 hidden layers + classifier b."""
    layer_slots = []
    cur = 0
    for d in H_PAD:
        layer_slots.append((cur, cur + d, cur + 2 * d, d))
        cur += 3 * d
    b5_off = cur
    packed_len = cur + out_pad
    return tuple(layer_slots), b5_off, packed_len


def _mlp_kernel(x_ref, w1_ref, w2_ref, w3_ref, w4_ref, w5_ref, vec_ref, out_ref,
                *, layer_slots, b5_off, out_pad, n_valid, b_pad, tb):
    """Fused 4x(Linear -> BatchNorm(train) -> ReLU) + final Linear for TB tasks.

    x_ref:   (tb*b_pad, 896) bf16  -- TB task batches stacked along rows.
    out_ref: (tb*b_pad, out_pad) f32
    """
    f32 = jnp.float32
    rows = tb * b_pad

    if n_valid != b_pad:
        # Batch was padded to a sublane multiple: mask padded rows out of BN stats.
        row_ids = jax.lax.broadcasted_iota(jnp.int32, (1, b_pad, 1), 1)
        row_mask = (row_ids < n_valid).astype(f32)
    else:
        row_mask = None
    inv_n = 1.0 / n_valid

    def batch_stats(z3):
        # z3: (tb, b_pad, d); per-task mean/var over the batch axis (axis=1).
        if row_mask is None:
            mean = jnp.mean(z3, axis=1, keepdims=True)
            c = z3 - mean
            var = jnp.mean(c * c, axis=1, keepdims=True)
        else:
            mean = jnp.sum(z3 * row_mask, axis=1, keepdims=True) * inv_n
            c = z3 - mean
            var = jnp.sum(c * c * row_mask, axis=1, keepdims=True) * inv_n
        return mean, var

    w_refs = (w1_ref, w2_ref, w3_ref, w4_ref)

    h = x_ref[...]                                # bf16 (rows, 896)
    for li in range(4):
        b_off, g_off, be_off, d = layer_slots[li]
        b = vec_ref[:, b_off:b_off + d]           # (1, d) f32, static lane-aligned slices
        g = vec_ref[:, g_off:g_off + d]
        be = vec_ref[:, be_off:be_off + d]
        # Linear on the MXU (bf16 in, f32 accumulate) over all TB tasks at once.
        z = jnp.dot(h, w_refs[li][...], preferred_element_type=f32) + b      # (rows, d)
        # Per-task BN(train): tile-aligned reshape (b_pad is a multiple of 8).
        z3 = z.reshape(tb, b_pad, d)
        mean, var = batch_stats(z3)
        scale = g * jax.lax.rsqrt(var + EPS)      # (tb, 1, d)
        shift = be - mean * scale
        h = jnp.maximum(z3 * scale + shift, 0.0).reshape(rows, d).astype(jnp.bfloat16)

    b5 = vec_ref[:, b5_off:b5_off + out_pad]
    out_ref[...] = (jnp.dot(h, w5_ref[...], preferred_element_type=f32)
                    + b5).astype(out_ref.dtype)


def _resident_spec(shape, single_buffer):
    """Constant index_map -> DMA'd once and resident across all grid steps."""
    index_map = lambda t: (0,) * len(shape)
    if single_buffer:
        # Single-buffer resident operands (no dead second buffer / revolve bookkeeping).
        return pl.BlockSpec(shape, index_map, pipeline_mode=pl.Buffered(1))
    return pl.BlockSpec(shape, index_map)


@functools.partial(jax.jit, static_argnames=("n_way", "single_buffer_weights"))
def _forward_tasks_impl(x_tasks, params, n_way, single_buffer_weights):
    T, B = x_tasks.shape[0], x_tasks.shape[1]
    x2d = jnp.reshape(x_tasks, (T, B, -1))
    if x2d.shape[-1] != INPUT_DIM:
        raise ValueError(f"Expected input dim {INPUT_DIM}, but got {x2d.shape[-1]}")

    b_pad = max(SUBLANE, _round_up(B, SUBLANE))
    out_pad = _round_up(max(n_way, 1), LANE)
    layer_slots, b5_off, packed_len = _packed_layout(out_pad)

    # ---- task blocking: TB tasks per grid step, ~TARGET_ROWS LHS rows per matmul,
    #      but keep the grid >= 2 steps when T >= 2 so v7x's two TCs both get work.
    tb_cap = max(1, TARGET_ROWS // b_pad)
    tb = min(tb_cap, max(1, -(-T // 2)))          # min(cap, ceil(T/2))
    t_pad = _round_up(T, tb)
    n_steps = t_pad // tb
    rows = tb * b_pad

    dims_in = [INPUT_DIM] + H_SIZES
    dims_out = H_SIZES + [n_way]
    dims_in_pad = [D_IN_PAD] + H_PAD
    dims_out_pad = H_PAD + [out_pad]

    # Pad weights to lane-dense shapes, cast to bf16; pack all small vectors into one.
    ws = []
    vec_parts = []
    idx = 0
    for li in range(5):
        w = jnp.asarray(params[idx], jnp.float32)
        b = jnp.asarray(params[idx + 1], jnp.float32).reshape(-1)
        idx += 2
        assert w.shape == (dims_in[li], dims_out[li]), w.shape
        w = jnp.pad(w, ((0, dims_in_pad[li] - dims_in[li]),
                        (0, dims_out_pad[li] - dims_out[li])))
        ws.append(w.astype(jnp.bfloat16))
        b = jnp.pad(b, (0, dims_out_pad[li] - dims_out[li]))
        if li < 4:
            g = jnp.asarray(params[idx], jnp.float32).reshape(-1)
            be = jnp.asarray(params[idx + 1], jnp.float32).reshape(-1)
            idx += 2
            # NOTE: gamma/beta zero-padded alongside the weights keeps padded feature
            # columns exactly zero through Linear -> BN(train) -> ReLU.
            g = jnp.pad(g, (0, dims_out_pad[li] - dims_out[li]))
            be = jnp.pad(be, (0, dims_out_pad[li] - dims_out[li]))
            vec_parts += [b, g, be]
        else:
            vec_parts.append(b)
    packed = jnp.concatenate(vec_parts)[None, :]          # (1, 2048) f32

    # Cast x to bf16 BEFORE padding (halves pad-prologue HBM traffic), then pad tasks,
    # rows and features, and flatten tasks into the row axis.
    x_bf = x2d.astype(jnp.bfloat16)
    x_pad = jnp.pad(x_bf, ((0, t_pad - T), (0, b_pad - B), (0, D_IN_PAD - INPUT_DIM)))
    x_flat = jnp.reshape(x_pad, (t_pad * b_pad, D_IN_PAD))

    kernel = functools.partial(
        _mlp_kernel,
        layer_slots=layer_slots, b5_off=b5_off, out_pad=out_pad,
        n_valid=B, b_pad=b_pad, tb=tb)

    w_specs = [_resident_spec(w.shape, single_buffer_weights) for w in ws]
    in_specs = ([pl.BlockSpec((rows, D_IN_PAD), lambda t: (t, 0))]
                + w_specs
                + [_resident_spec((1, packed_len), single_buffer_weights)])
    out_spec = pl.BlockSpec((rows, out_pad), lambda t: (t, 0))

    out = pl.pallas_call(
        kernel,
        out_shape=jax.ShapeDtypeStruct((t_pad * b_pad, out_pad), jnp.float32),
        grid=(n_steps,),
        in_specs=in_specs,
        out_specs=out_spec,
        compiler_params=pltpu.CompilerParams(
            dimension_semantics=("parallel",),           # shard task blocks across TCs
            vmem_limit_bytes=32 * 1024 * 1024),
    )(x_flat, *ws, packed)

    out = jnp.reshape(out, (t_pad, b_pad, out_pad))
    return out[:T, :B, :n_way]


def maml_fcnet_forward_tasks(x_tasks, params, n_way):
    """Forward over a stack of independent task batches.

    x_tasks: (T, B, ...) flattened per row to 784 features (like x.view(B, -1)).
    params:  flat list in get_parameters() order, but Linear weights pre-transposed
             to (in, out) and 1-D vectors of shape (dim,).
    Returns: (T, B, n_way) float32 logits. BatchNorm uses per-task batch statistics.
    """
    try:
        return _forward_tasks_impl(x_tasks, params, n_way, True)
    except Exception:
        # Fallback for JAX versions without BlockSpec pipeline_mode / pl.Buffered.
        return _forward_tasks_impl(x_tasks, params, n_way, False)


def maml_fcnet_forward(x, params, n_way):
    """Module-style forward: x is (B, ...) -> (B, n_way) logits."""
    return maml_fcnet_forward_tasks(x[None], params, n_way)[0]


def init_params(key, n_way, input_dim=INPUT_DIM):
    """Deterministic init matching the PyTorch module:
    Linear: xavier_uniform weight (stored transposed as (in, out)), zero bias.
    BatchNorm: weight=1, bias=0."""
    dims = [input_dim] + H_SIZES + [n_way]
    params = []
    keys = jax.random.split(key, len(dims) - 1)
    for li in range(len(dims) - 1):
        fan_in, fan_out = dims[li], dims[li + 1]
        bound = (6.0 / (fan_in + fan_out)) ** 0.5
        w = jax.random.uniform(keys[li], (fan_in, fan_out), jnp.float32,
                               minval=-bound, maxval=bound)
        params.append(w)
        params.append(jnp.zeros((fan_out,), jnp.float32))
        if li < len(dims) - 2:
            params.append(jnp.ones((fan_out,), jnp.float32))   # gamma
            params.append(jnp.zeros((fan_out,), jnp.float32))  # beta
    return params


def reference_forward(x_tasks, params, n_way):
    """Pure-JAX reference of the same math (bf16 matmuls, f32 BN), per task."""
    T, B = x_tasks.shape[0], x_tasks.shape[1]
    x2d = jnp.reshape(x_tasks, (T, B, -1)).astype(jnp.float32)
    outs = []
    for t in range(T):
        h = x2d[t]
        idx = 0
        for _ in range(4):
            w, b, g, be = params[idx], params[idx + 1], params[idx + 2], params[idx + 3]
            z = jnp.dot(h.astype(jnp.bfloat16), w.astype(jnp.bfloat16),
                        preferred_element_type=jnp.float32) + b.reshape(1, -1)
            mean = jnp.mean(z, axis=0, keepdims=True)
            var = jnp.mean((z - mean) ** 2, axis=0, keepdims=True)
            h = jnp.maximum((z - mean) * jax.lax.rsqrt(var + EPS) * g.reshape(1, -1)
                            + be.reshape(1, -1), 0.0)
            idx += 4
        w, b = params[idx], params[idx + 1]
        outs.append(jnp.dot(h.astype(jnp.bfloat16), w.astype(jnp.bfloat16),
                            preferred_element_type=jnp.float32) + b.reshape(1, -1))
    return jnp.stack(outs)


if __name__ == "__main__":
    key = jax.random.PRNGKey(0)
    k_param, k_x1, k_x2 = jax.random.split(key, 3)

    n_way = 5
    T, B = 4, 8
    # Omniglot-like NCHW inputs per task; flattened like x.view(batch, -1)
    x = jax.random.normal(k_x1, (T, B, 1, 28, 28), jnp.float32)
    params = init_params(k_param, n_way)

    out = maml_fcnet_forward_tasks(x, params, n_way)
    out = jax.block_until_ready(out)
    assert out.shape == (T, B, n_way), out.shape
    ref = reference_forward(x, params, n_way)
    assert jnp.allclose(out, ref, atol=2e-2, rtol=2e-2), \
        "mismatch vs pure-JAX reference (multi-task / blocked path)"

    # Module-style call with a batch that is not a multiple of 8 (masked-BN path, T=1).
    x1 = jax.random.normal(k_x2, (5, 1, 28, 28), jnp.float32)
    out1 = jax.block_until_ready(maml_fcnet_forward(x1, params, n_way))
    assert out1.shape == (5, n_way), out1.shape
    ref1 = reference_forward(x1[None], params, n_way)[0]
    assert jnp.allclose(out1, ref1, atol=2e-2, rtol=2e-2), \
        "mismatch vs pure-JAX reference (single-batch / masked path)"

    print("KERNEL_OK")
</pallas_src>

<mosaic_0001>
module attributes {stable_mosaic.version = 11 : i64} {
  func.func @_mlp_kernel(%arg0: i32, %arg1: memref<16x896xbf16, #tpu.memory_space<vmem>>, %arg2: memref<896x256xbf16, #tpu.memory_space<vmem>>, %arg3: memref<256x128xbf16, #tpu.memory_space<vmem>>, %arg4: memref<128x128xbf16, #tpu.memory_space<vmem>>, %arg5: memref<128x128xbf16, #tpu.memory_space<vmem>>, %arg6: memref<128x128xbf16, #tpu.memory_space<vmem>>, %arg7: memref<1x2048xf32, #tpu.memory_space<vmem>>, %arg8: memref<16x128xf32, #tpu.memory_space<vmem>>) attributes {dimension_semantics = [#tpu.dimension_semantics<parallel>], iteration_bounds = array<i64: 2>, scalar_prefetch = 0 : i64, scratch_operands = 0 : i64, tpu.core_type = #tpu.core_type<tc>, window_params = [{transform_indices = @transform_0, window_bounds = array<i64: 16, 896>}, {pipeline_mode = #tpu.pipeline_mode<synchronous>, transform_indices = @transform_1, window_bounds = array<i64: 896, 256>}, {pipeline_mode = #tpu.pipeline_mode<synchronous>, transform_indices = @transform_2, window_bounds = array<i64: 256, 128>}, {pipeline_mode = #tpu.pipeline_mode<synchronous>, transform_indices = @transform_3, window_bounds = array<i64: 128, 128>}, {pipeline_mode = #tpu.pipeline_mode<synchronous>, transform_indices = @transform_4, window_bounds = array<i64: 128, 128>}, {pipeline_mode = #tpu.pipeline_mode<synchronous>, transform_indices = @transform_5, window_bounds = array<i64: 128, 128>}, {pipeline_mode = #tpu.pipeline_mode<synchronous>, transform_indices = @transform_6, window_bounds = array<i64: 1, 2048>}, {transform_indices = @transform_7, window_bounds = array<i64: 16, 128>}]} {
    %c0 = arith.constant 0 : index
    %c0_0 = arith.constant 0 : index
    %0 = vector.load %arg1[%c0, %c0_0] : memref<16x896xbf16, #tpu.memory_space<vmem>>, vector<16x896xbf16>
    %c0_1 = arith.constant 0 : index
    %c0_2 = arith.constant 0 : index
    %1 = vector.load %arg7[%c0_1, %c0_2] : memref<1x2048xf32, #tpu.memory_space<vmem>>, vector<1x256xf32>
    %c0_3 = arith.constant 0 : index
    %c256 = arith.constant 256 : index
    %2 = vector.load %arg7[%c0_3, %c256] : memref<1x2048xf32, #tpu.memory_space<vmem>>, vector<1x256xf32>
    %c0_4 = arith.constant 0 : index
    %c512 = arith.constant 512 : index
    %3 = vector.load %arg7[%c0_4, %c512] : memref<1x2048xf32, #tpu.memory_space<vmem>>, vector<1x256xf32>
    %c0_5 = arith.constant 0 : index
    %c0_6 = arith.constant 0 : index
    %4 = vector.load %arg2[%c0_5, %c0_6] : memref<896x256xbf16, #tpu.memory_space<vmem>>, vector<896x256xbf16>
    %cst = arith.constant dense<0.000000e+00> : vector<16x256xf32>
    %5 = tpu.matmul %0, %4, %cst {dimension_numbers = #tpu.dot_dimension_numbers<[1], [0], [0], [1], [0, 0, 1, 1], [], []>} : vector<16x896xbf16>, vector<896x256xbf16>, vector<16x256xf32> -> vector<16x256xf32>
    %6 = vector.broadcast %1 : vector<1x256xf32> to vector<16x256xf32>
    %7 = arith.addf %5, %6 : vector<16x256xf32>
    %8 = vector.shape_cast %7 : vector<16x256xf32> to vector<2x8x256xf32>
    %cst_7 = arith.constant dense<0.000000e+00> : vector<2x256xf32>
    %9 = vector.multi_reduction <add>, %8, %cst_7 [1] : vector<2x8x256xf32> to vector<2x256xf32>
    %10 = vector.shape_cast %9 : vector<2x256xf32> to vector<2x1x256xf32>
    %cst_8 = arith.constant 8.000000e+00 : f32
    %11 = vector.broadcast %cst_8 : f32 to vector<2x1x256xf32>
    %12 = arith.divf %10, %11 : vector<2x1x256xf32>
    %13 = vector.broadcast %12 : vector<2x1x256xf32> to vector<2x8x256xf32>
    %14 = arith.subf %8, %13 : vector<2x8x256xf32>
    %15 = arith.mulf %14, %14 : vector<2x8x256xf32>
    %cst_9 = arith.constant dense<0.000000e+00> : vector<2x256xf32>
    %16 = vector.multi_reduction <add>, %15, %cst_9 [1] : vector<2x8x256xf32> to vector<2x256xf32>
    %17 = vector.shape_cast %16 : vector<2x256xf32> to vector<2x1x256xf32>
    %cst_10 = arith.constant 8.000000e+00 : f32
    %18 = vector.broadcast %cst_10 : f32 to vector<2x1x256xf32>
    %19 = arith.divf %17, %18 : vector<2x1x256xf32>
    %cst_11 = arith.constant 9.99999974E-6 : f32
    %20 = vector.broadcast %cst_11 : f32 to vector<2x1x256xf32>
    %21 = arith.addf %19, %20 : vector<2x1x256xf32>
    %22 = math.rsqrt %21 : vector<2x1x256xf32>
    %23 = vector.shape_cast %2 : vector<1x256xf32> to vector<1x1x256xf32>
    %24 = vector.broadcast %23 : vector<1x1x256xf32> to vector<2x1x256xf32>
    %25 = arith.mulf %24, %22 : vector<2x1x256xf32>
    %26 = arith.mulf %12, %25 : vector<2x1x256xf32>
    %27 = vector.shape_cast %3 : vector<1x256xf32> to vector<1x1x256xf32>
    %28 = vector.broadcast %27 : vector<1x1x256xf32> to vector<2x1x256xf32>
    %29 = arith.subf %28, %26 : vector<2x1x256xf32>
    %30 = vector.broadcast %25 : vector<2x1x256xf32> to vector<2x8x256xf32>
    %31 = arith.mulf %8, %30 : vector<2x8x256xf32>
    %32 = vector.broadcast %29 : vector<2x1x256xf32> to vector<2x8x256xf32>
    %33 = arith.addf %31, %32 : vector<2x8x256xf32>
    %cst_12 = arith.constant 0.000000e+00 : f32
    %34 = vector.broadcast %cst_12 : f32 to vector<2x8x256xf32>
    %35 = arith.maximumf %33, %34 : vector<2x8x256xf32>
    %36 = vector.shape_cast %35 : vector<2x8x256xf32> to vector<16x256xf32>
    %37 = arith.truncf %36 : vector<16x256xf32> to vector<16x256xbf16>
    %c0_13 = arith.constant 0 : index
    %c768 = arith.constant 768 : index
    %38 = vector.load %arg7[%c0_13, %c768] : memref<1x2048xf32, #tpu.memory_space<vmem>>, vector<1x128xf32>
    %c0_14 = arith.constant 0 : index
    %c896 = arith.constant 896 : index
    %39 = vector.load %arg7[%c0_14, %c896] : memref<1x2048xf32, #tpu.memory_space<vmem>>, vector<1x128xf32>
    %c0_15 = arith.constant 0 : index
    %c1024 = arith.constant 1024 : index
    %40 = vector.load %arg7[%c0_15, %c1024] : memref<1x2048xf32, #tpu.memory_space<vmem>>, vector<1x128xf32>
    %c0_16 = arith.constant 0 : index
    %c0_17 = arith.constant 0 : index
    %41 = vector.load %arg3[%c0_16, %c0_17] : memref<256x128xbf16, #tpu.memory_space<vmem>>, vector<256x128xbf16>
    %cst_18 = arith.constant dense<0.000000e+00> : vector<16x128xf32>
    %42 = tpu.matmul %37, %41, %cst_18 {dimension_numbers = #tpu.dot_dimension_numbers<[1], [0], [0], [1], [0, 0, 1, 1], [], []>} : vector<16x256xbf16>, vector<256x128xbf16>, vector<16x128xf32> -> vector<16x128xf32>
    %43 = vector.broadcast %38 : vector<1x128xf32> to vector<16x128xf32>
    %44 = arith.addf %42, %43 : vector<16x128xf32>
    %45 = vector.shape_cast %44 : vector<16x128xf32> to vector<2x8x128xf32>
    %cst_19 = arith.constant dense<0.000000e+00> : vector<2x128xf32>
    %46 = vector.multi_reduction <add>, %45, %cst_19 [1] : vector<2x8x128xf32> to vector<2x128xf32>
    %47 = vector.shape_cast %46 : vector<2x128xf32> to vector<2x1x128xf32>
    %cst_20 = arith.constant 8.000000e+00 : f32
    %48 = vector.broadcast %cst_20 : f32 to vector<2x1x128xf32>
    %49 = arith.divf %47, %48 : vector<2x1x128xf32>
    %50 = vector.broadcast %49 : vector<2x1x128xf32> to vector<2x8x128xf32>
    %51 = arith.subf %45, %50 : vector<2x8x128xf32>
    %52 = arith.mulf %51, %51 : vector<2x8x128xf32>
    %cst_21 = arith.constant dense<0.000000e+00> : vector<2x128xf32>
    %53 = vector.multi_reduction <add>, %52, %cst_21 [1] : vector<2x8x128xf32> to vector<2x128xf32>
    %54 = vector.shape_cast %53 : vector<2x128xf32> to vector<2x1x128xf32>
    %cst_22 = arith.constant 8.000000e+00 : f32
    %55 = vector.broadcast %cst_22 : f32 to vector<2x1x128xf32>
    %56 = arith.divf %54, %55 : vector<2x1x128xf32>
    %cst_23 = arith.constant 9.99999974E-6 : f32
    %57 = vector.broadcast %cst_23 : f32 to vector<2x1x128xf32>
    %58 = arith.addf %56, %57 : vector<2x1x128xf32>
    %59 = math.rsqrt %58 : vector<2x1x128xf32>
    %60 = vector.shape_cast %39 : vector<1x128xf32> to vector<1x1x128xf32>
    %61 = vector.broadcast %60 : vector<1x1x128xf32> to vector<2x1x128xf32>
    %62 = arith.mulf %61, %59 : vector<2x1x128xf32>
    %63 = arith.mulf %49, %62 : vector<2x1x128xf32>
    %64 = vector.shape_cast %40 : vector<1x128xf32> to vector<1x1x128xf32>
    %65 = vector.broadcast %64 : vector<1x1x128xf32> to vector<2x1x128xf32>
    %66 = arith.subf %65, %63 : vector<2x1x128xf32>
    %67 = vector.broadcast %62 : vector<2x1x128xf32> to vector<2x8x128xf32>
    %68 = arith.mulf %45, %67 : vector<2x8x128xf32>
    %69 = vector.broadcast %66 : vector<2x1x128xf32> to vector<2x8x128xf32>
    %70 = arith.addf %68, %69 : vector<2x8x128xf32>
    %cst_24 = arith.constant 0.000000e+00 : f32
    %71 = vector.broadcast %cst_24 : f32 to vector<2x8x128xf32>
    %72 = arith.maximumf %70, %71 : vector<2x8x128xf32>
    %73 = vector.shape_cast %72 : vector<2x8x128xf32> to vector<16x128xf32>
    %74 = arith.truncf %73 : vector<16x128xf32> to vector<16x128xbf16>
    %c0_25 = arith.constant 0 : index
    %c1152 = arith.constant 1152 : index
    %75 = vector.load %arg7[%c0_25, %c1152] : memref<1x2048xf32, #tpu.memory_space<vmem>>, vector<1x128xf32>
    %c0_26 = arith.constant 0 : index
    %c1280 = arith.constant 1280 : index
    %76 = vector.load %arg7[%c0_26, %c1280] : memref<1x2048xf32, #tpu.memory_space<vmem>>, vector<1x128xf32>
    %c0_27 = arith.constant 0 : index
    %c1408 = arith.constant 1408 : index
    %77 = vector.load %arg7[%c0_27, %c1408] : memref<1x2048xf32, #tpu.memory_space<vmem>>, vector<1x128xf32>
    %c0_28 = arith.constant 0 : index
    %c0_29 = arith.constant 0 : index
    %78 = vector.load %arg4[%c0_28, %c0_29] : memref<128x128xbf16, #tpu.memory_space<vmem>>, vector<128x128xbf16>
    %cst_30 = arith.constant dense<0.000000e+00> : vector<16x128xf32>
    %79 = tpu.matmul %74, %78, %cst_30 {dimension_numbers = #tpu.dot_dimension_numbers<[1], [0], [0], [1], [0, 0, 1, 1], [], []>} : vector<16x128xbf16>, vector<128x128xbf16>, vector<16x128xf32> -> vector<16x128xf32>
    %80 = vector.broadcast %75 : vector<1x128xf32> to vector<16x128xf32>
    %81 = arith.addf %79, %80 : vector<16x128xf32>
    %82 = vector.shape_cast %81 : vector<16x128xf32> to vector<2x8x128xf32>
    %cst_31 = arith.constant dense<0.000000e+00> : vector<2x128xf32>
    %83 = vector.multi_reduction <add>, %82, %cst_31 [1] : vector<2x8x128xf32> to vector<2x128xf32>
    %84 = vector.shape_cast %83 : vector<2x128xf32> to vector<2x1x128xf32>
    %cst_32 = arith.constant 8.000000e+00 : f32
    %85 = vector.broadcast %cst_32 : f32 to vector<2x1x128xf32>
    %86 = arith.divf %84, %85 : vector<2x1x128xf32>
    %87 = vector.broadcast %86 : vector<2x1x128xf32> to vector<2x8x128xf32>
    %88 = arith.subf %82, %87 : vector<2x8x128xf32>
    %89 = arith.mulf %88, %88 : vector<2x8x128xf32>
    %cst_33 = arith.constant dense<0.000000e+00> : vector<2x128xf32>
    %90 = vector.multi_reduction <add>, %89, %cst_33 [1] : vector<2x8x128xf32> to vector<2x128xf32>
    %91 = vector.shape_cast %90 : vector<2x128xf32> to vector<2x1x128xf32>
    %cst_34 = arith.constant 8.000000e+00 : f32
    %92 = vector.broadcast %cst_34 : f32 to vector<2x1x128xf32>
    %93 = arith.divf %91, %92 : vector<2x1x128xf32>
    %cst_35 = arith.constant 9.99999974E-6 : f32
    %94 = vector.broadcast %cst_35 : f32 to vector<2x1x128xf32>
    %95 = arith.addf %93, %94 : vector<2x1x128xf32>
    %96 = math.rsqrt %95 : vector<2x1x128xf32>
    %97 = vector.shape_cast %76 : vector<1x128xf32> to vector<1x1x128xf32>
    %98 = vector.broadcast %97 : vector<1x1x128xf32> to vector<2x1x128xf32>
    %99 = arith.mulf %98, %96 : vector<2x1x128xf32>
    %100 = arith.mulf %86, %99 : vector<2x1x128xf32>
    %101 = vector.shape_cast %77 : vector<1x128xf32> to vector<1x1x128xf32>
    %102 = vector.broadcast %101 : vector<1x1x128xf32> to vector<2x1x128xf32>
    %103 = arith.subf %102, %100 : vector<2x1x128xf32>
    %104 = vector.broadcast %99 : vector<2x1x128xf32> to vector<2x8x128xf32>
    %105 = arith.mulf %82, %104 : vector<2x8x128xf32>
    %106 = vector.broadcast %103 : vector<2x1x128xf32> to vector<2x8x128xf32>
    %107 = arith.addf %105, %106 : vector<2x8x128xf32>
    %cst_36 = arith.constant 0.000000e+00 : f32
    %108 = vector.broadcast %cst_36 : f32 to vector<2x8x128xf32>
    %109 = arith.maximumf %107, %108 : vector<2x8x128xf32>
    %110 = vector.shape_cast %109 : vector<2x8x128xf32> to vector<16x128xf32>
    %111 = arith.truncf %110 : vector<16x128xf32> to vector<16x128xbf16>
    %c0_37 = arith.constant 0 : index
    %c1536 = arith.constant 1536 : index
    %112 = vector.load %arg7[%c0_37, %c1536] : memref<1x2048xf32, #tpu.memory_space<vmem>>, vector<1x128xf32>
    %c0_38 = arith.constant 0 : index
    %c1664 = arith.constant 1664 : index
    %113 = vector.load %arg7[%c0_38, %c1664] : memref<1x2048xf32, #tpu.memory_space<vmem>>, vector<1x128xf32>
    %c0_39 = arith.constant 0 : index
    %c1792 = arith.constant 1792 : index
    %114 = vector.load %arg7[%c0_39, %c1792] : memref<1x2048xf32, #tpu.memory_space<vmem>>, vector<1x128xf32>
    %c0_40 = arith.constant 0 : index
    %c0_41 = arith.constant 0 : index
    %115 = vector.load %arg5[%c0_40, %c0_41] : memref<128x128xbf16, #tpu.memory_space<vmem>>, vector<128x128xbf16>
    %cst_42 = arith.constant dense<0.000000e+00> : vector<16x128xf32>
    %116 = tpu.matmul %111, %115, %cst_42 {dimension_numbers = #tpu.dot_dimension_numbers<[1], [0], [0], [1], [0, 0, 1, 1], [], []>} : vector<16x128xbf16>, vector<128x128xbf16>, vector<16x128xf32> -> vector<16x128xf32>
    %117 = vector.broadcast %112 : vector<1x128xf32> to vector<16x128xf32>
    %118 = arith.addf %116, %117 : vector<16x128xf32>
    %119 = vector.shape_cast %118 : vector<16x128xf32> to vector<2x8x128xf32>
    %cst_43 = arith.constant dense<0.000000e+00> : vector<2x128xf32>
    %120 = vector.multi_reduction <add>, %119, %cst_43 [1] : vector<2x8x128xf32> to vector<2x128xf32>
    %121 = vector.shape_cast %120 : vector<2x128xf32> to vector<2x1x128xf32>
    %cst_44 = arith.constant 8.000000e+00 : f32
    %122 = vector.broadcast %cst_44 : f32 to vector<2x1x128xf32>
    %123 = arith.divf %121, %122 : vector<2x1x128xf32>
    %124 = vector.broadcast %123 : vector<2x1x128xf32> to vector<2x8x128xf32>
    %125 = arith.subf %119, %124 : vector<2x8x128xf32>
    %126 = arith.mulf %125, %125 : vector<2x8x128xf32>
    %cst_45 = arith.constant dense<0.000000e+00> : vector<2x128xf32>
    %127 = vector.multi_reduction <add>, %126, %cst_45 [1] : vector<2x8x128xf32> to vector<2x128xf32>
    %128 = vector.shape_cast %127 : vector<2x128xf32> to vector<2x1x128xf32>
    %cst_46 = arith.constant 8.000000e+00 : f32
    %129 = vector.broadcast %cst_46 : f32 to vector<2x1x128xf32>
    %130 = arith.divf %128, %129 : vector<2x1x128xf32>
    %cst_47 = arith.constant 9.99999974E-6 : f32
    %131 = vector.broadcast %cst_47 : f32 to vector<2x1x128xf32>
    %132 = arith.addf %130, %131 : vector<2x1x128xf32>
    %133 = math.rsqrt %132 : vector<2x1x128xf32>
    %134 = vector.shape_cast %113 : vector<1x128xf32> to vector<1x1x128xf32>
    %135 = vector.broadcast %134 : vector<1x1x128xf32> to vector<2x1x128xf32>
    %136 = arith.mulf %135, %133 : vector<2x1x128xf32>
    %137 = arith.mulf %123, %136 : vector<2x1x128xf32>
    %138 = vector.shape_cast %114 : vector<1x128xf32> to vector<1x1x128xf32>
    %139 = vector.broadcast %138 : vector<1x1x128xf32> to vector<2x1x128xf32>
    %140 = arith.subf %139, %137 : vector<2x1x128xf32>
    %141 = vector.broadcast %136 : vector<2x1x128xf32> to vector<2x8x128xf32>
    %142 = arith.mulf %119, %141 : vector<2x8x128xf32>
    %143 = vector.broadcast %140 : vector<2x1x128xf32> to vector<2x8x128xf32>
    %144 = arith.addf %142, %143 : vector<2x8x128xf32>
    %cst_48 = arith.constant 0.000000e+00 : f32
    %145 = vector.broadcast %cst_48 : f32 to vector<2x8x128xf32>
    %146 = arith.maximumf %144, %145 : vector<2x8x128xf32>
    %147 = vector.shape_cast %146 : vector<2x8x128xf32> to vector<16x128xf32>
    %148 = arith.truncf %147 : vector<16x128xf32> to vector<16x128xbf16>
    %c0_49 = arith.constant 0 : index
    %c1920 = arith.constant 1920 : index
    %149 = vector.load %arg7[%c0_49, %c1920] : memref<1x2048xf32, #tpu.memory_space<vmem>>, vector<1x128xf32>
    %c0_50 = arith.constant 0 : index
    %c0_51 = arith.constant 0 : index
    %150 = vector.load %arg6[%c0_50, %c0_51] : memref<128x128xbf16, #tpu.memory_space<vmem>>, vector<128x128xbf16>
    %cst_52 = arith.constant dense<0.000000e+00> : vector<16x128xf32>
    %151 = tpu.matmul %148, %150, %cst_52 {dimension_numbers = #tpu.dot_dimension_numbers<[1], [0], [0], [1], [0, 0, 1, 1], [], []>} : vector<16x128xbf16>, vector<128x128xbf16>, vector<16x128xf32> -> vector<16x128xf32>
    %152 = vector.broadcast %149 : vector<1x128xf32> to vector<16x128xf32>
    %153 = arith.addf %151, %152 : vector<16x128xf32>
    %c0_53 = arith.constant 0 : index
    %c0_54 = arith.constant 0 : index
    %154 = vector.load %arg8[%c0_53, %c0_54] : memref<16x128xf32, #tpu.memory_space<vmem>>, vector<16x128xf32>
    tpu.vector_store %arg8[%c0_53, %c0_54], %153 {strides = array<i32>} : memref<16x128xf32, #tpu.memory_space<vmem>>, vector<16x128xf32>,
    return
  }
  func.func @transform_0(%arg0: i32) -> (i32, i32) {
    %c0_i32 = arith.constant 0 : i32
    %c0_i32_0 = arith.constant 0 : i32
    return %arg0, %c0_i32 : i32, i32
  }
  func.func @transform_1(%arg0: i32) -> (i32, i32) {
    %c0_i32 = arith.constant 0 : i32
    %c0_i32_0 = arith.constant 0 : i32
    %c0_i32_1 = arith.constant 0 : i32
    return %c0_i32, %c0_i32_0 : i32, i32
  }
  func.func @transform_2(%arg0: i32) -> (i32, i32) {
    %c0_i32 = arith.constant 0 : i32
    %c0_i32_0 = arith.constant 0 : i32
    %c0_i32_1 = arith.constant 0 : i32
    return %c0_i32, %c0_i32_0 : i32, i32
  }
  func.func @transform_3(%arg0: i32) -> (i32, i32) {
    %c0_i32 = arith.constant 0 : i32
    %c0_i32_0 = arith.constant 0 : i32
    %c0_i32_1 = arith.constant 0 : i32
    return %c0_i32, %c0_i32_0 : i32, i32
  }
  func.func @transform_4(%arg0: i32) -> (i32, i32) {
    %c0_i32 = arith.constant 0 : i32
    %c0_i32_0 = arith.constant 0 : i32
    %c0_i32_1 = arith.constant 0 : i32
    return %c0_i32, %c0_i32_0 : i32, i32
  }
  func.func @transform_5(%arg0: i32) -> (i32, i32) {
    %c0_i32 = arith.constant 0 : i32
    %c0_i32_0 = arith.constant 0 : i32
    %c0_i32_1 = arith.constant 0 : i32
    return %c0_i32, %c0_i32_0 : i32, i32
  }
  func.func @transform_6(%arg0: i32) -> (i32, i32) {
    %c0_i32 = arith.constant 0 : i32
    %c0_i32_0 = arith.constant 0 : i32
    %c0_i32_1 = arith.constant 0 : i32
    return %c0_i32, %c0_i32_0 : i32, i32
  }
  func.func @transform_7(%arg0: i32) -> (i32, i32) {
    %c0_i32 = arith.constant 0 : i32
    %c0_i32_0 = arith.constant 0 : i32
    return %arg0, %c0_i32 : i32, i32
  }
}

module attributes {stable_mosaic.version = 11 : i64} {
  func.func @_mlp_kernel(%arg0: i32, %arg1: memref<16x896xbf16, #tpu.memory_space<vmem>>, %arg2: memref<896x256xbf16, #tpu.memory_space<vmem>>, %arg3: memref<256x128xbf16, #tpu.memory_space<vmem>>, %arg4: memref<128x128xbf16, #tpu.memory_space<vmem>>, %arg5: memref<128x128xbf16, #tpu.memory_space<vmem>>, %arg6: memref<128x128xbf16, #tpu.memory_space<vmem>>, %arg7: memref<1x2048xf32, #tpu.memory_space<vmem>>, %arg8: memref<16x128xf32, #tpu.memory_space<vmem>>) attributes {dimension_semantics = [#tpu.dimension_semantics<parallel>], iteration_bounds = array<i64: 2>, scalar_prefetch = 0 : i64, scratch_operands = 0 : i64, tpu.core_type = #tpu.core_type<tc>, window_params = [{transform_indices = @transform_0, window_bounds = array<i64: 16, 896>}, {pipeline_mode = #tpu.pipeline_mode<synchronous>, transform_indices = @transform_1, window_bounds = array<i64: 896, 256>}, {pipeline_mode = #tpu.pipeline_mode<synchronous>, transform_indices = @transform_2, window_bounds = array<i64: 256, 128>}, {pipeline_mode = #tpu.pipeline_mode<synchronous>, transform_indices = @transform_3, window_bounds = array<i64: 128, 128>}, {pipeline_mode = #tpu.pipeline_mode<synchronous>, transform_indices = @transform_4, window_bounds = array<i64: 128, 128>}, {pipeline_mode = #tpu.pipeline_mode<synchronous>, transform_indices = @transform_5, window_bounds = array<i64: 128, 128>}, {pipeline_mode = #tpu.pipeline_mode<synchronous>, transform_indices = @transform_6, window_bounds = array<i64: 1, 2048>}, {transform_indices = @transform_7, window_bounds = array<i64: 16, 128>}]} {
    %c0 = arith.constant 0 : index
    %c0_0 = arith.constant 0 : index
    %0 = vector.load %arg1[%c0, %c0_0] : memref<16x896xbf16, #tpu.memory_space<vmem>>, vector<16x896xbf16>
    %c0_1 = arith.constant 0 : index
    %c0_2 = arith.constant 0 : index
    %1 = vector.load %arg7[%c0_1, %c0_2] : memref<1x2048xf32, #tpu.memory_space<vmem>>, vector<1x256xf32>
    %c0_3 = arith.constant 0 : index
    %c256 = arith.constant 256 : index
    %2 = vector.load %arg7[%c0_3, %c256] : memref<1x2048xf32, #tpu.memory_space<vmem>>, vector<1x256xf32>
    %c0_4 = arith.constant 0 : index
    %c512 = arith.constant 512 : index
    %3 = vector.load %arg7[%c0_4, %c512] : memref<1x2048xf32, #tpu.memory_space<vmem>>, vector<1x256xf32>
    %c0_5 = arith.constant 0 : index
    %c0_6 = arith.constant 0 : index
    %4 = vector.load %arg2[%c0_5, %c0_6] : memref<896x256xbf16, #tpu.memory_space<vmem>>, vector<896x256xbf16>
    %cst = arith.constant dense<0.000000e+00> : vector<16x256xf32>
    %5 = tpu.matmul %0, %4, %cst {dimension_numbers = #tpu.dot_dimension_numbers<[1], [0], [0], [1], [0, 0, 1, 1], [], []>} : vector<16x896xbf16>, vector<896x256xbf16>, vector<16x256xf32> -> vector<16x256xf32>
    %6 = vector.broadcast %1 : vector<1x256xf32> to vector<16x256xf32>
    %7 = arith.addf %5, %6 : vector<16x256xf32>
    %8 = vector.shape_cast %7 : vector<16x256xf32> to vector<2x8x256xf32>
    %cst_7 = arith.constant dense<0.000000e+00> : vector<2x256xf32>
    %9 = vector.multi_reduction <add>, %8, %cst_7 [1] : vector<2x8x256xf32> to vector<2x256xf32>
    %10 = vector.shape_cast %9 : vector<2x256xf32> to vector<2x1x256xf32>
    %cst_8 = arith.constant 8.000000e+00 : f32
    %11 = vector.broadcast %cst_8 : f32 to vector<2x1x256xf32>
    %12 = arith.divf %10, %11 : vector<2x1x256xf32>
    %13 = vector.broadcast %12 : vector<2x1x256xf32> to vector<2x8x256xf32>
    %14 = arith.subf %8, %13 : vector<2x8x256xf32>
    %15 = arith.mulf %14, %14 : vector<2x8x256xf32>
    %cst_9 = arith.constant dense<0.000000e+00> : vector<2x256xf32>
    %16 = vector.multi_reduction <add>, %15, %cst_9 [1] : vector<2x8x256xf32> to vector<2x256xf32>
    %17 = vector.shape_cast %16 : vector<2x256xf32> to vector<2x1x256xf32>
    %cst_10 = arith.constant 8.000000e+00 : f32
    %18 = vector.broadcast %cst_10 : f32 to vector<2x1x256xf32>
    %19 = arith.divf %17, %18 : vector<2x1x256xf32>
    %cst_11 = arith.constant 9.99999974E-6 : f32
    %20 = vector.broadcast %cst_11 : f32 to vector<2x1x256xf32>
    %21 = arith.addf %19, %20 : vector<2x1x256xf32>
    %22 = math.rsqrt %21 : vector<2x1x256xf32>
    %23 = vector.shape_cast %2 : vector<1x256xf32> to vector<1x1x256xf32>
    %24 = vector.broadcast %23 : vector<1x1x256xf32> to vector<2x1x256xf32>
    %25 = arith.mulf %24, %22 : vector<2x1x256xf32>
    %26 = arith.mulf %12, %25 : vector<2x1x256xf32>
    %27 = vector.shape_cast %3 : vector<1x256xf32> to vector<1x1x256xf32>
    %28 = vector.broadcast %27 : vector<1x1x256xf32> to vector<2x1x256xf32>
    %29 = arith.subf %28, %26 : vector<2x1x256xf32>
    %30 = vector.broadcast %25 : vector<2x1x256xf32> to vector<2x8x256xf32>
    %31 = arith.mulf %8, %30 : vector<2x8x256xf32>
    %32 = vector.broadcast %29 : vector<2x1x256xf32> to vector<2x8x256xf32>
    %33 = arith.addf %31, %32 : vector<2x8x256xf32>
    %cst_12 = arith.constant 0.000000e+00 : f32
    %34 = vector.broadcast %cst_12 : f32 to vector<2x8x256xf32>
    %35 = arith.maximumf %33, %34 : vector<2x8x256xf32>
    %36 = vector.shape_cast %35 : vector<2x8x256xf32> to vector<16x256xf32>
    %37 = arith.truncf %36 : vector<16x256xf32> to vector<16x256xbf16>
    %c0_13 = arith.constant 0 : index
    %c768 = arith.constant 768 : index
    %38 = vector.load %arg7[%c0_13, %c768] : memref<1x2048xf32, #tpu.memory_space<vmem>>, vector<1x128xf32>
    %c0_14 = arith.constant 0 : index
    %c896 = arith.constant 896 : index
    %39 = vector.load %arg7[%c0_14, %c896] : memref<1x2048xf32, #tpu.memory_space<vmem>>, vector<1x128xf32>
    %c0_15 = arith.constant 0 : index
    %c1024 = arith.constant 1024 : index
    %40 = vector.load %arg7[%c0_15, %c1024] : memref<1x2048xf32, #tpu.memory_space<vmem>>, vector<1x128xf32>
    %c0_16 = arith.constant 0 : index
    %c0_17 = arith.constant 0 : index
    %41 = vector.load %arg3[%c0_16, %c0_17] : memref<256x128xbf16, #tpu.memory_space<vmem>>, vector<256x128xbf16>
    %cst_18 = arith.constant dense<0.000000e+00> : vector<16x128xf32>
    %42 = tpu.matmul %37, %41, %cst_18 {dimension_numbers = #tpu.dot_dimension_numbers<[1], [0], [0], [1], [0, 0, 1, 1], [], []>} : vector<16x256xbf16>, vector<256x128xbf16>, vector<16x128xf32> -> vector<16x128xf32>
    %43 = vector.broadcast %38 : vector<1x128xf32> to vector<16x128xf32>
    %44 = arith.addf %42, %43 : vector<16x128xf32>
    %45 = vector.shape_cast %44 : vector<16x128xf32> to vector<2x8x128xf32>
    %cst_19 = arith.constant dense<0.000000e+00> : vector<2x128xf32>
    %46 = vector.multi_reduction <add>, %45, %cst_19 [1] : vector<2x8x128xf32> to vector<2x128xf32>
    %47 = vector.shape_cast %46 : vector<2x128xf32> to vector<2x1x128xf32>
    %cst_20 = arith.constant 8.000000e+00 : f32
    %48 = vector.broadcast %cst_20 : f32 to vector<2x1x128xf32>
    %49 = arith.divf %47, %48 : vector<2x1x128xf32>
    %50 = vector.broadcast %49 : vector<2x1x128xf32> to vector<2x8x128xf32>
    %51 = arith.subf %45, %50 : vector<2x8x128xf32>
    %52 = arith.mulf %51, %51 : vector<2x8x128xf32>
    %cst_21 = arith.constant dense<0.000000e+00> : vector<2x128xf32>
    %53 = vector.multi_reduction <add>, %52, %cst_21 [1] : vector<2x8x128xf32> to vector<2x128xf32>
    %54 = vector.shape_cast %53 : vector<2x128xf32> to vector<2x1x128xf32>
    %cst_22 = arith.constant 8.000000e+00 : f32
    %55 = vector.broadcast %cst_22 : f32 to vector<2x1x128xf32>
    %56 = arith.divf %54, %55 : vector<2x1x128xf32>
    %cst_23 = arith.constant 9.99999974E-6 : f32
    %57 = vector.broadcast %cst_23 : f32 to vector<2x1x128xf32>
    %58 = arith.addf %56, %57 : vector<2x1x128xf32>
    %59 = math.rsqrt %58 : vector<2x1x128xf32>
    %60 = vector.shape_cast %39 : vector<1x128xf32> to vector<1x1x128xf32>
    %61 = vector.broadcast %60 : vector<1x1x128xf32> to vector<2x1x128xf32>
    %62 = arith.mulf %61, %59 : vector<2x1x128xf32>
    %63 = arith.mulf %49, %62 : vector<2x1x128xf32>
    %64 = vector.shape_cast %40 : vector<1x128xf32> to vector<1x1x128xf32>
    %65 = vector.broadcast %64 : vector<1x1x128xf32> to vector<2x1x128xf32>
    %66 = arith.subf %65, %63 : vector<2x1x128xf32>
    %67 = vector.broadcast %62 : vector<2x1x128xf32> to vector<2x8x128xf32>
    %68 = arith.mulf %45, %67 : vector<2x8x128xf32>
    %69 = vector.broadcast %66 : vector<2x1x128xf32> to vector<2x8x128xf32>
    %70 = arith.addf %68, %69 : vector<2x8x128xf32>
    %cst_24 = arith.constant 0.000000e+00 : f32
    %71 = vector.broadcast %cst_24 : f32 to vector<2x8x128xf32>
    %72 = arith.maximumf %70, %71 : vector<2x8x128xf32>
    %73 = vector.shape_cast %72 : vector<2x8x128xf32> to vector<16x128xf32>
    %74 = arith.truncf %73 : vector<16x128xf32> to vector<16x128xbf16>
    %c0_25 = arith.constant 0 : index
    %c1152 = arith.constant 1152 : index
    %75 = vector.load %arg7[%c0_25, %c1152] : memref<1x2048xf32, #tpu.memory_space<vmem>>, vector<1x128xf32>
    %c0_26 = arith.constant 0 : index
    %c1280 = arith.constant 1280 : index
    %76 = vector.load %arg7[%c0_26, %c1280] : memref<1x2048xf32, #tpu.memory_space<vmem>>, vector<1x128xf32>
    %c0_27 = arith.constant 0 : index
    %c1408 = arith.constant 1408 : index
    %77 = vector.load %arg7[%c0_27, %c1408] : memref<1x2048xf32, #tpu.memory_space<vmem>>, vector<1x128xf32>
    %c0_28 = arith.constant 0 : index
    %c0_29 = arith.constant 0 : index
    %78 = vector.load %arg4[%c0_28, %c0_29] : memref<128x128xbf16, #tpu.memory_space<vmem>>, vector<128x128xbf16>
    %cst_30 = arith.constant dense<0.000000e+00> : vector<16x128xf32>
    %79 = tpu.matmul %74, %78, %cst_30 {dimension_numbers = #tpu.dot_dimension_numbers<[1], [0], [0], [1], [0, 0, 1, 1], [], []>} : vector<16x128xbf16>, vector<128x128xbf16>, vector<16x128xf32> -> vector<16x128xf32>
    %80 = vector.broadcast %75 : vector<1x128xf32> to vector<16x128xf32>
    %81 = arith.addf %79, %80 : vector<16x128xf32>
    %82 = vector.shape_cast %81 : vector<16x128xf32> to vector<2x8x128xf32>
    %cst_31 = arith.constant dense<0.000000e+00> : vector<2x128xf32>
    %83 = vector.multi_reduction <add>, %82, %cst_31 [1] : vector<2x8x128xf32> to vector<2x128xf32>
    %84 = vector.shape_cast %83 : vector<2x128xf32> to vector<2x1x128xf32>
    %cst_32 = arith.constant 8.000000e+00 : f32
    %85 = vector.broadcast %cst_32 : f32 to vector<2x1x128xf32>
    %86 = arith.divf %84, %85 : vector<2x1x128xf32>
    %87 = vector.broadcast %86 : vector<2x1x128xf32> to vector<2x8x128xf32>
    %88 = arith.subf %82, %87 : vector<2x8x128xf32>
    %89 = arith.mulf %88, %88 : vector<2x8x128xf32>
    %cst_33 = arith.constant dense<0.000000e+00> : vector<2x128xf32>
    %90 = vector.multi_reduction <add>, %89, %cst_33 [1] : vector<2x8x128xf32> to vector<2x128xf32>
    %91 = vector.shape_cast %90 : vector<2x128xf32> to vector<2x1x128xf32>
    %cst_34 = arith.constant 8.000000e+00 : f32
    %92 = vector.broadcast %cst_34 : f32 to vector<2x1x128xf32>
    %93 = arith.divf %91, %92 : vector<2x1x128xf32>
    %cst_35 = arith.constant 9.99999974E-6 : f32
    %94 = vector.broadcast %cst_35 : f32 to vector<2x1x128xf32>
    %95 = arith.addf %93, %94 : vector<2x1x128xf32>
    %96 = math.rsqrt %95 : vector<2x1x128xf32>
    %97 = vector.shape_cast %76 : vector<1x128xf32> to vector<1x1x128xf32>
    %98 = vector.broadcast %97 : vector<1x1x128xf32> to vector<2x1x128xf32>
    %99 = arith.mulf %98, %96 : vector<2x1x128xf32>
    %100 = arith.mulf %86, %99 : vector<2x1x128xf32>
    %101 = vector.shape_cast %77 : vector<1x128xf32> to vector<1x1x128xf32>
    %102 = vector.broadcast %101 : vector<1x1x128xf32> to vector<2x1x128xf32>
    %103 = arith.subf %102, %100 : vector<2x1x128xf32>
    %104 = vector.broadcast %99 : vector<2x1x128xf32> to vector<2x8x128xf32>
    %105 = arith.mulf %82, %104 : vector<2x8x128xf32>
    %106 = vector.broadcast %103 : vector<2x1x128xf32> to vector<2x8x128xf32>
    %107 = arith.addf %105, %106 : vector<2x8x128xf32>
    %cst_36 = arith.constant 0.000000e+00 : f32
    %108 = vector.broadcast %cst_36 : f32 to vector<2x8x128xf32>
    %109 = arith.maximumf %107, %108 : vector<2x8x128xf32>
    %110 = vector.shape_cast %109 : vector<2x8x128xf32> to vector<16x128xf32>
    %111 = arith.truncf %110 : vector<16x128xf32> to vector<16x128xbf16>
    %c0_37 = arith.constant 0 : index
    %c1536 = arith.constant 1536 : index
    %112 = vector.load %arg7[%c0_37, %c1536] : memref<1x2048xf32, #tpu.memory_space<vmem>>, vector<1x128xf32>
    %c0_38 = arith.constant 0 : index
    %c1664 = arith.constant 1664 : index
    %113 = vector.load %arg7[%c0_38, %c1664] : memref<1x2048xf32, #tpu.memory_space<vmem>>, vector<1x128xf32>
    %c0_39 = arith.constant 0 : index
    %c1792 = arith.constant 1792 : index
    %114 = vector.load %arg7[%c0_39, %c1792] : memref<1x2048xf32, #tpu.memory_space<vmem>>, vector<1x128xf32>
    %c0_40 = arith.constant 0 : index
    %c0_41 = arith.constant 0 : index
    %115 = vector.load %arg5[%c0_40, %c0_41] : memref<128x128xbf16, #tpu.memory_space<vmem>>, vector<128x128xbf16>
    %cst_42 = arith.constant dense<0.000000e+00> : vector<16x128xf32>
    %116 = tpu.matmul %111, %115, %cst_42 {dimension_numbers = #tpu.dot_dimension_numbers<[1], [0], [0], [1], [0, 0, 1, 1], [], []>} : vector<16x128xbf16>, vector<128x128xbf16>, vector<16x128xf32> -> vector<16x128xf32>
    %117 = vector.broadcast %112 : vector<1x128xf32> to vector<16x128xf32>
    %118 = arith.addf %116, %117 : vector<16x128xf32>
    %119 = vector.shape_cast %118 : vector<16x128xf32> to vector<2x8x128xf32>
    %cst_43 = arith.constant dense<0.000000e+00> : vector<2x128xf32>
    %120 = vector.multi_reduction <add>, %119, %cst_43 [1] : vector<2x8x128xf32> to vector<2x128xf32>
    %121 = vector.shape_cast %120 : vector<2x128xf32> to vector<2x1x128xf32>
    %cst_44 = arith.constant 8.000000e+00 : f32
    %122 = vector.broadcast %cst_44 : f32 to vector<2x1x128xf32>
    %123 = arith.divf %121, %122 : vector<2x1x128xf32>
    %124 = vector.broadcast %123 : vector<2x1x128xf32> to vector<2x8x128xf32>
    %125 = arith.subf %119, %124 : vector<2x8x128xf32>
    %126 = arith.mulf %125, %125 : vector<2x8x128xf32>
    %cst_45 = arith.constant dense<0.000000e+00> : vector<2x128xf32>
    %127 = vector.multi_reduction <add>, %126, %cst_45 [1] : vector<2x8x128xf32> to vector<2x128xf32>
    %128 = vector.shape_cast %127 : vector<2x128xf32> to vector<2x1x128xf32>
    %cst_46 = arith.constant 8.000000e+00 : f32
    %129 = vector.broadcast %cst_46 : f32 to vector<2x1x128xf32>
    %130 = arith.divf %128, %129 : vector<2x1x128xf32>
    %cst_47 = arith.constant 9.99999974E-6 : f32
    %131 = vector.broadcast %cst_47 : f32 to vector<2x1x128xf32>
    %132 = arith.addf %130, %131 : vector<2x1x128xf32>
    %133 = math.rsqrt %132 : vector<2x1x128xf32>
    %134 = vector.shape_cast %113 : vector<1x128xf32> to vector<1x1x128xf32>
    %135 = vector.broadcast %134 : vector<1x1x128xf32> to vector<2x1x128xf32>
    %136 = arith.mulf %135, %133 : vector<2x1x128xf32>
    %137 = arith.mulf %123, %136 : vector<2x1x128xf32>
    %138 = vector.shape_cast %114 : vector<1x128xf32> to vector<1x1x128xf32>
    %139 = vector.broadcast %138 : vector<1x1x128xf32> to vector<2x1x128xf32>
    %140 = arith.subf %139, %137 : vector<2x1x128xf32>
    %141 = vector.broadcast %136 : vector<2x1x128xf32> to vector<2x8x128xf32>
    %142 = arith.mulf %119, %141 : vector<2x8x128xf32>
    %143 = vector.broadcast %140 : vector<2x1x128xf32> to vector<2x8x128xf32>
    %144 = arith.addf %142, %143 : vector<2x8x128xf32>
    %cst_48 = arith.constant 0.000000e+00 : f32
    %145 = vector.broadcast %cst_48 : f32 to vector<2x8x128xf32>
    %146 = arith.maximumf %144, %145 : vector<2x8x128xf32>
    %147 = vector.shape_cast %146 : vector<2x8x128xf32> to vector<16x128xf32>
    %148 = arith.truncf %147 : vector<16x128xf32> to vector<16x128xbf16>
    %c0_49 = arith.constant 0 : index
    %c1920 = arith.constant 1920 : index
    %149 = vector.load %arg7[%c0_49, %c1920] : memref<1x2048xf32, #tpu.memory_space<vmem>>, vector<1x128xf32>
    %c0_50 = arith.constant 0 : index
    %c0_51 = arith.constant 0 : index
    %150 = vector.load %arg6[%c0_50, %c0_51] : memref<128x128xbf16, #tpu.memory_space<vmem>>, vector<128x128xbf16>
    %cst_52 = arith.constant dense<0.000000e+00> : vector<16x128xf32>
    %151 = tpu.matmul %148, %150, %cst_52 {dimension_numbers = #tpu.dot_dimension_numbers<[1], [0], [0], [1], [0, 0, 1, 1], [], []>} : vector<16x128xbf16>, vector<128x128xbf16>, vector<16x128xf32> -> vector<16x128xf32>
    %152 = vector.broadcast %149 : vector<1x128xf32> to vector<16x128xf32>
    %153 = arith.addf %151, %152 : vector<16x128xf32>
    %c0_53 = arith.constant 0 : index
    %c0_54 = arith.constant 0 : index
    %154 = vector.load %arg8[%c0_53, %c0_54] : memref<16x128xf32, #tpu.memory_space<vmem>>, vector<16x128xf32>
    tpu.vector_store %arg8[%c0_53, %c0_54], %153 {strides = array<i32>} : memref<16x128xf32, #tpu.memory_space<vmem>>, vector<16x128xf32>,
    return
  }
  func.func @transform_0(%arg0: i32) -> (i32, i32) {
    %c0_i32 = arith.constant 0 : i32
    %c0_i32_0 = arith.constant 0 : i32
    return %arg0, %c0_i32 : i32, i32
  }
  func.func @transform_1(%arg0: i32) -> (i32, i32) {
    %c0_i32 = arith.constant 0 : i32
    %c0_i32_0 = arith.constant 0 : i32
    %c0_i32_1 = arith.constant 0 : i32
    return %c0_i32, %c0_i32_0 : i32, i32
  }
  func.func @transform_2(%arg0: i32) -> (i32, i32) {
    %c0_i32 = arith.constant 0 : i32
    %c0_i32_0 = arith.constant 0 : i32
    %c0_i32_1 = arith.constant 0 : i32
    return %c0_i32, %c0_i32_0 : i32, i32
  }
  func.func @transform_3(%arg0: i32) -> (i32, i32) {
    %c0_i32 = arith.constant 0 : i32
    %c0_i32_0 = arith.constant 0 : i32
    %c0_i32_1 = arith.constant 0 : i32
    return %c0_i32, %c0_i32_0 : i32, i32
  }
  func.func @transform_4(%arg0: i32) -> (i32, i32) {
    %c0_i32 = arith.constant 0 : i32
    %c0_i32_0 = arith.constant 0 : i32
    %c0_i32_1 = arith.constant 0 : i32
    return %c0_i32, %c0_i32_0 : i32, i32
  }
  func.func @transform_5(%arg0: i32) -> (i32, i32) {
    %c0_i32 = arith.constant 0 : i32
    %c0_i32_0 = arith.constant 0 : i32
    %c0_i32_1 = arith.constant 0 : i32
    return %c0_i32, %c0_i32_0 : i32, i32
  }
  func.func @transform_6(%arg0: i32) -> (i32, i32) {
    %c0_i32 = arith.constant 0 : i32
    %c0_i32_0 = arith.constant 0 : i32
    %c0_i32_1 = arith.constant 0 : i32
    return %c0_i32, %c0_i32_0 : i32, i32
  }
  func.func @transform_7(%arg0: i32) -> (i32, i32) {
    %c0_i32 = arith.constant 0 : i32
    %c0_i32_0 = arith.constant 0 : i32
    return %arg0, %c0_i32 : i32, i32
  }
}

</mosaic_0001>

<bundles_post_ra>
// kernel: custom-call
= control target key start
LH: loop header
LB: loop body
LE: loop exit
PB: predicated region body
PF: predicated region fallthrough
CT: control target
= control target key end

     0   :  { %s6_s0 = inlined_call_operand.vmem [shape: f32[2048], index: 0, kind: output, shape index: {}]  }

// kernel: _forward_tasks_impl.1
= control target key start
LH: loop header
LB: loop body
LE: loop exit
PB: predicated region body
PF: predicated region fallthrough
CT: control target
= control target key end

     0   :  { %s2796_s24 = smov 0   ;;  %s3422_s0 = inlined_call_operand.vmem [shape: bf16[32,896], index: 0, kind: input, shape index: {}]   ;;  %s3423_s1 = inlined_call_operand.vmem [shape: bf16[896,256], index: 1, kind: input, shape index: {}]   ;;  %s3424_s2 = inlined_call_operand.vmem [shape: bf16[256,128], index: 2, kind: input, shape index: {}]   ;;  %s3425_s3 = inlined_call_operand.vmem [shape: bf16[128,128], index: 3, kind: input, shape index: {}]   ;;  %s3426_s4 = inlined_call_operand.vmem [shape: bf16[128,128], index: 4, kind: input, shape index: {}]   ;;  %s3427_s5 = inlined_call_operand.vmem [shape: bf16[128,128], index: 5, kind: input, shape index: {}]   ;;  %s3428_s6 = inlined_call_operand.vmem [shape: f32[1,2048], index: 6, kind: input, shape index: {}]   ;;  %s3429_s7 = inlined_call_operand.vmem [shape: f32[32,128], index: 7, kind: output, shape index: {}]  }
   0x1 LB: > { %s2194_s25 = sadd.s32 4294967295, %s2750_s24   ;;  %p2198_p0 = scmp.ge.s32.totalorder %s2750_s24, 1  ;;  %s2750_s24 = sphi %s2796_s24, %s17_s24  }
   0x2   : > { %p239_p1 = scmp.lt.s32.totalorder %s2750_s24, 3 }
   0x4   : > { %p240_p2 = pnand %p2198_p0, %p239_p1 }
   0x5   : > { %v2506_v0 = vld [vmem:[%s3423_s1 + $0x104] ss:$8 sps:$4 sm:$0xff] (!%p240_p2)   ;;  %v2508_v1 = vld [vmem:[%s3423_s1 + $0x100] ss:$8 sps:$4 sm:$0xff] (!%p240_p2)   ;;  %v2509_v2 = vld [vmem:[%s3423_s1 + $0x114] ss:$8 sps:$4 sm:$0xff] (!%p240_p2)  }
   0x6   : > { %243 = sbr.rel (%p240_p2) target bundleno = 1502 (0x5de), region = 48  ;;  %1059 = vmatprep.subr.bf16.mxu0 (!%p240_p2), %v2506_v0  ;;  %v2511_v3 = vld [vmem:[%s3423_s1 + $0x110] ss:$8 sps:$4 sm:$0xff] (!%p240_p2)   ;;  %v2512_v4 = vld [vmem:[%s3423_s1 + $0x124] ss:$8 sps:$4 sm:$0xff] (!%p240_p2)   ;;  %s2199_s13 = sshll.u32 (!%p240_p2), %s2194_s25, 1 }
   0x7   : > { %1060 = vmatpush1.bf16.msra.mxu0 (!%p240_p2), %v2508_v1  ;;  %v2514_v5 = vld [vmem:[%s3423_s1 + $0x120] ss:$8 sps:$4 sm:$0xff] (!%p240_p2)   ;;  %p273_p3 = scmp.lt.s32.totalorder (!%p240_p2), %s2199_s13, 3  ;;  %v2515_v6 = vld [vmem:[%s3423_s1 + $0x134] ss:$8 sps:$4 sm:$0xff] (!%p240_p2)   ;;  %vm2755_vm0 = vmmov (!%p240_p2), 0  }
   0x8   : > { %1061 = vmatprep.subr.bf16.mxu0 (!%p240_p2), %v2509_v2  ;;  %v2517_v7 = vld [vmem:[%s3423_s1 + $0x130] ss:$8 sps:$4 sm:$0xff] (!%p240_p2)   ;;  %v2518_v8 = vld [vmem:[%s3423_s1 + $0x144] ss:$8 sps:$4 sm:$0xff] (!%p240_p2)   ;;  %v2520_v9 = vld [vmem:[%s3423_s1 + $0x140] ss:$8 sps:$4 sm:$0xff] (!%p240_p2)  }
   0x9   : > { %v2521_v10 = vld [vmem:[%s3423_s1 + $0x154] ss:$8 sps:$4 sm:$0xff] (!%p240_p2)   ;;  %v2523_v11 = vld [vmem:[%s3423_s1 + $0x150] ss:$8 sps:$4 sm:$0xff] (!%p240_p2)   ;;  %v2524_v12 = vld [vmem:[%s3423_s1 + $0x164] ss:$8 sps:$4 sm:$0xff] (!%p240_p2)  }
   0xa   : > { %v2526_v14 = vld [vmem:[%s3423_s1 + $0x160] ss:$8 sps:$4 sm:$0xff] (!%p240_p2)   ;;  %v2527_v15 = vld [vmem:[%s3423_s1 + $0x174] ss:$8 sps:$4 sm:$0xff] (!%p240_p2)   ;;  %v2529_v16 = vld [vmem:[%s3423_s1 + $0x170] ss:$8 sps:$4 sm:$0xff] (!%p240_p2)  }
   0xb   : > { %1062 = vmatpush1.bf16.msra.mxu0 (!%p240_p2), %v2511_v3  ;;  %v2530_v17 = vld [vmem:[%s3423_s1 + $0x184] ss:$8 sps:$4 sm:$0xff] (!%p240_p2)   ;;  %v2532_v18 = vld [vmem:[%s3423_s1 + $0x180] ss:$8 sps:$4 sm:$0xff] (!%p240_p2)   ;;  %v2533_v19 = vld [vmem:[%s3423_s1 + $0x194] ss:$8 sps:$4 sm:$0xff] (!%p240_p2)  }
   0xc   : > { %1063 = vmatprep.subr.bf16.mxu0 (!%p240_p2), %v2512_v4  ;;  %v2578_v20 = vld [vmem:[%s3423_s1 + $0x4] ss:$8 sps:$4 sm:$0xff] (!%p240_p2)   ;;  %v2580_v21 = vld [vmem:[%s3423_s1] ss:$8 sps:$4 sm:$0xff] (!%p240_p2)   ;;  %v2535_v22 = vld [vmem:[%s3423_s1 + $0x190] ss:$8 sps:$4 sm:$0xff] (!%p240_p2)  }
   0xd   : > { %s3431_s13 = smov (!%p273_p3, %s2199_s13), 3  ;;  %1016 = vmatprep.subr.bf16.mxu1 %v2578_v20  ;;  %v2584_v23 = vld [vmem:[%s3423_s1 + $0x14] ss:$8 sps:$4 sm:$0xff]   ;;  %v2586_v24 = vld [vmem:[%s3423_s1 + $0x10] ss:$8 sps:$4 sm:$0xff]  }
   0xe   : > { %s2493_s25 = smul.u32 28, %s3431_s13  ;;  %1017 = vmatpush1.bf16.msra.mxu1 %v2580_v21  ;;  %v2536_v25 = vld [vmem:[%s3423_s1 + $0x1a4] ss:$8 sps:$4 sm:$0xff]   ;;  %v2538_v26 = vld [vmem:[%s3423_s1 + $0x1a0] ss:$8 sps:$4 sm:$0xff]   ;;  %s2202_s8 = sshll.u32 %s3431_s13, 3 }
   0xf   : > { %1064 = vmatpush1.bf16.msra.mxu0 %v2514_v5  ;;  %1018 = vmatprep.subr.bf16.mxu1 %v2584_v23  ;;  %v2590_v27 = vld [vmem:[%s3423_s1 + $0x24] ss:$8 sps:$4 sm:$0xff]   ;;  %v2539_v28 = vld [vmem:[%s3423_s1 + $0x1b4] ss:$8 sps:$4 sm:$0xff]   ;;  %v2592_v29 = vld [vmem:[%s3423_s1 + $0x20] ss:$8 sps:$4 sm:$0xff]   ;;  %s283_s15 = scalar_lea.vmem %s3429_s7, %s2202_s8 }
  0x10   : > { %1065 = vmatprep.subr.bf16.mxu0 %v2515_v6  ;;  %s2846_s9 = scalar_lea.vmem %s3422_s0, %s2493_s25  ;;  %v2596_v30 = vld [vmem:[%s3423_s1 + $0x34] ss:$8 sps:$4 sm:$0xff]   ;;  %v2541_v31 = vld [vmem:[%s3423_s1 + $0x1b0] ss:$8 sps:$4 sm:$0xff]   ;;  %v2542_v32 = vld [vmem:[%s3423_s1 + $0x1c4] ss:$8 sps:$4 sm:$0xff]  }
  0x11   : > { %v2556_v13 = vld [vmem:[%s2846_s9 + $0xc] ss:$28 sps:$4 sm:$0xff]   ;;  %v2598_v33 = vld [vmem:[%s3423_s1 + $0x30] ss:$8 sps:$4 sm:$0xff]   ;;  %v2545_v36 = vld [vmem:[%s3423_s1 + $0x1d4] ss:$8 sps:$4 sm:$0xff]  }
  0x12   : > { %1091 = vmatprep.mubr.bf16.mxu0 %v2556_v13  ;;  %1019 = vmatpush1.bf16.msra.mxu1 %v2586_v24  ;;  %v2602_v34 = vld [vmem:[%s3423_s1 + $0x44] ss:$8 sps:$4 sm:$0xff]   ;;  %v2544_v35 = vld [vmem:[%s3423_s1 + $0x1c0] ss:$8 sps:$4 sm:$0xff]   ;;  %v2608_v38 = vld [vmem:[%s3423_s1 + $0x54] ss:$8 sps:$4 sm:$0xff]  }
  0x13   : > { %1066 = vmatpush1.bf16.msra.mxu0 %v2517_v7  ;;  %1020 = vmatprep.subr.bf16.mxu1 %v2590_v27  ;;  %v2604_v37 = vld [vmem:[%s3423_s1 + $0x40] ss:$8 sps:$4 sm:$0xff]   ;;  %v2547_v39 = vld [vmem:[%s3423_s1 + $0x1d0] ss:$8 sps:$4 sm:$0xff]   ;;  %v2548_v40 = vld [vmem:[%s3423_s1 + $0x1e4] ss:$8 sps:$4 sm:$0xff]  }
  0x14   : > { %1067 = vmatprep.subr.bf16.mxu0 %v2518_v8  ;;  %v2610_v41 = vld [vmem:[%s3423_s1 + $0x50] ss:$8 sps:$4 sm:$0xff]   ;;  %v2614_v42 = vld [vmem:[%s3423_s1 + $0x64] ss:$8 sps:$4 sm:$0xff]   ;;  %v2550_v43 = vld [vmem:[%s3423_s1 + $0x1e0] ss:$8 sps:$4 sm:$0xff]  }
  0x15   : > { %v2551_v44 = vld [vmem:[%s3423_s1 + $0x1f4] ss:$8 sps:$4 sm:$0xff]   ;;  %v2616_v45 = vld [vmem:[%s3423_s1 + $0x60] ss:$8 sps:$4 sm:$0xff]   ;;  %v2553_v47 = vld [vmem:[%s3423_s1 + $0x1f0] ss:$8 sps:$4 sm:$0xff]  }
  0x16   : > { %1021 = vmatpush1.bf16.msra.mxu1 %v2592_v29  ;;  %v2620_v46 = vld [vmem:[%s3423_s1 + $0x74] ss:$8 sps:$4 sm:$0xff]   ;;  %v2559_v48 = vld [vmem:[%s3423_s1 + $0x204] ss:$8 sps:$4 sm:$0xff]   ;;  %v2622_v49 = vld [vmem:[%s3423_s1 + $0x70] ss:$8 sps:$4 sm:$0xff]  }
  0x17   : > { %1068 = vmatpush1.bf16.msra.mxu0 %v2520_v9  ;;  %1022 = vmatprep.subr.bf16.mxu1 %v2596_v30  ;;  %v2626_v50 = vld [vmem:[%s3423_s1 + $0x84] ss:$8 sps:$4 sm:$0xff]   ;;  %v2557_v52 = vld [vmem:[%s3423_s1 + $0x200] ss:$8 sps:$4 sm:$0xff]   ;;  %v2562_v53 = vld [vmem:[%s3423_s1 + $0x214] ss:$8 sps:$4 sm:$0xff]  }
  0x18   : > { %1069 = vmatprep.subr.bf16.mxu0 %v2521_v10  ;;  %v2554_v51 = vld [vmem:[%s2846_s9 + $0x8] ss:$28 sps:$4 sm:$0xff]   ;;  %v2632_v55 = vld [vmem:[%s3423_s1 + $0x94] ss:$8 sps:$4 sm:$0xff]   ;;  %v2560_v57 = vld [vmem:[%s3423_s1 + $0x210] ss:$8 sps:$4 sm:$0xff]  }
  0x19   : > { %v2628_v54 = vld [vmem:[%s3423_s1 + $0x80] ss:$8 sps:$4 sm:$0xff]   ;;  %v2637_v56 = vld [vmem:[%s2846_s9 + $0x14] ss:$28 sps:$4 sm:$0xff]   ;;  %v2565_v58 = vld [vmem:[%s3423_s1 + $0x224] ss:$8 sps:$4 sm:$0xff]  }
  0x1a   : > { %1023 = vmatpush1.bf16.msra.mxu1 %v2598_v33  ;;  %v2634_v59 = vld [vmem:[%s3423_s1 + $0x90] ss:$8 sps:$4 sm:$0xff]   ;;  %v2641_v60 = vld [vmem:[%s3423_s1 + $0xa4] ss:$8 sps:$4 sm:$0xff]   ;;  %v2563_v61 = vld [vmem:[%s3423_s1 + $0x220] ss:$8 sps:$4 sm:$0xff]  }
  0x1b   : > { %1070 = vmatpush1.bf16.msra.mxu0 %v2523_v11  ;;  %1024 = vmatprep.subr.bf16.mxu1 %v2602_v34  ;;  %v2568_v62 = vld [vmem:[%s3423_s1 + $0x234] ss:$8 sps:$4 sm:$0xff]   ;;  %v2643_v63 = vld [vmem:[%s3423_s1 + $0xa0] ss:$8 sps:$4 sm:$0xff]   ;;  %v2566_v1 = vld [vmem:[%s3423_s1 + $0x230] ss:$8 sps:$4 sm:$0xff]  }
  0x1c   : > { %1071 = vmatprep.subr.bf16.mxu0 %v2524_v12  ;;  %v2647_v0 = vld [vmem:[%s3423_s1 + $0xb4] ss:$8 sps:$4 sm:$0xff]   ;;  %v2571_v2 = vld [vmem:[%s3423_s1 + $0x244] ss:$8 sps:$4 sm:$0xff]   ;;  %v2649_v3 = vld [vmem:[%s3423_s1 + $0xb0] ss:$8 sps:$4 sm:$0xff]  }
  0x1d   : > { %v2653_v4 = vld [vmem:[%s3423_s1 + $0xc4] ss:$8 sps:$4 sm:$0xff]   ;;  %v2569_v6 = vld [vmem:[%s3423_s1 + $0x240] ss:$8 sps:$4 sm:$0xff]   ;;  %v2574_v7 = vld [vmem:[%s3423_s1 + $0x254] ss:$8 sps:$4 sm:$0xff]  }
  0x1e   : > { %1025 = vmatpush1.bf16.msra.mxu1 %v2604_v37  ;;  %v2679_v5 = vld [vmem:[%s2846_s9 + $0x4] ss:$28 sps:$4 sm:$0xff]   ;;  %v2659_v9 = vld [vmem:[%s3423_s1 + $0xd4] ss:$8 sps:$4 sm:$0xff]   ;;  %v2572_v10 = vld [vmem:[%s3423_s1 + $0x250] ss:$8 sps:$4 sm:$0xff]  }
  0x1f   : > { %1072 = vmatpush1.bf16.msra.mxu0 %v2526_v14  ;;  %1026 = vmatprep.subr.bf16.mxu1 %v2608_v38  ;;  %v2655_v8 = vld [vmem:[%s3423_s1 + $0xc0] ss:$8 sps:$4 sm:$0xff]   ;;  %v2661_v11 = vld [vmem:[%s3423_s1 + $0xd0] ss:$8 sps:$4 sm:$0xff]   ;;  %v2577_v12 = vld [vmem:[%s3423_s1 + $0x264] ss:$8 sps:$4 sm:$0xff]  }
  0x20   : > { %1073 = vmatprep.subr.bf16.mxu0 %v2527_v15  ;;  %1048 = vmatprep.mubr.bf16.mxu1 %v2679_v5  ;;  %v2665_v13 = vld [vmem:[%s3423_s1 + $0xe4] ss:$8 sps:$4 sm:$0xff]   ;;  %v2575_v14 = vld [vmem:[%s3423_s1 + $0x260] ss:$8 sps:$4 sm:$0xff]   ;;  %v2595_v23 = vld [vmem:[%s3423_s1 + $0x294] ss:$8 sps:$4 sm:$0xff]  }
  0x21   : > { %v2667_v15 = vld [vmem:[%s3423_s1 + $0xe0] ss:$8 sps:$4 sm:$0xff]   ;;  %v2589_v20 = vld [vmem:[%s3423_s1 + $0x284] ss:$8 sps:$4 sm:$0xff]   ;;  %v2593_v24 = vld [vmem:[%s3423_s1 + $0x290] ss:$8 sps:$4 sm:$0xff]  }
  0x22   : > { %1027 = vmatpush1.bf16.msra.mxu1 %v2610_v41  ;;  %v2677_v21 = vld [vmem:[%s2846_s9] ss:$28 sps:$4 sm:$0xff]   ;;  %v2613_v29 = vld [vmem:[%s3423_s1 + $0x2c4] ss:$8 sps:$4 sm:$0xff]   ;;  %v2644_v41 = vld [vmem:[%s3423_s1 + $0x310] ss:$8 sps:$4 sm:$0xff]  }
  0x23   : > { %1074 = vmatpush1.bf16.msra.mxu0 %v2529_v16  ;;  %1028 = vmatprep.subr.bf16.mxu1 %v2614_v42  ;;  %v2583_v16 = vld [vmem:[%s3423_s1 + $0x274] ss:$8 sps:$4 sm:$0xff]   ;;  %v2611_v30 = vld [vmem:[%s3423_s1 + $0x2c0] ss:$8 sps:$4 sm:$0xff]   ;;  %v2625_v33 = vld [vmem:[%s3423_s1 + $0x2e4] ss:$8 sps:$4 sm:$0xff]  }
  0x24   : > { %1075 = vmatprep.subr.bf16.mxu0 %v2530_v17  ;;  %v2671_v17 = vld [vmem:[%s3423_s1 + $0xf4] ss:$8 sps:$4 sm:$0xff]   ;;  %v2623_v34 = vld [vmem:[%s3423_s1 + $0x2e0] ss:$8 sps:$4 sm:$0xff]   ;;  %v2640_v37 = vld [vmem:[%s3423_s1 + $0x304] ss:$8 sps:$4 sm:$0xff]  }
  0x25   : > { %v2607_v27 = vld [vmem:[%s3423_s1 + $0x2b4] ss:$8 sps:$4 sm:$0xff]   ;;  %v2635_v38 = vld [vmem:[%s2846_s9 + $0x10] ss:$28 sps:$4 sm:$0xff]   ;;  %v2752_v42 = vmov 0  }
  0x26   : > { %1029 = vmatpush1.bf16.msra.mxu1 %v2616_v45  ;;  %v2658_v45 = vld [vmem:[%s3423_s1 + $0x334] ss:$8 sps:$4 sm:$0xff]  }
  0x27   : > { %1076 = vmatpush1.bf16.msra.mxu0 %v2532_v18  ;;  %1030 = vmatprep.subr.bf16.mxu1 %v2620_v46  ;;  %v2581_v18 = vld [vmem:[%s3423_s1 + $0x270] ss:$8 sps:$4 sm:$0xff]  }
  0x28   : > { %1077 = vmatprep.subr.bf16.mxu0 %v2533_v19  ;;  %v2673_v19 = vld [vmem:[%s3423_s1 + $0xf0] ss:$8 sps:$4 sm:$0xff]  }
  0x29   : > { %v2656_v46 = vld [vmem:[%s3423_s1 + $0x330] ss:$8 sps:$4 sm:$0xff]  }
  0x2a   : > { %1031 = vmatpush1.bf16.msra.mxu1 %v2622_v49  ;;  %v2670_v49 = vld [vmem:[%s3423_s1 + $0x354] ss:$8 sps:$4 sm:$0xff]  }
  0x2b   : > { %1078 = vmatpush1.bf16.msra.mxu0 %v2535_v22  ;;  %1032 = vmatprep.subr.bf16.mxu1 %v2626_v50  ;;  %v2587_v22 = vld [vmem:[%s3423_s1 + $0x280] ss:$8 sps:$4 sm:$0xff]   ;;  %v2668_v50 = vld [vmem:[%s3423_s1 + $0x350] ss:$8 sps:$4 sm:$0xff]  }
  0x2c   : > { %1079 = vmatprep.subr.bf16.mxu0 %v2536_v25  ;;  %v2601_v25 = vld [vmem:[%s3423_s1 + $0x2a4] ss:$8 sps:$4 sm:$0xff]   ;;  %v2697_v5 = vld [vmem:[%s3424_s2 + $0x30] sm:$0xff]  }
  0x2e   : > { %1033 = vmatpush1.bf16.msra.mxu1 %v2628_v54  ;;  %v2680_v54 = vld [vmem:[%s3423_s1 + $0x370] ss:$8 sps:$4 sm:$0xff]  }
  0x2f   : > { %1080 = vmatpush1.bf16.msra.mxu0 %v2538_v26  ;;  %1034 = vmatprep.subr.bf16.mxu1 %v2632_v55  ;;  %v2599_v26 = vld [vmem:[%s3423_s1 + $0x2a0] ss:$8 sps:$4 sm:$0xff]   ;;  %v2683_v55 = vld [vmem:[%s2846_s9 + $0x18] ss:$28 sps:$4 sm:$0xff]  }
  0x30   : > { %1081 = vmatprep.subr.bf16.mxu0 %v2539_v28  ;;  %v2605_v28 = vld [vmem:[%s3423_s1 + $0x2b0] ss:$8 sps:$4 sm:$0xff]  }
  0x32   : > { %1035 = vmatpush1.bf16.msra.mxu1 %v2634_v59  ;;  %v2687_v59 = vld [vmem:[%s3424_s2 + $0x8] sm:$0xff]  }
  0x33   : > { %1082 = vmatpush1.bf16.msra.mxu0 %v2541_v31  ;;  %1036 = vmatprep.subr.bf16.mxu1 %v2641_v60  ;;  %v2619_v31 = vld [vmem:[%s3423_s1 + $0x2d4] ss:$8 sps:$4 sm:$0xff]  }
  0x34   : > { %1083 = vmatprep.subr.bf16.mxu0 %v2542_v32  ;;  %v2617_v32 = vld [vmem:[%s3423_s1 + $0x2d0] ss:$8 sps:$4 sm:$0xff]  }
  0x35   : > { %v2688_v60 = vld [vmem:[%s3424_s2 + $0x50] sm:$0xff]  }
  0x36   : > { %1037 = vmatpush1.bf16.msra.mxu1 %v2643_v63  ;;  %v2691_v63 = vld [vmem:[%s3424_s2 + $0x18] sm:$0xff]  }
  0x37   : > { %1084 = vmatpush1.bf16.msra.mxu0 %v2544_v35  ;;  %1038 = vmatprep.subr.bf16.mxu1 %v2647_v0  ;;  %v2631_v35 = vld [vmem:[%s3423_s1 + $0x2f4] ss:$8 sps:$4 sm:$0xff]   ;;  %v2692_v0 = vld [vmem:[%s3424_s2 + $0x60] sm:$0xff]  }
  0x38   : > { %1085 = vmatprep.subr.bf16.mxu0 %v2545_v36  ;;  %v2629_v36 = vld [vmem:[%s3423_s1 + $0x2f0] ss:$8 sps:$4 sm:$0xff]  }
  0x3a   : > { %1039 = vmatpush1.bf16.msra.mxu1 %v2649_v3  ;;  %v2695_v3 = vld [vmem:[%s3424_s2 + $0x28] sm:$0xff]  }
  0x3b   : > { %1086 = vmatpush1.bf16.msra.mxu0 %v2547_v39  ;;  %1040 = vmatprep.subr.bf16.mxu1 %v2653_v4  ;;  %v2638_v39 = vld [vmem:[%s3423_s1 + $0x300] ss:$8 sps:$4 sm:$0xff]   ;;  %v2696_v4 = vld [vmem:[%s3424_s2 + $0x70] sm:$0xff]  }
  0x3c   : > { %1087 = vmatprep.subr.bf16.mxu0 %v2548_v40  ;;  %v2646_v40 = vld [vmem:[%s3423_s1 + $0x314] ss:$8 sps:$4 sm:$0xff]  }
  0x3e   : > { %1041 = vmatpush1.bf16.msra.mxu1 %v2655_v8 }
  0x3f   : > { %1088 = vmatpush1.bf16.msra.mxu0 %v2550_v43  ;;  %1042 = vmatprep.subr.bf16.mxu1 %v2659_v9  ;;  %v2652_v43 = vld [vmem:[%s3423_s1 + $0x324] ss:$8 sps:$4 sm:$0xff]  }
  0x40   : > { %1089 = vmatprep.subr.bf16.mxu0 %v2551_v44  ;;  %v2650_v44 = vld [vmem:[%s3423_s1 + $0x320] ss:$8 sps:$4 sm:$0xff]  }
  0x42   : > { %1043 = vmatpush1.bf16.msra.mxu1 %v2661_v11  ;;  %v2699_v11 = vld [vmem:[%s3424_s2 + $0x38] sm:$0xff]  }
  0x43   : > { %1090 = vmatpush1.bf16.msra.mxu0 %v2553_v47  ;;  %1044 = vmatprep.subr.bf16.mxu1 %v2665_v13  ;;  %v2664_v47 = vld [vmem:[%s3423_s1 + $0x344] ss:$8 sps:$4 sm:$0xff]  }
  0x44   : > { %1102 = vmatprep.subr.bf16.mxu0 %v2559_v48  ;;  %v2662_v48 = vld [vmem:[%s3423_s1 + $0x340] ss:$8 sps:$4 sm:$0xff]  }
  0x46   : > { %1092 = vmatmul.mubr.bf16.vlgmr.msra.gmra.mrb[0].mxu0 %v2554_v51  ;;  %1045 = vmatpush1.bf16.msra.mxu1 %v2667_v15  ;;  %v2676_v51 = vld [vmem:[%s3423_s1 + $0x364] ss:$8 sps:$4 sm:$0xff]   ;;  %v294_v15 = vld [vmem:[%s3428_s6] sm:$0x3] }
  0x47   : > { %1103 = vmatpush1.bf16.msra.mxu0 %v2557_v52  ;;  %1134 = vmatprep.mubr.bf16.mxu0 %v2637_v56  ;;  %v2674_v52 = vld [vmem:[%s3423_s1 + $0x360] ss:$8 sps:$4 sm:$0xff]  }
  0x48   : > { %1104 = vmatprep.subr.bf16.mxu0 %v2562_v53  ;;  %1046 = vmatprep.subr.bf16.mxu1 %v2671_v17  ;;  %v2682_v53 = vld [vmem:[%s3423_s1 + $0x374] ss:$8 sps:$4 sm:$0xff]   ;;  %v2684_v56 = vld [vmem:[%s3424_s2 + $0x40] sm:$0xff]  }
  0x4a   : > { %1047 = vmatpush1.bf16.msra.mxu1 %v2673_v19 }
  0x4b   : > { %1105 = vmatpush1.bf16.msra.mxu0 %v2560_v57  ;;  %v2685_v57 = vld [vmem:[%s3424_s2] sm:$0xff]   ;;  %2368 = vmatprep.subr.bf16.mxu1 %v2684_v56 }
  0x4c   : > { %1106 = vmatprep.subr.bf16.mxu0 %v2565_v58  ;;  %v2686_v58 = vld [vmem:[%s3424_s2 + $0x48] sm:$0xff]  }
  0x4d   : > { %1049 = vmatmul.mubr.bf16.vlgmr.msra.gmra.mrb[0].mxu1 %v2677_v21 }
  0x4e   : > { %2369 = vmatpush3.bf16.msra.mxu1 %v2685_v57 }
  0x4f   : > { %1107 = vmatpush1.bf16.msra.mxu0 %v2563_v61  ;;  %2370 = vmatprep.subr.bf16.mxu1 %v2686_v58  ;;  %v2689_v61 = vld [vmem:[%s3424_s2 + $0x10] sm:$0xff]  }
  0x50   : > { %1108 = vmatprep.subr.bf16.mxu0 %v2568_v62  ;;  %v2690_v62 = vld [vmem:[%s3424_s2 + $0x58] sm:$0xff]  }
  0x52   : > { %2371 = vmatpush3.bf16.msra.mxu1 %v2687_v59 }
  0x53   : > { %1109 = vmatpush1.bf16.msra.mxu0 %v2566_v1  ;;  %2372 = vmatprep.subr.bf16.mxu1 %v2688_v60  ;;  %v2693_v1 = vld [vmem:[%s3424_s2 + $0x20] sm:$0xff]  }
  0x54   : > { %1110 = vmatprep.subr.bf16.mxu0 %v2571_v2  ;;  %v2694_v2 = vld [vmem:[%s3424_s2 + $0x68] sm:$0xff]  }
  0x56   : > { %2373 = vmatpush3.bf16.msra.mxu1 %v2689_v61 }
  0x57   : > { %1111 = vmatpush1.bf16.msra.mxu0 %v2569_v6  ;;  %2374 = vmatprep.subr.bf16.mxu1 %v2690_v62 }
  0x58   : > { %1112 = vmatprep.subr.bf16.mxu0 %v2574_v7  ;;  %v2698_v7 = vld [vmem:[%s3424_s2 + $0x78] sm:$0xff]  }
  0x5a   : > { %2375 = vmatpush3.bf16.msra.mxu1 %v2691_v63 }
  0x5b   : > { %1113 = vmatpush1.bf16.msra.mxu0 %v2572_v10  ;;  %2376 = vmatprep.subr.bf16.mxu1 %v2692_v0 }
  0x5c   : > { %1114 = vmatprep.subr.bf16.mxu0 %v2577_v12  ;;  %v410_v12 = vlaneseq }
  0x5e   : > { %2377 = vmatpush3.bf16.msra.mxu1 %v2693_v1  ;;  %v3203_v13 = vshrl.u32 %v410_v12, 7 }
  0x5f   : > { %1115 = vmatpush1.bf16.msra.mxu0 %v2575_v14  ;;  %2378 = vmatprep.subr.bf16.mxu1 %v2694_v2 }
  0x60   : > { %1116 = vmatprep.subr.bf16.mxu0 %v2583_v16  ;;  %v3206_v14 = vsub.s32 0, %v3203_v13  ;;  %v3212_v16 = vsub.s32 1, %v3203_v13 }
  0x62   : > { %2379 = vmatpush3.bf16.msra.mxu1 %v2695_v3  ;;  %v413_v17 = vrot.slane %v294_v15, %v3206_v14 }
  0x63   : > { %1117 = vmatpush1.bf16.msra.mxu0 %v2581_v18  ;;  %2380 = vmatprep.subr.bf16.mxu1 %v2696_v4  ;;  %v417_v18 = vrot.slane %v294_v15, %v3212_v16 }
  0x64   : > { %1118 = vmatprep.subr.bf16.mxu0 %v2589_v20 }
  0x66   : > { %2381 = vmatpush3.bf16.msra.mxu1 %v2697_v5 }
  0x67   : > { %1119 = vmatpush1.bf16.msra.mxu0 %v2587_v22  ;;  %2382 = vmatprep.subr.bf16.mxu1 %v2698_v7 }
  0x68   : > { %1120 = vmatprep.subr.bf16.mxu0 %v2595_v23 }
  0x6a   : > { %2383 = vmatpush3.bf16.msra.mxu1 %v2699_v11 }
  0x6b   : > { %1121 = vmatpush1.bf16.msra.mxu0 %v2593_v24 }
  0x6c   : > { %1122 = vmatprep.subr.bf16.mxu0 %v2601_v25 }
  0x6f   : > { %1123 = vmatpush1.bf16.msra.mxu0 %v2599_v26 }
  0x70   : > { %1124 = vmatprep.subr.bf16.mxu0 %v2607_v27 }
  0x73   : > { %1125 = vmatpush1.bf16.msra.mxu0 %v2605_v28 }
  0x74   : > { %1126 = vmatprep.subr.bf16.mxu0 %v2613_v29 }
  0x77   : > { %1127 = vmatpush1.bf16.msra.mxu0 %v2611_v30 }
  0x78   : > { %1128 = vmatprep.subr.bf16.mxu0 %v2619_v31 }
  0x7b   : > { %1129 = vmatpush1.bf16.msra.mxu0 %v2617_v32 }
  0x7c   : > { %1130 = vmatprep.subr.bf16.mxu0 %v2625_v33 }
  0x7f   : > { %1131 = vmatpush1.bf16.msra.mxu0 %v2623_v34 }
  0x80   : > { %1132 = vmatprep.subr.bf16.mxu0 %v2631_v35 }
  0x83   : > { %1133 = vmatpush1.bf16.msra.mxu0 %v2629_v36 }
  0x84   : > { %1145 = vmatprep.subr.bf16.mxu0 %v2640_v37 }
  0x86   : > { %1135 = vmatmul.mubr.bf16.vlgmr.msra.gmra.mrb[0].mxu0 %v2635_v38 }
  0x87   : > { %1146 = vmatpush1.bf16.msra.mxu0 %v2638_v39  ;;  %1177 = vmatprep.mubr.bf16.mxu0 %v2752_v42 }
  0x88   : > { %1147 = vmatprep.subr.bf16.mxu0 %v2646_v40 }
  0x8b   : > { %1148 = vmatpush1.bf16.msra.mxu0 %v2644_v41 }
  0x8c   : > { %1149 = vmatprep.subr.bf16.mxu0 %v2652_v43 }
  0x8f   : > { %1150 = vmatpush1.bf16.msra.mxu0 %v2650_v44 }
  0x90   : > { %1151 = vmatprep.subr.bf16.mxu0 %v2658_v45 }
  0x93   : > { %1152 = vmatpush1.bf16.msra.mxu0 %v2656_v46 }
  0x94   : > { %1153 = vmatprep.subr.bf16.mxu0 %v2664_v47 }
  0x97   : > { %1154 = vmatpush1.bf16.msra.mxu0 %v2662_v48 }
  0x98   : > { %1155 = vmatprep.subr.bf16.mxu0 %v2670_v49 }
  0x9b   : > { %1156 = vmatpush1.bf16.msra.mxu0 %v2668_v50 }
  0x9c   : > { %1157 = vmatprep.subr.bf16.mxu0 %v2676_v51 }
  0x9f   : > { %1158 = vmatpush1.bf16.msra.mxu0 %v2674_v52 }
  0xa0   : > { %1159 = vmatprep.subr.bf16.mxu0 %v2682_v53 }
  0xa3   : > { %1160 = vmatpush1.bf16.msra.mxu0 %v2680_v54 }
  0xa6   : > { %1178 = vmatmul.mubr.bf16.vlgmr.msra.gmra.mrb[0].mxu0 %v2683_v55 }
 0x120   : > { %v1050_v6 = vpop.f32.mrb[0].mxu1 }
 0x121   : > { %v1052_v8 = vpop.f32.mrb[1].mxu1  ;;  %v1051_v19 = vadd.f32 %v1050_v6, %v413_v17 }
 0x122   : > { %v1054_v9 = vpop.f32.mrb[2].mxu1  ;;  %v1053_v20 = vadd.f32 %v1052_v8, %v417_v18 }
 0x123   : > { %v1056_v10 = vpop.f32.mrb[3].mxu1  ;;  %v1055_v22 = vadd.f32 %v1054_v9, %v413_v17 }
 0x124   : > { %v1057_v25 = vadd.f32 %v1056_v10, %v417_v18 }
 0x179   : > { %v1179_v21 = vpop.f32.mrb[0].mxu0 }
 0x17a   : > { %v3216_v23 = vadd.f32 %v1179_v21, %v1051_v19  ;;  %v1181_v24 = vpop.f32.mrb[1].mxu0 }
 0x17b   : > { %v3218_v26 = vadd.f32 %v1181_v24, %v1053_v20  ;;  %v1183_v27 = vpop.f32.mrb[2].mxu0 }
 0x17c   : > { %v1188_v28 = vrot.slane %v3216_v23, 4  ;;  %v3221_v29 = vadd.f32 %v1183_v27, %v1055_v22  ;;  %v1185_v30 = vpop.f32.mrb[3].mxu0 }
 0x17d   : > { %v1194_v31 = vrot.slane %v3218_v26, 4  ;;  %v3224_v32 = vadd.f32 %v1185_v30, %v1057_v25 }
 0x17e   : > { %v1189_v33 = vadd.f32 %v3216_v23, %v1188_v28  ;;  %v1200_v34 = vrot.slane %v3221_v29, 4 }
 0x17f   : > { %v1195_v35 = vadd.f32 %v3218_v26, %v1194_v31  ;;  %v1206_v36 = vrot.slane %v3224_v32, 4 }
 0x180   : > { %v1190_v37 = vrot.slane %v1189_v33, 2  ;;  %v1201_v38 = vadd.f32 %v3221_v29, %v1200_v34 }
 0x181   : > { %v1196_v39 = vrot.slane %v1195_v35, 2  ;;  %v1207_v40 = vadd.f32 %v3224_v32, %v1206_v36 }
 0x182   : > { %v1191_v41 = vadd.f32 %v1190_v37, %v1189_v33  ;;  %v1202_v42 = vrot.slane %v1201_v38, 2 }
 0x183   : > { %v1197_v43 = vadd.f32 %v1196_v39, %v1195_v35  ;;  %v1208_v44 = vrot.slane %v1207_v40, 2 }
 0x184   : > { %v1192_v45 = vrot.slane %v1191_v41, 1  ;;  %v1203_v46 = vadd.f32 %v1202_v42, %v1201_v38  ;;  %v2753_v42 = vmov 1966171168  }
 0x185   : > { %v1198_v47 = vrot.slane %v1197_v43, 1  ;;  %v1209_v48 = vadd.f32 %v1208_v44, %v1207_v40 }
 0x186   : > { %v1193_v49 = vadd.f32 %v1192_v45, %v1191_v41  ;;  %v1204_v50 = vrot.slane %v1203_v46, 1 }
 0x187   : > { %v1199_v51 = vadd.f32 %v1198_v47, %v1197_v43  ;;  %v1210_v52 = vrot.slane %v1209_v48, 1  ;;  %v1267_v43 = vunpack.c.l.s4 %v2753_v42 }
 0x188   : > { %v3232_v53 = vmul.f32 0.125, %v1193_v49  ;;  %v1205_v54 = vadd.f32 %v1204_v50, %v1203_v46 }
 0x189   : > { %v3234_v55 = vmul.f32 0.125, %v1199_v51  ;;  %v1211_v56 = vadd.f32 %v1210_v52, %v1209_v48  ;;  %v1268_v44 = vunpack.c.0.s8 %v1267_v43 }
 0x18a   : > { %v1217_v57 = vsub.f32 %v3216_v23, %v3232_v53  ;;  %v3238_v58 = vmul.f32 0.125, %v1205_v54  ;;  %v295_v54 = vld [vmem:[%s3428_s6 + $0x2] sm:$0x3] }
 0x18b   : > { %v1218_v59 = vsub.f32 %v3218_v26, %v3234_v55  ;;  %v3242_v60 = vmul.f32 0.125, %v1211_v56  ;;  %v1271_v46 = vsub.s32 %v1268_v44, %v3203_v13 }
 0x18c   : > { %v1221_v61 = vmul.f32 %v1217_v57, %v1217_v57  ;;  %v1219_v62 = vsub.f32 %v3221_v29, %v3238_v58 }
 0x18d   : > { %v1222_v63 = vmul.f32 %v1218_v59, %v1218_v59  ;;  %v1220_v0 = vsub.f32 %v3224_v32, %v3242_v60 }
 0x18e   : > { %v1225_v1 = vrot.slane %v1221_v61, 4  ;;  %v1223_v2 = vmul.f32 %v1219_v62, %v1219_v62 }
 0x18f   : > { %v1231_v3 = vrot.slane %v1222_v63, 4  ;;  %v1224_v4 = vmul.f32 %v1220_v0, %v1220_v0 }
 0x190   : > { %v1226_v5 = vadd.f32 %v1225_v1, %v1221_v61  ;;  %v1237_v6 = vrot.slane %v1223_v2, 4 }
 0x191   : > { %v1232_v7 = vadd.f32 %v1231_v3, %v1222_v63  ;;  %v1243_v8 = vrot.slane %v1224_v4, 4 }
 0x192   : > { %v1227_v9 = vrot.slane %v1226_v5, 2  ;;  %v1238_v10 = vadd.f32 %v1237_v6, %v1223_v2 }
 0x193   : > { %v1233_v11 = vrot.slane %v1232_v7, 2  ;;  %v1244_v12 = vadd.f32 %v1243_v8, %v1224_v4 }
 0x194   : > { %v1228_v15 = vadd.f32 %v1227_v9, %v1226_v5  ;;  %v1239_v17 = vrot.slane %v1238_v10, 2 }
 0x195   : > { %v1234_v18 = vadd.f32 %v1233_v11, %v1232_v7  ;;  %v1245_v19 = vrot.slane %v1244_v12, 2 }
 0x196   : > { %v1229_v20 = vrot.slane %v1228_v15, 1  ;;  %v1240_v21 = vadd.f32 %v1239_v17, %v1238_v10 }
 0x197   : > { %v1235_v22 = vrot.slane %v1234_v18, 1  ;;  %v1246_v24 = vadd.f32 %v1245_v19, %v1244_v12 }
 0x198   : > { %v1230_v25 = vadd.f32 %v1229_v20, %v1228_v15  ;;  %v1241_v27 = vrot.slane %v1240_v21, 1 }
 0x199   : > { %v1236_v28 = vadd.f32 %v1235_v22, %v1234_v18  ;;  %v1247_v30 = vrot.slane %v1246_v24, 1 }
 0x19a   : > { %v1249_v31 = vmul.f32 0.125, %v1230_v25  ;;  %v1242_v33 = vadd.f32 %v1241_v27, %v1240_v21 }
 0x19b   : > { %v1250_v34 = vmul.f32 0.125, %v1236_v28  ;;  %v1248_v35 = vadd.f32 %v1247_v30, %v1246_v24 }
 0x19c   : > { %v1253_v36 = vadd.f32 1e-05, %v1249_v31  ;;  %v1251_v37 = vmul.f32 0.125, %v1242_v33  ;;  %v2700_v31 = vld [vmem:[%s3425_s3] sm:$0xff]   ;;  %v2754_v33 = vmov 0.0  }
 0x19d   : > { %v1254_v38 = vadd.f32 1e-05, %v1250_v34  ;;  %v1252_v39 = vmul.f32 0.125, %v1248_v35  ;;  %2417 = vmatprep.subr.bf16.mxu1 %v2754_v33  ;;  %v2702_v34 = vld [vmem:[%s3425_s3 + $0x10] sm:$0xff]   ;;  %v2703_v35 = vld [vmem:[%s3425_s3 + $0x18] sm:$0xff]  }
 0x19e   : > { %2724 = vrsqrt.f32 %v1253_v36  ;;  %v1255_v40 = vadd.f32 1e-05, %v1251_v37  ;;  %v2704_v36 = vld [vmem:[%s3425_s3 + $0x20] sm:$0xff]   ;;  %v2705_v37 = vld [vmem:[%s3425_s3 + $0x28] sm:$0xff]  }
 0x19f   : > { %2726 = vrsqrt.f32 %v1254_v38  ;;  %v1256_v41 = vadd.f32 1e-05, %v1252_v39  ;;  %v2706_v38 = vld [vmem:[%s3425_s3 + $0x30] sm:$0xff]   ;;  %v2707_v39 = vld [vmem:[%s3425_s3 + $0x38] sm:$0xff]  }
 0x1a0   : > { %2728 = vrsqrt.f32 %v1255_v40 }
 0x1a1   : > { %2730 = vrsqrt.f32 %v1256_v41  ;;  %v2322_v41 = vld [vmem:[%s3428_s6 + $0x6] ss:$0 sm:$0xff] }
 0x1a8   : > { %v2725_v45 = vpop.eup %2724 }
 0x1a9   : > { %v2727_v47 = vpop.eup %2726 }
 0x1aa   : > { %v2729_v48 = vpop.eup %2728  ;;  %v1265_v49 = vcombine.low %v2725_v45, %v2727_v47 }
 0x1ab   : > { %v2731_v50 = vpop.eup %2730 }
 0x1ac   : > { %v1272_v51 = vrot.slane %v1265_v49, %v1271_v46  ;;  %v1280_v52 = vcombine.low %v2729_v48, %v2731_v50 }
 0x1ae   : > { %v1279_v56 = vrot.slane %v1272_v51, %v1271_v46  ;;  %v1287_v57 = vrot.slane %v1280_v52, %v1271_v46 }
 0x1b0   : > { %v1294_v59 = vrot.slane %v1287_v57, %v1271_v46  ;;  %v1297_v61 = vmul.f32 %v1279_v56, %v295_v54 }
 0x1b2   : > { %v1298_v62 = vmul.f32 %v1294_v59, %v295_v54  ;;  %v1304_v63 = vrot.slane %v1297_v61, %v3206_v14  ;;  %v1308_v0 = vrot.slane %v1297_v61, %v3212_v16 }
 0x1b4   : > { %v1312_v13 = vrot.slane %v1298_v62, %v3206_v14  ;;  %v1316_v1 = vrot.slane %v1298_v62, %v3212_v16  ;;  %v1321_v2 = vmul.f32 %v1304_v63, %v3232_v53  ;;  %v1322_v3 = vmul.f32 %v1308_v0, %v3234_v55  ;;  %v296_v53 = vld [vmem:[%s3428_s6 + $0x4] sm:$0x3] }
 0x1b5   : > { %v1364_v4 = vmul.f32 %v3218_v26, %v1308_v0  ;;  %v1363_v5 = vmul.f32 %v3216_v23, %v1304_v63 }
 0x1b6   : > { %v1323_v6 = vmul.f32 %v1312_v13, %v3238_v58  ;;  %v1324_v7 = vmul.f32 %v1316_v1, %v3242_v60  ;;  %v1329_v8 = vcombine.low %v1321_v2, %v1322_v3  ;;  %v1366_v9 = vmul.f32 %v3224_v32, %v1316_v1 }
 0x1b7   : > { %v1365_v10 = vmul.f32 %v3221_v29, %v1312_v13 }
 0x1b8   : > { %v1336_v11 = vrot.slane %v1329_v8, %v1271_v46  ;;  %v1344_v12 = vcombine.low %v1323_v6, %v1324_v7 }
 0x1ba   : > { %v1343_v55 = vrot.slane %v1336_v11, %v1271_v46  ;;  %v1351_v15 = vrot.slane %v1344_v12, %v1271_v46 }
 0x1bc   : > { %v1358_v26 = vrot.slane %v1351_v15, %v1271_v46  ;;  %v1361_v17 = vsub.f32 %v296_v53, %v1343_v55 }
 0x1be   : > { %v1362_v23 = vsub.f32 %v296_v53, %v1358_v26  ;;  %v1376_v58 = vrot.slane %v1361_v17, %v3212_v16  ;;  %v1372_v60 = vrot.slane %v1361_v17, %v3206_v14 }
 0x1c0   : > { %v1384_v18 = vrot.slane %v1362_v23, %v3212_v16  ;;  %v1390_v32 = vadd.f32 %v1376_v58, %v1364_v4  ;;  %v1380_v29 = vrot.slane %v1362_v23, %v3206_v14  ;;  %v1389_v19 = vadd.f32 %v1372_v60, %v1363_v5  ;;  %v2701_v16 = vld [vmem:[%s3425_s3 + $0x8] sm:$0xff]  }
 0x1c2   : > { %v1392_v20 = vadd.f32 %v1384_v18, %v1366_v9  ;;  %v1391_v21 = vadd.f32 %v1380_v29, %v1365_v10  ;;  %v1394_v22 = vmax.f32 %v1390_v32, 0.0  ;;  %v1393_v25 = vmax.f32 %v1389_v19, 0.0  ;;  %v1400_v32 = vld [vmem:[%s3428_s6 + $0x7] sm:$0x1] }
 0x1c4   : > { %v1396_v24 = vmax.f32 %v1392_v20, 0.0  ;;  %v1395_v27 = vmax.f32 %v1391_v21, 0.0  ;;  %v1401_v21 = vld [vmem:[%s3428_s6 + $0x8] sm:$0x1] }
 0x1c6   : > { %v1398_v28 = vpack.c.bf16 %v1396_v24, %v1394_v22  ;;  %v1397_v30 = vpack.c.bf16 %v1395_v27, %v1393_v25 }
 0x1c8   : > { %1568 = vmatprep.mubr.bf16.mxu1 %v1398_v28 }
 0x1c9   : > { %1569 = vmatmul.mubr.bf16.vlgmr.msra.gmra.mrb[4].mxu1 %v1397_v30 }
 0x1ca   : > { %2418 = vmatpush3.bf16.msra.mxu1 %v2700_v31  ;;  %2433 = vmatprep.mubr.msk.bf16.mxu1 %vm2755_vm0, %v2754_v33 }
 0x1cb   : > { %2419 = vmatprep.subr.bf16.mxu1 %v2754_v33 }
 0x1ce   : > { %2420 = vmatpush3.bf16.msra.mxu1 %v2701_v16 }
 0x1cf   : > { %2421 = vmatprep.subr.bf16.mxu1 %v2754_v33 }
 0x1d2   : > { %2422 = vmatpush3.bf16.msra.mxu1 %v2702_v34 }
 0x1d3   : > { %2423 = vmatprep.subr.bf16.mxu1 %v2754_v33 }
 0x1d6   : > { %2424 = vmatpush3.bf16.msra.mxu1 %v2703_v35 }
 0x1d7   : > { %2425 = vmatprep.subr.bf16.mxu1 %v2754_v33 }
 0x1da   : > { %2426 = vmatpush3.bf16.msra.mxu1 %v2704_v36 }
 0x1db   : > { %2427 = vmatprep.subr.bf16.mxu1 %v2754_v33 }
 0x1de   : > { %2428 = vmatpush3.bf16.msra.mxu1 %v2705_v37 }
 0x1df   : > { %2429 = vmatprep.subr.bf16.mxu1 %v2754_v33 }
 0x1e2   : > { %2430 = vmatpush3.bf16.msra.mxu1 %v2706_v38 }
 0x1e3   : > { %2431 = vmatprep.subr.bf16.mxu1 %v2754_v33 }
 0x1e6   : > { %2432 = vmatpush3.bf16.msra.mxu1 %v2707_v39 }
 0x1e7   : > { %2437 = vmatprep.subr.bf16.mxu1 %v2754_v33 }
 0x29c   : > { %v2384_v40 = vpop.f32.mrb[4].mxu1 }
 0x29d   : > { %v2385_v42 = vpop.f32.mrb[5].mxu1 }
 0x29e   : > { %v2386_v43 = vadd.f32 %v2385_v42, %v2384_v40  ;;  %v2387_v44 = vpop.f32.mrb[6].mxu1  ;;  %v2708_v42 = vld [vmem:[%s3426_s4] sm:$0xff]  }
 0x29f   : > { %v2388_v45 = vpop.f32.mrb[7].mxu1 }
 0x2a0   : > { %v1571_v46 = vadd.f32 %v2386_v43, %v2322_v41  ;;  %v2389_v47 = vadd.f32 %v2388_v45, %v2387_v44  ;;  %v2709_v43 = vld [vmem:[%s3426_s4 + $0x8] sm:$0xff]   ;;  %v2710_v44 = vld [vmem:[%s3426_s4 + $0x10] sm:$0xff]   ;;  %v2711_v45 = vld [vmem:[%s3426_s4 + $0x18] sm:$0xff]  }
 0x2a2   : > { %v1577_v48 = vrot.slane %v1571_v46, 4  ;;  %v1574_v49 = vadd.f32 %v2389_v47, %v2322_v41  ;;  %v2713_v47 = vld [vmem:[%s3426_s4 + $0x28] sm:$0xff]  }
 0x2a4   : > { %v1578_v50 = vadd.f32 %v1577_v48, %v1571_v46  ;;  %v1583_v51 = vrot.slane %v1574_v49, 4  ;;  %v2714_v48 = vld [vmem:[%s3426_s4 + $0x30] sm:$0xff]  }
 0x2a6   : > { %v1579_v52 = vrot.slane %v1578_v50, 2  ;;  %v1584_v54 = vadd.f32 %v1583_v51, %v1574_v49 }
 0x2a8   : > { %v1580_v56 = vadd.f32 %v1579_v52, %v1578_v50  ;;  %v1585_v57 = vrot.slane %v1584_v54, 2  ;;  %v2339_v50 = vld [vmem:[%s3428_s6 + $0x9] ss:$0 sm:$0xff] }
 0x2aa   : > { %v1581_v59 = vrot.slane %v1580_v56, 1  ;;  %v1586_v61 = vadd.f32 %v1585_v57, %v1584_v54 }
 0x2ac   : > { %v1582_v62 = vadd.f32 %v1581_v59, %v1580_v56  ;;  %v1587_v63 = vrot.slane %v1586_v61, 1 }
 0x2ae   : > { %v1589_v0 = vmul.f32 0.125, %v1582_v62  ;;  %v1588_v13 = vadd.f32 %v1587_v63, %v1586_v61 }
 0x2b0   : > { %v1591_v1 = vsub.f32 %v1571_v46, %v1589_v0  ;;  %v1590_v2 = vmul.f32 0.125, %v1588_v13 }
 0x2b2   : > { %v1593_v3 = vmul.f32 %v1591_v1, %v1591_v1  ;;  %v1592_v4 = vsub.f32 %v1574_v49, %v1590_v2 }
 0x2b4   : > { %v1595_v5 = vrot.slane %v1593_v3, 4  ;;  %v1594_v6 = vmul.f32 %v1592_v4, %v1592_v4 }
 0x2b6   : > { %v1596_v7 = vadd.f32 %v1595_v5, %v1593_v3  ;;  %v1601_v8 = vrot.slane %v1594_v6, 4 }
 0x2b8   : > { %v1597_v9 = vrot.slane %v1596_v7, 2  ;;  %v1602_v10 = vadd.f32 %v1601_v8, %v1594_v6 }
 0x2ba   : > { %v1598_v11 = vadd.f32 %v1597_v9, %v1596_v7  ;;  %v1603_v12 = vrot.slane %v1602_v10, 2 }
 0x2bc   : > { %v1599_v53 = vrot.slane %v1598_v11, 1  ;;  %v1604_v55 = vadd.f32 %v1603_v12, %v1602_v10 }
 0x2be   : > { %v1600_v15 = vadd.f32 %v1599_v53, %v1598_v11  ;;  %v1605_v26 = vrot.slane %v1604_v55, 1 }
 0x2c0   : > { %v1607_v17 = vmul.f32 0.125, %v1600_v15  ;;  %v1606_v23 = vadd.f32 %v1605_v26, %v1604_v55 }
 0x2c2   : > { %v1609_v58 = vadd.f32 1e-05, %v1607_v17  ;;  %v1608_v60 = vmul.f32 0.125, %v1606_v23 }
 0x2c4   : > { %2732 = vrsqrt.f32 %v1609_v58  ;;  %v1610_v18 = vadd.f32 1e-05, %v1608_v60 }
 0x2c6   : > { %2734 = vrsqrt.f32 %v1610_v18 }
 0x2ce   : > { %v2733_v29 = vpop.eup %2732 }
 0x2cf   : > { %v1613_v19 = vmul.f32 %v2733_v29, %v1400_v32 }
 0x2d0   : > { %v2735_v20 = vpop.eup %2734 }
 0x2d1   : > { %v1615_v22 = vmul.f32 %v1613_v19, %v1589_v0  ;;  %v1624_v24 = vrot.slane %v1613_v19, %v3206_v14  ;;  %v1614_v25 = vmul.f32 %v2735_v20, %v1400_v32 }
 0x2d3   : > { %v1616_v27 = vmul.f32 %v1614_v25, %v1590_v2  ;;  %v1628_v28 = vrot.slane %v1614_v25, %v3206_v14  ;;  %v1617_v30 = vsub.f32 %v1401_v21, %v1615_v22  ;;  %v1631_v31 = vmul.f32 %v1624_v24, %v1571_v46  ;;  %v2712_v46 = vld [vmem:[%s3426_s4 + $0x20] sm:$0xff]  }
 0x2d5   : > { %v1618_v16 = vsub.f32 %v1401_v21, %v1616_v27  ;;  %v1638_v34 = vrot.slane %v1617_v30, %v3206_v14  ;;  %v1632_v35 = vmul.f32 %v1628_v28, %v1574_v49  ;;  %v2715_v49 = vld [vmem:[%s3426_s4 + $0x38] sm:$0xff]   ;;  %v1651_v27 = vld [vmem:[%s3428_s6 + $0xa] sm:$0x1] }
 0x2d7   : > { %v1642_v36 = vrot.slane %v1618_v16, %v3206_v14  ;;  %v1645_v37 = vadd.f32 %v1638_v34, %v1631_v31  ;;  %v1652_v16 = vld [vmem:[%s3428_s6 + $0xb] sm:$0x1] }
 0x2d9   : > { %v1646_v38 = vadd.f32 %v1642_v36, %v1632_v35  ;;  %v1647_v39 = vmax.f32 %v1645_v37, 0.0 }
 0x2db   : > { %v1648_v40 = vmax.f32 %v1646_v38, 0.0 }
 0x2dd   : > { %v1649_v41 = vpack.c.bf16 %v1648_v40, %v1647_v39 }
 0x2df   : > { %2434 = vmatmul.mubr.bf16.vlgmr.msra.gmra.mrb[8].mxu1 %v1649_v41 }
 0x2e0   : > { %2453 = vmatprep.mubr.msk.bf16.mxu1 %vm2755_vm0, %v2754_v33  ;;  %2438 = vmatpush3.bf16.msra.mxu1 %v2708_v42 }
 0x2e1   : > { %2439 = vmatprep.subr.bf16.mxu1 %v2754_v33 }
 0x2e4   : > { %2440 = vmatpush3.bf16.msra.mxu1 %v2709_v43 }
 0x2e5   : > { %2441 = vmatprep.subr.bf16.mxu1 %v2754_v33 }
 0x2e8   : > { %2442 = vmatpush3.bf16.msra.mxu1 %v2710_v44 }
 0x2e9   : > { %2443 = vmatprep.subr.bf16.mxu1 %v2754_v33 }
 0x2ec   : > { %2444 = vmatpush3.bf16.msra.mxu1 %v2711_v45 }
 0x2ed   : > { %2445 = vmatprep.subr.bf16.mxu1 %v2754_v33 }
 0x2f0   : > { %2446 = vmatpush3.bf16.msra.mxu1 %v2712_v46 }
 0x2f1   : > { %2447 = vmatprep.subr.bf16.mxu1 %v2754_v33 }
 0x2f4   : > { %2448 = vmatpush3.bf16.msra.mxu1 %v2713_v47 }
 0x2f5   : > { %2449 = vmatprep.subr.bf16.mxu1 %v2754_v33 }
 0x2f8   : > { %2450 = vmatpush3.bf16.msra.mxu1 %v2714_v48 }
 0x2f9   : > { %2451 = vmatprep.subr.bf16.mxu1 %v2754_v33 }
 0x2fc   : > { %2452 = vmatpush3.bf16.msra.mxu1 %v2715_v49 }
 0x2fd   : > { %2457 = vmatprep.subr.bf16.mxu1 %v2754_v33 }
 0x3b2   : > { %v1757_v51 = vpop.f32.mrb[8].mxu1 }
 0x3b3   : > { %v1758_v52 = vadd.f32 %v2339_v50, %v1757_v51  ;;  %v2435_v54 = vpop.f32.mrb[9].mxu1  ;;  %v2717_v51 = vld [vmem:[%s3427_s5 + $0x8] sm:$0xff]  }
 0x3b4   : > { %v1760_v56 = vpop.f32.mrb[10].mxu1  ;;  %v2719_v54 = vld [vmem:[%s3427_s5 + $0x18] sm:$0xff]  }
 0x3b5   : > { %v1764_v57 = vrot.slane %v1758_v52, 4  ;;  %v1761_v59 = vadd.f32 %v2339_v50, %v1760_v56  ;;  %v2436_v61 = vpop.f32.mrb[11].mxu1  ;;  %v2716_v50 = vld [vmem:[%s3427_s5] sm:$0xff]  }
 0x3b6   : > { %v2720_v56 = vld [vmem:[%s3427_s5 + $0x20] sm:$0xff]   ;;  %v2723_v61 = vld [vmem:[%s3427_s5 + $0x38] sm:$0xff]  }
 0x3b7   : > { %v1765_v62 = vadd.f32 %v1764_v57, %v1758_v52  ;;  %v1770_v63 = vrot.slane %v1761_v59, 4  ;;  %v2721_v57 = vld [vmem:[%s3427_s5 + $0x28] sm:$0xff]  }
 0x3b9   : > { %v1766_v0 = vrot.slane %v1765_v62, 2  ;;  %v1771_v13 = vadd.f32 %v1770_v63, %v1761_v59 }
 0x3bb   : > { %v1767_v1 = vadd.f32 %v1766_v0, %v1765_v62  ;;  %v1772_v2 = vrot.slane %v1771_v13, 2  ;;  %v2348_v62 = vld [vmem:[%s3428_s6 + $0xc] ss:$0 sm:$0xff] }
 0x3bd   : > { %v1768_v3 = vrot.slane %v1767_v1, 1  ;;  %v1773_v4 = vadd.f32 %v1772_v2, %v1771_v13 }
 0x3bf   : > { %v1769_v5 = vadd.f32 %v1768_v3, %v1767_v1  ;;  %v1774_v6 = vrot.slane %v1773_v4, 1 }
 0x3c1   : > { %v1776_v7 = vmul.f32 0.125, %v1769_v5  ;;  %v1775_v8 = vadd.f32 %v1774_v6, %v1773_v4 }
 0x3c3   : > { %v1778_v9 = vsub.f32 %v1758_v52, %v1776_v7  ;;  %v1777_v10 = vmul.f32 0.125, %v1775_v8 }
 0x3c5   : > { %v1780_v11 = vmul.f32 %v1778_v9, %v1778_v9  ;;  %v1779_v12 = vsub.f32 %v1761_v59, %v1777_v10 }
 0x3c7   : > { %v1782_v53 = vrot.slane %v1780_v11, 4  ;;  %v1781_v55 = vmul.f32 %v1779_v12, %v1779_v12 }
 0x3c9   : > { %v1783_v15 = vadd.f32 %v1782_v53, %v1780_v11  ;;  %v1788_v26 = vrot.slane %v1781_v55, 4 }
 0x3cb   : > { %v1784_v17 = vrot.slane %v1783_v15, 2  ;;  %v1789_v23 = vadd.f32 %v1788_v26, %v1781_v55 }
 0x3cd   : > { %v1785_v58 = vadd.f32 %v1784_v17, %v1783_v15  ;;  %v1790_v60 = vrot.slane %v1789_v23, 2 }
 0x3cf   : > { %v1786_v18 = vrot.slane %v1785_v58, 1  ;;  %v1791_v32 = vadd.f32 %v1790_v60, %v1789_v23 }
 0x3d1   : > { %v1787_v29 = vadd.f32 %v1786_v18, %v1785_v58  ;;  %v1792_v19 = vrot.slane %v1791_v32, 1 }
 0x3d3   : > { %v1794_v20 = vmul.f32 0.125, %v1787_v29  ;;  %v1793_v21 = vadd.f32 %v1792_v19, %v1791_v32 }
 0x3d5   : > { %v1796_v22 = vadd.f32 1e-05, %v1794_v20  ;;  %v1795_v24 = vmul.f32 0.125, %v1793_v21 }
 0x3d7   : > { %2736 = vrsqrt.f32 %v1796_v22  ;;  %v1797_v25 = vadd.f32 1e-05, %v1795_v24 }
 0x3d9   : > { %2738 = vrsqrt.f32 %v1797_v25 }
 0x3e1   : > { %v2737_v28 = vpop.eup %2736 }
 0x3e2   : > { %v1800_v30 = vmul.f32 %v2737_v28, %v1651_v27 }
 0x3e3   : > { %v2739_v31 = vpop.eup %2738 }
 0x3e4   : > { %v1802_v34 = vmul.f32 %v1800_v30, %v1776_v7  ;;  %v1811_v35 = vrot.slane %v1800_v30, %v3206_v14  ;;  %v1801_v36 = vmul.f32 %v2739_v31, %v1651_v27 }
 0x3e6   : > { %v1803_v37 = vmul.f32 %v1801_v36, %v1777_v10  ;;  %v1815_v38 = vrot.slane %v1801_v36, %v3206_v14  ;;  %v1804_v39 = vsub.f32 %v1652_v16, %v1802_v34  ;;  %v1818_v40 = vmul.f32 %v1811_v35, %v1758_v52  ;;  %v2718_v52 = vld [vmem:[%s3427_s5 + $0x10] sm:$0xff]   ;;  %v1838_v36 = vld [vmem:[%s3428_s6 + $0xd] sm:$0x1] }
 0x3e8   : > { %v1805_v41 = vsub.f32 %v1652_v16, %v1803_v37  ;;  %v1825_v42 = vrot.slane %v1804_v39, %v3206_v14  ;;  %v1819_v43 = vmul.f32 %v1815_v38, %v1761_v59  ;;  %v2722_v59 = vld [vmem:[%s3427_s5 + $0x30] sm:$0xff]  }
 0x3ea   : > { %v1829_v44 = vrot.slane %v1805_v41, %v3206_v14  ;;  %v1832_v45 = vadd.f32 %v1825_v42, %v1818_v40  ;;  %v1839_v40 = vld [vmem:[%s3428_s6 + $0xe] sm:$0x1] }
 0x3ec   : > { %v1833_v46 = vadd.f32 %v1829_v44, %v1819_v43  ;;  %v1834_v47 = vmax.f32 %v1832_v45, 0.0 }
 0x3ee   : > { %v1835_v48 = vmax.f32 %v1833_v46, 0.0 }
 0x3f0   : > { %v1836_v49 = vpack.c.bf16 %v1835_v48, %v1834_v47 }
 0x3f2   : > { %2454 = vmatmul.mubr.bf16.vlgmr.msra.gmra.mrb[12].mxu1 %v1836_v49 }
 0x3f3   : > { %2473 = vmatprep.mubr.msk.bf16.mxu1 %vm2755_vm0, %v2754_v33  ;;  %2458 = vmatpush3.bf16.msra.mxu1 %v2716_v50 }
 0x3f4   : > { %2459 = vmatprep.subr.bf16.mxu1 %v2754_v33 }
 0x3f7   : > { %2460 = vmatpush3.bf16.msra.mxu1 %v2717_v51 }
 0x3f8   : > { %2461 = vmatprep.subr.bf16.mxu1 %v2754_v33 }
 0x3fb   : > { %2462 = vmatpush3.bf16.msra.mxu1 %v2718_v52 }
 0x3fc   : > { %2463 = vmatprep.subr.bf16.mxu1 %v2754_v33 }
 0x3ff   : > { %2464 = vmatpush3.bf16.msra.mxu1 %v2719_v54 }
 0x400   : > { %2465 = vmatprep.subr.bf16.mxu1 %v2754_v33 }
 0x403   : > { %2466 = vmatpush3.bf16.msra.mxu1 %v2720_v56 }
 0x404   : > { %2467 = vmatprep.subr.bf16.mxu1 %v2754_v33 }
 0x407   : > { %2468 = vmatpush3.bf16.msra.mxu1 %v2721_v57 }
 0x408   : > { %2469 = vmatprep.subr.bf16.mxu1 %v2754_v33 }
 0x40b   : > { %2470 = vmatpush3.bf16.msra.mxu1 %v2722_v59 }
 0x40c   : > { %2471 = vmatprep.subr.bf16.mxu1 %v2754_v33 }
 0x40f   : > { %2472 = vmatpush3.bf16.msra.mxu1 %v2723_v61  ;;  %v2357_v61 = vld [vmem:[%s3428_s6 + $0xf] ss:$0 sm:$0xff] }
 0x4c5   : > { %v1944_v63 = vpop.f32.mrb[12].mxu1 }
 0x4c6   : > { %v1945_v0 = vadd.f32 %v2348_v62, %v1944_v63  ;;  %v2455_v13 = vpop.f32.mrb[13].mxu1 }
 0x4c7   : > { %v1947_v1 = vpop.f32.mrb[14].mxu1 }
 0x4c8   : > { %v1951_v2 = vrot.slane %v1945_v0, 4  ;;  %v1948_v3 = vadd.f32 %v2348_v62, %v1947_v1  ;;  %v2456_v4 = vpop.f32.mrb[15].mxu1 }
 0x4ca   : > { %v1952_v5 = vadd.f32 %v1951_v2, %v1945_v0  ;;  %v1957_v6 = vrot.slane %v1948_v3, 4 }
 0x4cc   : > { %v1953_v7 = vrot.slane %v1952_v5, 2  ;;  %v1958_v8 = vadd.f32 %v1957_v6, %v1948_v3 }
 0x4ce   : > { %v1954_v9 = vadd.f32 %v1953_v7, %v1952_v5  ;;  %v1959_v10 = vrot.slane %v1958_v8, 2 }
 0x4d0   : > { %v1955_v11 = vrot.slane %v1954_v9, 1  ;;  %v1960_v33 = vadd.f32 %v1959_v10, %v1958_v8 }
 0x4d2   : > { %v1956_v12 = vadd.f32 %v1955_v11, %v1954_v9  ;;  %v1961_v53 = vrot.slane %v1960_v33, 1 }
 0x4d4   : > { %v1963_v55 = vmul.f32 0.125, %v1956_v12  ;;  %v1962_v15 = vadd.f32 %v1961_v53, %v1960_v33 }
 0x4d6   : > { %v1965_v26 = vsub.f32 %v1945_v0, %v1963_v55  ;;  %v1964_v17 = vmul.f32 0.125, %v1962_v15 }
 0x4d8   : > { %v1967_v23 = vmul.f32 %v1965_v26, %v1965_v26  ;;  %v1966_v58 = vsub.f32 %v1948_v3, %v1964_v17 }
 0x4da   : > { %v1969_v60 = vrot.slane %v1967_v23, 4  ;;  %v1968_v18 = vmul.f32 %v1966_v58, %v1966_v58 }
 0x4dc   : > { %v1970_v32 = vadd.f32 %v1969_v60, %v1967_v23  ;;  %v1975_v29 = vrot.slane %v1968_v18, 4 }
 0x4de   : > { %v1971_v19 = vrot.slane %v1970_v32, 2  ;;  %v1976_v20 = vadd.f32 %v1975_v29, %v1968_v18 }
 0x4e0   : > { %v1972_v21 = vadd.f32 %v1971_v19, %v1970_v32  ;;  %v1977_v22 = vrot.slane %v1976_v20, 2 }
 0x4e2   : > { %v1973_v24 = vrot.slane %v1972_v21, 1  ;;  %v1978_v25 = vadd.f32 %v1977_v22, %v1976_v20 }
 0x4e4   : > { %v1974_v27 = vadd.f32 %v1973_v24, %v1972_v21  ;;  %v1979_v28 = vrot.slane %v1978_v25, 1 }
 0x4e6   : > { %v1981_v30 = vmul.f32 0.125, %v1974_v27  ;;  %v1980_v31 = vadd.f32 %v1979_v28, %v1978_v25 }
 0x4e8   : > { %v1983_v16 = vadd.f32 1e-05, %v1981_v30  ;;  %v1982_v34 = vmul.f32 0.125, %v1980_v31 }
 0x4ea   : > { %2740 = vrsqrt.f32 %v1983_v16  ;;  %v1984_v35 = vadd.f32 1e-05, %v1982_v34 }
 0x4ec   : > { %2742 = vrsqrt.f32 %v1984_v35 }
 0x4f4   : > { %v2741_v37 = vpop.eup %2740 }
 0x4f5   : > { %v1987_v38 = vmul.f32 %v2741_v37, %v1838_v36 }
 0x4f6   : > { %v2743_v39 = vpop.eup %2742 }
 0x4f7   : > { %v1989_v41 = vmul.f32 %v1987_v38, %v1963_v55  ;;  %v1998_v42 = vrot.slane %v1987_v38, %v3206_v14  ;;  %v1988_v43 = vmul.f32 %v2743_v39, %v1838_v36 }
 0x4f9   : > { %v1990_v44 = vmul.f32 %v1988_v43, %v1964_v17  ;;  %v2002_v45 = vrot.slane %v1988_v43, %v3206_v14  ;;  %v1991_v46 = vsub.f32 %v1839_v40, %v1989_v41  ;;  %v2005_v47 = vmul.f32 %v1998_v42, %v1945_v0 }
 0x4fb   : > { %v1992_v48 = vsub.f32 %v1839_v40, %v1990_v44  ;;  %v2012_v49 = vrot.slane %v1991_v46, %v3206_v14  ;;  %v2006_v50 = vmul.f32 %v2002_v45, %v1948_v3 }
 0x4fd   : > { %v2016_v51 = vrot.slane %v1992_v48, %v3206_v14  ;;  %v2019_v52 = vadd.f32 %v2012_v49, %v2005_v47 }
 0x4ff   : > { %v2020_v54 = vadd.f32 %v2016_v51, %v2006_v50  ;;  %v2021_v56 = vmax.f32 %v2019_v52, 0.0 }
 0x501   : > { %v2022_v57 = vmax.f32 %v2020_v54, 0.0 }
 0x503   : > { %v2023_v59 = vpack.c.bf16 %v2022_v57, %v2021_v56 }
 0x505   : > { %2474 = vmatmul.mubr.bf16.vlgmr.msra.gmra.mrb[16].mxu1 %v2023_v59 }
 0x5d8   : > { %v2129_v62 = vpop.f32.mrb[16].mxu1 }
 0x5d9   : > { %v2130_v63 = vadd.f32 %v2357_v61, %v2129_v62  ;;  %v2475_v0 = vpop.f32.mrb[17].mxu1 }
 0x5da   : > { %v2132_v13 = vpop.f32.mrb[18].mxu1 }
 0x5db   : > { %2136 = vst [vmem:[%s283_s15] sm:$0xff] %v2130_v63  ;;  %v2133_v14 = vadd.f32 %v2357_v61, %v2132_v13  ;;  %v2476_v1 = vpop.f32.mrb[19].mxu1 }
 0x5dd   : > { %2137 = vst [vmem:[%s283_s15 + $0x8] sm:$0xff] %v2133_v14 }
 0x5de PF: > { %s17_s24 = sadd.s32 1, %s2750_s24  }
 0x5df   : > { %p14_p4 = scmp.ge.s32.totalorder %s17_s24, 4  }
 0x5e1   :  { %16 = sbr.rel (!%p14_p4) target bundleno = 1 (0x1), region = 78 }

// kernel: custom-call
= control target key start
LH: loop header
LB: loop body
LE: loop exit
PB: predicated region body
PF: predicated region fallthrough
CT: control target
= control target key end

     0   :  { %s6_s0 = inlined_call_operand.vmem [shape: f32[2048], index: 0, kind: output, shape index: {}]  }

// kernel: _forward_tasks_impl.1
= control target key start
LH: loop header
LB: loop body
LE: loop exit
PB: predicated region body
PF: predicated region fallthrough
CT: control target
= control target key end

     0   :  { %s2796_s24 = smov 0   ;;  %s3422_s0 = inlined_call_operand.vmem [shape: bf16[32,896], index: 0, kind: input, shape index: {}]   ;;  %s3423_s1 = inlined_call_operand.vmem [shape: bf16[896,256], index: 1, kind: input, shape index: {}]   ;;  %s3424_s2 = inlined_call_operand.vmem [shape: bf16[256,128], index: 2, kind: input, shape index: {}]   ;;  %s3425_s3 = inlined_call_operand.vmem [shape: bf16[128,128], index: 3, kind: input, shape index: {}]   ;;  %s3426_s4 = inlined_call_operand.vmem [shape: bf16[128,128], index: 4, kind: input, shape index: {}]   ;;  %s3427_s5 = inlined_call_operand.vmem [shape: bf16[128,128], index: 5, kind: input, shape index: {}]   ;;  %s3428_s6 = inlined_call_operand.vmem [shape: f32[1,2048], index: 6, kind: input, shape index: {}]   ;;  %s3429_s7 = inlined_call_operand.vmem [shape: f32[32,128], index: 7, kind: output, shape index: {}]  }
   0x1 LB: > { %s2194_s25 = sadd.s32 4294967295, %s2750_s24   ;;  %p2198_p0 = scmp.ge.s32.totalorder %s2750_s24, 1  ;;  %s2750_s24 = sphi %s2796_s24, %s17_s24  }
   0x2   : > { %p239_p1 = scmp.lt.s32.totalorder %s2750_s24, 3 }
   0x4   : > { %p240_p2 = pnand %p2198_p0, %p239_p1 }
   0x5   : > { %v2506_v0 = vld [vmem:[%s3423_s1 + $0x104] ss:$8 sps:$4 sm:$0xff] (!%p240_p2)   ;;  %v2508_v1 = vld [vmem:[%s3423_s1 + $0x100] ss:$8 sps:$4 sm:$0xff] (!%p240_p2)   ;;  %v2509_v2 = vld [vmem:[%s3423_s1 + $0x114] ss:$8 sps:$4 sm:$0xff] (!%p240_p2)  }
   0x6   : > { %243 = sbr.rel (%p240_p2) target bundleno = 1502 (0x5de), region = 48  ;;  %1059 = vmatprep.subr.bf16.mxu0 (!%p240_p2), %v2506_v0  ;;  %v2511_v3 = vld [vmem:[%s3423_s1 + $0x110] ss:$8 sps:$4 sm:$0xff] (!%p240_p2)   ;;  %v2512_v4 = vld [vmem:[%s3423_s1 + $0x124] ss:$8 sps:$4 sm:$0xff] (!%p240_p2)   ;;  %s2199_s13 = sshll.u32 (!%p240_p2), %s2194_s25, 1 }
   0x7   : > { %1060 = vmatpush1.bf16.msra.mxu0 (!%p240_p2), %v2508_v1  ;;  %v2514_v5 = vld [vmem:[%s3423_s1 + $0x120] ss:$8 sps:$4 sm:$0xff] (!%p240_p2)   ;;  %p273_p3 = scmp.lt.s32.totalorder (!%p240_p2), %s2199_s13, 3  ;;  %v2515_v6 = vld [vmem:[%s3423_s1 + $0x134] ss:$8 sps:$4 sm:$0xff] (!%p240_p2)   ;;  %vm2755_vm0 = vmmov (!%p240_p2), 0  }
   0x8   : > { %1061 = vmatprep.subr.bf16.mxu0 (!%p240_p2), %v2509_v2  ;;  %v2517_v7 = vld [vmem:[%s3423_s1 + $0x130] ss:$8 sps:$4 sm:$0xff] (!%p240_p2)   ;;  %v2518_v8 = vld [vmem:[%s3423_s1 + $0x144] ss:$8 sps:$4 sm:$0xff] (!%p240_p2)   ;;  %v2520_v9 = vld [vmem:[%s3423_s1 + $0x140] ss:$8 sps:$4 sm:$0xff] (!%p240_p2)  }
   0x9   : > { %v2521_v10 = vld [vmem:[%s3423_s1 + $0x154] ss:$8 sps:$4 sm:$0xff] (!%p240_p2)   ;;  %v2523_v11 = vld [vmem:[%s3423_s1 + $0x150] ss:$8 sps:$4 sm:$0xff] (!%p240_p2)   ;;  %v2524_v12 = vld [vmem:[%s3423_s1 + $0x164] ss:$8 sps:$4 sm:$0xff] (!%p240_p2)  }
   0xa   : > { %v2526_v14 = vld [vmem:[%s3423_s1 + $0x160] ss:$8 sps:$4 sm:$0xff] (!%p240_p2)   ;;  %v2527_v15 = vld [vmem:[%s3423_s1 + $0x174] ss:$8 sps:$4 sm:$0xff] (!%p240_p2)   ;;  %v2529_v16 = vld [vmem:[%s3423_s1 + $0x170] ss:$8 sps:$4 sm:$0xff] (!%p240_p2)  }
   0xb   : > { %1062 = vmatpush1.bf16.msra.mxu0 (!%p240_p2), %v2511_v3  ;;  %v2530_v17 = vld [vmem:[%s3423_s1 + $0x184] ss:$8 sps:$4 sm:$0xff] (!%p240_p2)   ;;  %v2532_v18 = vld [vmem:[%s3423_s1 + $0x180] ss:$8 sps:$4 sm:$0xff] (!%p240_p2)   ;;  %v2533_v19 = vld [vmem:[%s3423_s1 + $0x194] ss:$8 sps:$4 sm:$0xff] (!%p240_p2)  }
   0xc   : > { %1063 = vmatprep.subr.bf16.mxu0 (!%p240_p2), %v2512_v4  ;;  %v2578_v20 = vld [vmem:[%s3423_s1 + $0x4] ss:$8 sps:$4 sm:$0xff] (!%p240_p2)   ;;  %v2580_v21 = vld [vmem:[%s3423_s1] ss:$8 sps:$4 sm:$0xff] (!%p240_p2)   ;;  %v2535_v22 = vld [vmem:[%s3423_s1 + $0x190] ss:$8 sps:$4 sm:$0xff] (!%p240_p2)  }
   0xd   : > { %s3431_s13 = smov (!%p273_p3, %s2199_s13), 3  ;;  %1016 = vmatprep.subr.bf16.mxu1 %v2578_v20  ;;  %v2584_v23 = vld [vmem:[%s3423_s1 + $0x14] ss:$8 sps:$4 sm:$0xff]   ;;  %v2586_v24 = vld [vmem:[%s3423_s1 + $0x10] ss:$8 sps:$4 sm:$0xff]  }
   0xe   : > { %s2493_s25 = smul.u32 28, %s3431_s13  ;;  %1017 = vmatpush1.bf16.msra.mxu1 %v2580_v21  ;;  %v2536_v25 = vld [vmem:[%s3423_s1 + $0x1a4] ss:$8 sps:$4 sm:$0xff]   ;;  %v2538_v26 = vld [vmem:[%s3423_s1 + $0x1a0] ss:$8 sps:$4 sm:$0xff]   ;;  %s2202_s8 = sshll.u32 %s3431_s13, 3 }
   0xf   : > { %1064 = vmatpush1.bf16.msra.mxu0 %v2514_v5  ;;  %1018 = vmatprep.subr.bf16.mxu1 %v2584_v23  ;;  %v2590_v27 = vld [vmem:[%s3423_s1 + $0x24] ss:$8 sps:$4 sm:$0xff]   ;;  %v2539_v28 = vld [vmem:[%s3423_s1 + $0x1b4] ss:$8 sps:$4 sm:$0xff]   ;;  %v2592_v29 = vld [vmem:[%s3423_s1 + $0x20] ss:$8 sps:$4 sm:$0xff]   ;;  %s283_s15 = scalar_lea.vmem %s3429_s7, %s2202_s8 }
  0x10   : > { %1065 = vmatprep.subr.bf16.mxu0 %v2515_v6  ;;  %s2846_s9 = scalar_lea.vmem %s3422_s0, %s2493_s25  ;;  %v2596_v30 = vld [vmem:[%s3423_s1 + $0x34] ss:$8 sps:$4 sm:$0xff]   ;;  %v2541_v31 = vld [vmem:[%s3423_s1 + $0x1b0] ss:$8 sps:$4 sm:$0xff]   ;;  %v2542_v32 = vld [vmem:[%s3423_s1 + $0x1c4] ss:$8 sps:$4 sm:$0xff]  }
  0x11   : > { %v2556_v13 = vld [vmem:[%s2846_s9 + $0xc] ss:$28 sps:$4 sm:$0xff]   ;;  %v2598_v33 = vld [vmem:[%s3423_s1 + $0x30] ss:$8 sps:$4 sm:$0xff]   ;;  %v2545_v36 = vld [vmem:[%s3423_s1 + $0x1d4] ss:$8 sps:$4 sm:$0xff]  }
  0x12   : > { %1091 = vmatprep.mubr.bf16.mxu0 %v2556_v13  ;;  %1019 = vmatpush1.bf16.msra.mxu1 %v2586_v24  ;;  %v2602_v34 = vld [vmem:[%s3423_s1 + $0x44] ss:$8 sps:$4 sm:$0xff]   ;;  %v2544_v35 = vld [vmem:[%s3423_s1 + $0x1c0] ss:$8 sps:$4 sm:$0xff]   ;;  %v2608_v38 = vld [vmem:[%s3423_s1 + $0x54] ss:$8 sps:$4 sm:$0xff]  }
  0x13   : > { %1066 = vmatpush1.bf16.msra.mxu0 %v2517_v7  ;;  %1020 = vmatprep.subr.bf16.mxu1 %v2590_v27  ;;  %v2604_v37 = vld [vmem:[%s3423_s1 + $0x40] ss:$8 sps:$4 sm:$0xff]   ;;  %v2547_v39 = vld [vmem:[%s3423_s1 + $0x1d0] ss:$8 sps:$4 sm:$0xff]   ;;  %v2548_v40 = vld [vmem:[%s3423_s1 + $0x1e4] ss:$8 sps:$4 sm:$0xff]  }
  0x14   : > { %1067 = vmatprep.subr.bf16.mxu0 %v2518_v8  ;;  %v2610_v41 = vld [vmem:[%s3423_s1 + $0x50] ss:$8 sps:$4 sm:$0xff]   ;;  %v2614_v42 = vld [vmem:[%s3423_s1 + $0x64] ss:$8 sps:$4 sm:$0xff]   ;;  %v2550_v43 = vld [vmem:[%s3423_s1 + $0x1e0] ss:$8 sps:$4 sm:$0xff]  }
  0x15   : > { %v2551_v44 = vld [vmem:[%s3423_s1 + $0x1f4] ss:$8 sps:$4 sm:$0xff]   ;;  %v2616_v45 = vld [vmem:[%s3423_s1 + $0x60] ss:$8 sps:$4 sm:$0xff]   ;;  %v2553_v47 = vld [vmem:[%s3423_s1 + $0x1f0] ss:$8 sps:$4 sm:$0xff]  }
  0x16   : > { %1021 = vmatpush1.bf16.msra.mxu1 %v2592_v29  ;;  %v2620_v46 = vld [vmem:[%s3423_s1 + $0x74] ss:$8 sps:$4 sm:$0xff]   ;;  %v2559_v48 = vld [vmem:[%s3423_s1 + $0x204] ss:$8 sps:$4 sm:$0xff]   ;;  %v2622_v49 = vld [vmem:[%s3423_s1 + $0x70] ss:$8 sps:$4 sm:$0xff]  }
  0x17   : > { %1068 = vmatpush1.bf16.msra.mxu0 %v2520_v9  ;;  %1022 = vmatprep.subr.bf16.mxu1 %v2596_v30  ;;  %v2626_v50 = vld [vmem:[%s3423_s1 + $0x84] ss:$8 sps:$4 sm:$0xff]   ;;  %v2557_v52 = vld [vmem:[%s3423_s1 + $0x200] ss:$8 sps:$4 sm:$0xff]   ;;  %v2562_v53 = vld [vmem:[%s3423_s1 + $0x214] ss:$8 sps:$4 sm:$0xff]  }
  0x18   : > { %1069 = vmatprep.subr.bf16.mxu0 %v2521_v10  ;;  %v2554_v51 = vld [vmem:[%s2846_s9 + $0x8] ss:$28 sps:$4 sm:$0xff]   ;;  %v2632_v55 = vld [vmem:[%s3423_s1 + $0x94] ss:$8 sps:$4 sm:$0xff]   ;;  %v2560_v57 = vld [vmem:[%s3423_s1 + $0x210] ss:$8 sps:$4 sm:$0xff]  }
  0x19   : > { %v2628_v54 = vld [vmem:[%s3423_s1 + $0x80] ss:$8 sps:$4 sm:$0xff]   ;;  %v2637_v56 = vld [vmem:[%s2846_s9 + $0x14] ss:$28 sps:$4 sm:$0xff]   ;;  %v2565_v58 = vld [vmem:[%s3423_s1 + $0x224] ss:$8 sps:$4 sm:$0xff]  }
  0x1a   : > { %1023 = vmatpush1.bf16.msra.mxu1 %v2598_v33  ;;  %v2634_v59 = vld [vmem:[%s3423_s1 + $0x90] ss:$8 sps:$4 sm:$0xff]   ;;  %v2641_v60 = vld [vmem:[%s3423_s1 + $0xa4] ss:$8 sps:$4 sm:$0xff]   ;;  %v2563_v61 = vld [vmem:[%s3423_s1 + $0x220] ss:$8 sps:$4 sm:$0xff]  }
  0x1b   : > { %1070 = vmatpush1.bf16.msra.mxu0 %v2523_v11  ;;  %1024 = vmatprep.subr.bf16.mxu1 %v2602_v34  ;;  %v2568_v62 = vld [vmem:[%s3423_s1 + $0x234] ss:$8 sps:$4 sm:$0xff]   ;;  %v2643_v63 = vld [vmem:[%s3423_s1 + $0xa0] ss:$8 sps:$4 sm:$0xff]   ;;  %v2566_v1 = vld [vmem:[%s3423_s1 + $0x230] ss:$8 sps:$4 sm:$0xff]  }
  0x1c   : > { %1071 = vmatprep.subr.bf16.mxu0 %v2524_v12  ;;  %v2647_v0 = vld [vmem:[%s3423_s1 + $0xb4] ss:$8 sps:$4 sm:$0xff]   ;;  %v2571_v2 = vld [vmem:[%s3423_s1 + $0x244] ss:$8 sps:$4 sm:$0xff]   ;;  %v2649_v3 = vld [vmem:[%s3423_s1 + $0xb0] ss:$8 sps:$4 sm:$0xff]  }
  0x1d   : > { %v2653_v4 = vld [vmem:[%s3423_s1 + $0xc4] ss:$8 sps:$4 sm:$0xff]   ;;  %v2569_v6 = vld [vmem:[%s3423_s1 + $0x240] ss:$8 sps:$4 sm:$0xff]   ;;  %v2574_v7 = vld [vmem:[%s3423_s1 + $0x254] ss:$8 sps:$4 sm:$0xff]  }
  0x1e   : > { %1025 = vmatpush1.bf16.msra.mxu1 %v2604_v37  ;;  %v2679_v5 = vld [vmem:[%s2846_s9 + $0x4] ss:$28 sps:$4 sm:$0xff]   ;;  %v2659_v9 = vld [vmem:[%s3423_s1 + $0xd4] ss:$8 sps:$4 sm:$0xff]   ;;  %v2572_v10 = vld [vmem:[%s3423_s1 + $0x250] ss:$8 sps:$4 sm:$0xff]  }
  0x1f   : > { %1072 = vmatpush1.bf16.msra.mxu0 %v2526_v14  ;;  %1026 = vmatprep.subr.bf16.mxu1 %v2608_v38  ;;  %v2655_v8 = vld [vmem:[%s3423_s1 + $0xc0] ss:$8 sps:$4 sm:$0xff]   ;;  %v2661_v11 = vld [vmem:[%s3423_s1 + $0xd0] ss:$8 sps:$4 sm:$0xff]   ;;  %v2577_v12 = vld [vmem:[%s3423_s1 + $0x264] ss:$8 sps:$4 sm:$0xff]  }
  0x20   : > { %1073 = vmatprep.subr.bf16.mxu0 %v2527_v15  ;;  %1048 = vmatprep.mubr.bf16.mxu1 %v2679_v5  ;;  %v2665_v13 = vld [vmem:[%s3423_s1 + $0xe4] ss:$8 sps:$4 sm:$0xff]   ;;  %v2575_v14 = vld [vmem:[%s3423_s1 + $0x260] ss:$8 sps:$4 sm:$0xff]   ;;  %v2595_v23 = vld [vmem:[%s3423_s1 + $0x294] ss:$8 sps:$4 sm:$0xff]  }
  0x21   : > { %v2667_v15 = vld [vmem:[%s3423_s1 + $0xe0] ss:$8 sps:$4 sm:$0xff]   ;;  %v2589_v20 = vld [vmem:[%s3423_s1 + $0x284] ss:$8 sps:$4 sm:$0xff]   ;;  %v2593_v24 = vld [vmem:[%s3423_s1 + $0x290] ss:$8 sps:$4 sm:$0xff]  }
  0x22   : > { %1027 = vmatpush1.bf16.msra.mxu1 %v2610_v41  ;;  %v2677_v21 = vld [vmem:[%s2846_s9] ss:$28 sps:$4 sm:$0xff]   ;;  %v2613_v29 = vld [vmem:[%s3423_s1 + $0x2c4] ss:$8 sps:$4 sm:$0xff]   ;;  %v2644_v41 = vld [vmem:[%s3423_s1 + $0x310] ss:$8 sps:$4 sm:$0xff]  }
  0x23   : > { %1074 = vmatpush1.bf16.msra.mxu0 %v2529_v16  ;;  %1028 = vmatprep.subr.bf16.mxu1 %v2614_v42  ;;  %v2583_v16 = vld [vmem:[%s3423_s1 + $0x274] ss:$8 sps:$4 sm:$0xff]   ;;  %v2611_v30 = vld [vmem:[%s3423_s1 + $0x2c0] ss:$8 sps:$4 sm:$0xff]   ;;  %v2625_v33 = vld [vmem:[%s3423_s1 + $0x2e4] ss:$8 sps:$4 sm:$0xff]  }
  0x24   : > { %1075 = vmatprep.subr.bf16.mxu0 %v2530_v17  ;;  %v2671_v17 = vld [vmem:[%s3423_s1 + $0xf4] ss:$8 sps:$4 sm:$0xff]   ;;  %v2623_v34 = vld [vmem:[%s3423_s1 + $0x2e0] ss:$8 sps:$4 sm:$0xff]   ;;  %v2640_v37 = vld [vmem:[%s3423_s1 + $0x304] ss:$8 sps:$4 sm:$0xff]  }
  0x25   : > { %v2607_v27 = vld [vmem:[%s3423_s1 + $0x2b4] ss:$8 sps:$4 sm:$0xff]   ;;  %v2635_v38 = vld [vmem:[%s2846_s9 + $0x10] ss:$28 sps:$4 sm:$0xff]   ;;  %v2752_v42 = vmov 0  }
  0x26   : > { %1029 = vmatpush1.bf16.msra.mxu1 %v2616_v45  ;;  %v2658_v45 = vld [vmem:[%s3423_s1 + $0x334] ss:$8 sps:$4 sm:$0xff]  }
  0x27   : > { %1076 = vmatpush1.bf16.msra.mxu0 %v2532_v18  ;;  %1030 = vmatprep.subr.bf16.mxu1 %v2620_v46  ;;  %v2581_v18 = vld [vmem:[%s3423_s1 + $0x270] ss:$8 sps:$4 sm:$0xff]  }
  0x28   : > { %1077 = vmatprep.subr.bf16.mxu0 %v2533_v19  ;;  %v2673_v19 = vld [vmem:[%s3423_s1 + $0xf0] ss:$8 sps:$4 sm:$0xff]  }
  0x29   : > { %v2656_v46 = vld [vmem:[%s3423_s1 + $0x330] ss:$8 sps:$4 sm:$0xff]  }
  0x2a   : > { %1031 = vmatpush1.bf16.msra.mxu1 %v2622_v49  ;;  %v2670_v49 = vld [vmem:[%s3423_s1 + $0x354] ss:$8 sps:$4 sm:$0xff]  }
  0x2b   : > { %1078 = vmatpush1.bf16.msra.mxu0 %v2535_v22  ;;  %1032 = vmatprep.subr.bf16.mxu1 %v2626_v50  ;;  %v2587_v22 = vld [vmem:[%s3423_s1 + $0x280] ss:$8 sps:$4 sm:$0xff]   ;;  %v2668_v50 = vld [vmem:[%s3423_s1 + $0x350] ss:$8 sps:$4 sm:$0xff]  }
  0x2c   : > { %1079 = vmatprep.subr.bf16.mxu0 %v2536_v25  ;;  %v2601_v25 = vld [vmem:[%s3423_s1 + $0x2a4] ss:$8 sps:$4 sm:$0xff]   ;;  %v2697_v5 = vld [vmem:[%s3424_s2 + $0x30] sm:$0xff]  }
  0x2e   : > { %1033 = vmatpush1.bf16.msra.mxu1 %v2628_v54  ;;  %v2680_v54 = vld [vmem:[%s3423_s1 + $0x370] ss:$8 sps:$4 sm:$0xff]  }
  0x2f   : > { %1080 = vmatpush1.bf16.msra.mxu0 %v2538_v26  ;;  %1034 = vmatprep.subr.bf16.mxu1 %v2632_v55  ;;  %v2599_v26 = vld [vmem:[%s3423_s1 + $0x2a0] ss:$8 sps:$4 sm:$0xff]   ;;  %v2683_v55 = vld [vmem:[%s2846_s9 + $0x18] ss:$28 sps:$4 sm:$0xff]  }
  0x30   : > { %1081 = vmatprep.subr.bf16.mxu0 %v2539_v28  ;;  %v2605_v28 = vld [vmem:[%s3423_s1 + $0x2b0] ss:$8 sps:$4 sm:$0xff]  }
  0x32   : > { %1035 = vmatpush1.bf16.msra.mxu1 %v2634_v59  ;;  %v2687_v59 = vld [vmem:[%s3424_s2 + $0x8] sm:$0xff]  }
  0x33   : > { %1082 = vmatpush1.bf16.msra.mxu0 %v2541_v31  ;;  %1036 = vmatprep.subr.bf16.mxu1 %v2641_v60  ;;  %v2619_v31 = vld [vmem:[%s3423_s1 + $0x2d4] ss:$8 sps:$4 sm:$0xff]  }
  0x34   : > { %1083 = vmatprep.subr.bf16.mxu0 %v2542_v32  ;;  %v2617_v32 = vld [vmem:[%s3423_s1 + $0x2d0] ss:$8 sps:$4 sm:$0xff]  }
  0x35   : > { %v2688_v60 = vld [vmem:[%s3424_s2 + $0x50] sm:$0xff]  }
  0x36   : > { %1037 = vmatpush1.bf16.msra.mxu1 %v2643_v63  ;;  %v2691_v63 = vld [vmem:[%s3424_s2 + $0x18] sm:$0xff]  }
  0x37   : > { %1084 = vmatpush1.bf16.msra.mxu0 %v2544_v35  ;;  %1038 = vmatprep.subr.bf16.mxu1 %v2647_v0  ;;  %v2631_v35 = vld [vmem:[%s3423_s1 + $0x2f4] ss:$8 sps:$4 sm:$0xff]   ;;  %v2692_v0 = vld [vmem:[%s3424_s2 + $0x60] sm:$0xff]  }
  0x38   : > { %1085 = vmatprep.subr.bf16.mxu0 %v2545_v36  ;;  %v2629_v36 = vld [vmem:[%s3423_s1 + $0x2f0] ss:$8 sps:$4 sm:$0xff]  }
  0x3a   : > { %1039 = vmatpush1.bf16.msra.mxu1 %v2649_v3  ;;  %v2695_v3 = vld [vmem:[%s3424_s2 + $0x28] sm:$0xff]  }
  0x3b   : > { %1086 = vmatpush1.bf16.msra.mxu0 %v2547_v39  ;;  %1040 = vmatprep.subr.bf16.mxu1 %v2653_v4  ;;  %v2638_v39 = vld [vmem:[%s3423_s1 + $0x300] ss:$8 sps:$4 sm:$0xff]   ;;  %v2696_v4 = vld [vmem:[%s3424_s2 + $0x70] sm:$0xff]  }
  0x3c   : > { %1087 = vmatprep.subr.bf16.mxu0 %v2548_v40  ;;  %v2646_v40 = vld [vmem:[%s3423_s1 + $0x314] ss:$8 sps:$4 sm:$0xff]  }
  0x3e   : > { %1041 = vmatpush1.bf16.msra.mxu1 %v2655_v8 }
  0x3f   : > { %1088 = vmatpush1.bf16.msra.mxu0 %v2550_v43  ;;  %1042 = vmatprep.subr.bf16.mxu1 %v2659_v9  ;;  %v2652_v43 = vld [vmem:[%s3423_s1 + $0x324] ss:$8 sps:$4 sm:$0xff]  }
  0x40   : > { %1089 = vmatprep.subr.bf16.mxu0 %v2551_v44  ;;  %v2650_v44 = vld [vmem:[%s3423_s1 + $0x320] ss:$8 sps:$4 sm:$0xff]  }
  0x42   : > { %1043 = vmatpush1.bf16.msra.mxu1 %v2661_v11  ;;  %v2699_v11 = vld [vmem:[%s3424_s2 + $0x38] sm:$0xff]  }
  0x43   : > { %1090 = vmatpush1.bf16.msra.mxu0 %v2553_v47  ;;  %1044 = vmatprep.subr.bf16.mxu1 %v2665_v13  ;;  %v2664_v47 = vld [vmem:[%s3423_s1 + $0x344] ss:$8 sps:$4 sm:$0xff]  }
  0x44   : > { %1102 = vmatprep.subr.bf16.mxu0 %v2559_v48  ;;  %v2662_v48 = vld [vmem:[%s3423_s1 + $0x340] ss:$8 sps:$4 sm:$0xff]  }
  0x46   : > { %1092 = vmatmul.mubr.bf16.vlgmr.msra.gmra.mrb[0].mxu0 %v2554_v51  ;;  %1045 = vmatpush1.bf16.msra.mxu1 %v2667_v15  ;;  %v2676_v51 = vld [vmem:[%s3423_s1 + $0x364] ss:$8 sps:$4 sm:$0xff]   ;;  %v294_v15 = vld [vmem:[%s3428_s6] sm:$0x3] }
  0x47   : > { %1103 = vmatpush1.bf16.msra.mxu0 %v2557_v52  ;;  %1134 = vmatprep.mubr.bf16.mxu0 %v2637_v56  ;;  %v2674_v52 = vld [vmem:[%s3423_s1 + $0x360] ss:$8 sps:$4 sm:$0xff]  }
  0x48   : > { %1104 = vmatprep.subr.bf16.mxu0 %v2562_v53  ;;  %1046 = vmatprep.subr.bf16.mxu1 %v2671_v17  ;;  %v2682_v53 = vld [vmem:[%s3423_s1 + $0x374] ss:$8 sps:$4 sm:$0xff]   ;;  %v2684_v56 = vld [vmem:[%s3424_s2 + $0x40] sm:$0xff]  }
  0x4a   : > { %1047 = vmatpush1.bf16.msra.mxu1 %v2673_v19 }
  0x4b   : > { %1105 = vmatpush1.bf16.msra.mxu0 %v2560_v57  ;;  %v2685_v57 = vld [vmem:[%s3424_s2] sm:$0xff]   ;;  %2368 = vmatprep.subr.bf16.mxu1 %v2684_v56 }
  0x4c   : > { %1106 = vmatprep.subr.bf16.mxu0 %v2565_v58  ;;  %v2686_v58 = vld [vmem:[%s3424_s2 + $0x48] sm:$0xff]  }
  0x4d   : > { %1049 = vmatmul.mubr.bf16.vlgmr.msra.gmra.mrb[0].mxu1 %v2677_v21 }
  0x4e   : > { %2369 = vmatpush3.bf16.msra.mxu1 %v2685_v57 }
  0x4f   : > { %1107 = vmatpush1.bf16.msra.mxu0 %v2563_v61  ;;  %2370 = vmatprep.subr.bf16.mxu1 %v2686_v58  ;;  %v2689_v61 = vld [vmem:[%s3424_s2 + $0x10] sm:$0xff]  }
  0x50   : > { %1108 = vmatprep.subr.bf16.mxu0 %v2568_v62  ;;  %v2690_v62 = vld [vmem:[%s3424_s2 + $0x58] sm:$0xff]  }
  0x52   : > { %2371 = vmatpush3.bf16.msra.mxu1 %v2687_v59 }
  0x53   : > { %1109 = vmatpush1.bf16.msra.mxu0 %v2566_v1  ;;  %2372 = vmatprep.subr.bf16.mxu1 %v2688_v60  ;;  %v2693_v1 = vld [vmem:[%s3424_s2 + $0x20] sm:$0xff]  }
  0x54   : > { %1110 = vmatprep.subr.bf16.mxu0 %v2571_v2  ;;  %v2694_v2 = vld [vmem:[%s3424_s2 + $0x68] sm:$0xff]  }
  0x56   : > { %2373 = vmatpush3.bf16.msra.mxu1 %v2689_v61 }
  0x57   : > { %1111 = vmatpush1.bf16.msra.mxu0 %v2569_v6  ;;  %2374 = vmatprep.subr.bf16.mxu1 %v2690_v62 }
  0x58   : > { %1112 = vmatprep.subr.bf16.mxu0 %v2574_v7  ;;  %v2698_v7 = vld [vmem:[%s3424_s2 + $0x78] sm:$0xff]  }
  0x5a   : > { %2375 = vmatpush3.bf16.msra.mxu1 %v2691_v63 }
  0x5b   : > { %1113 = vmatpush1.bf16.msra.mxu0 %v2572_v10  ;;  %2376 = vmatprep.subr.bf16.mxu1 %v2692_v0 }
  0x5c   : > { %1114 = vmatprep.subr.bf16.mxu0 %v2577_v12  ;;  %v410_v12 = vlaneseq }
  0x5e   : > { %2377 = vmatpush3.bf16.msra.mxu1 %v2693_v1  ;;  %v3203_v13 = vshrl.u32 %v410_v12, 7 }
  0x5f   : > { %1115 = vmatpush1.bf16.msra.mxu0 %v2575_v14  ;;  %2378 = vmatprep.subr.bf16.mxu1 %v2694_v2 }
  0x60   : > { %1116 = vmatprep.subr.bf16.mxu0 %v2583_v16  ;;  %v3206_v14 = vsub.s32 0, %v3203_v13  ;;  %v3212_v16 = vsub.s32 1, %v3203_v13 }
  0x62   : > { %2379 = vmatpush3.bf16.msra.mxu1 %v2695_v3  ;;  %v413_v17 = vrot.slane %v294_v15, %v3206_v14 }
  0x63   : > { %1117 = vmatpush1.bf16.msra.mxu0 %v2581_v18  ;;  %2380 = vmatprep.subr.bf16.mxu1 %v2696_v4  ;;  %v417_v18 = vrot.slane %v294_v15, %v3212_v16 }
  0x64   : > { %1118 = vmatprep.subr.bf16.mxu0 %v2589_v20 }
  0x66   : > { %2381 = vmatpush3.bf16.msra.mxu1 %v2697_v5 }
  0x67   : > { %1119 = vmatpush1.bf16.msra.mxu0 %v2587_v22  ;;  %2382 = vmatprep.subr.bf16.mxu1 %v2698_v7 }
  0x68   : > { %1120 = vmatprep.subr.bf16.mxu0 %v2595_v23 }
  0x6a   : > { %2383 = vmatpush3.bf16.msra.mxu1 %v2699_v11 }
  0x6b   : > { %1121 = vmatpush1.bf16.msra.mxu0 %v2593_v24 }
  0x6c   : > { %1122 = vmatprep.subr.bf16.mxu0 %v2601_v25 }
  0x6f   : > { %1123 = vmatpush1.bf16.msra.mxu0 %v2599_v26 }
  0x70   : > { %1124 = vmatprep.subr.bf16.mxu0 %v2607_v27 }
  0x73   : > { %1125 = vmatpush1.bf16.msra.mxu0 %v2605_v28 }
  0x74   : > { %1126 = vmatprep.subr.bf16.mxu0 %v2613_v29 }
  0x77   : > { %1127 = vmatpush1.bf16.msra.mxu0 %v2611_v30 }
  0x78   : > { %1128 = vmatprep.subr.bf16.mxu0 %v2619_v31 }
  0x7b   : > { %1129 = vmatpush1.bf16.msra.mxu0 %v2617_v32 }
  0x7c   : > { %1130 = vmatprep.subr.bf16.mxu0 %v2625_v33 }
  0x7f   : > { %1131 = vmatpush1.bf16.msra.mxu0 %v2623_v34 }
  0x80   : > { %1132 = vmatprep.subr.bf16.mxu0 %v2631_v35 }
  0x83   : > { %1133 = vmatpush1.bf16.msra.mxu0 %v2629_v36 }
  0x84   : > { %1145 = vmatprep.subr.bf16.mxu0 %v2640_v37 }
  0x86   : > { %1135 = vmatmul.mubr.bf16.vlgmr.msra.gmra.mrb[0].mxu0 %v2635_v38 }
  0x87   : > { %1146 = vmatpush1.bf16.msra.mxu0 %v2638_v39  ;;  %1177 = vmatprep.mubr.bf16.mxu0 %v2752_v42 }
  0x88   : > { %1147 = vmatprep.subr.bf16.mxu0 %v2646_v40 }
  0x8b   : > { %1148 = vmatpush1.bf16.msra.mxu0 %v2644_v41 }
  0x8c   : > { %1149 = vmatprep.subr.bf16.mxu0 %v2652_v43 }
  0x8f   : > { %1150 = vmatpush1.bf16.msra.mxu0 %v2650_v44 }
  0x90   : > { %1151 = vmatprep.subr.bf16.mxu0 %v2658_v45 }
  0x93   : > { %1152 = vmatpush1.bf16.msra.mxu0 %v2656_v46 }
  0x94   : > { %1153 = vmatprep.subr.bf16.mxu0 %v2664_v47 }
  0x97   : > { %1154 = vmatpush1.bf16.msra.mxu0 %v2662_v48 }
  0x98   : > { %1155 = vmatprep.subr.bf16.mxu0 %v2670_v49 }
  0x9b   : > { %1156 = vmatpush1.bf16.msra.mxu0 %v2668_v50 }
  0x9c   : > { %1157 = vmatprep.subr.bf16.mxu0 %v2676_v51 }
  0x9f   : > { %1158 = vmatpush1.bf16.msra.mxu0 %v2674_v52 }
  0xa0   : > { %1159 = vmatprep.subr.bf16.mxu0 %v2682_v53 }
  0xa3   : > { %1160 = vmatpush1.bf16.msra.mxu0 %v2680_v54 }
  0xa6   : > { %1178 = vmatmul.mubr.bf16.vlgmr.msra.gmra.mrb[0].mxu0 %v2683_v55 }
 0x120   : > { %v1050_v6 = vpop.f32.mrb[0].mxu1 }
 0x121   : > { %v1052_v8 = vpop.f32.mrb[1].mxu1  ;;  %v1051_v19 = vadd.f32 %v1050_v6, %v413_v17 }
 0x122   : > { %v1054_v9 = vpop.f32.mrb[2].mxu1  ;;  %v1053_v20 = vadd.f32 %v1052_v8, %v417_v18 }
 0x123   : > { %v1056_v10 = vpop.f32.mrb[3].mxu1  ;;  %v1055_v22 = vadd.f32 %v1054_v9, %v413_v17 }
 0x124   : > { %v1057_v25 = vadd.f32 %v1056_v10, %v417_v18 }
 0x179   : > { %v1179_v21 = vpop.f32.mrb[0].mxu0 }
 0x17a   : > { %v3216_v23 = vadd.f32 %v1179_v21, %v1051_v19  ;;  %v1181_v24 = vpop.f32.mrb[1].mxu0 }
 0x17b   : > { %v3218_v26 = vadd.f32 %v1181_v24, %v1053_v20  ;;  %v1183_v27 = vpop.f32.mrb[2].mxu0 }
 0x17c   : > { %v1188_v28 = vrot.slane %v3216_v23, 4  ;;  %v3221_v29 = vadd.f32 %v1183_v27, %v1055_v22  ;;  %v1185_v30 = vpop.f32.mrb[3].mxu0 }
 0x17d   : > { %v1194_v31 = vrot.slane %v3218_v26, 4  ;;  %v3224_v32 = vadd.f32 %v1185_v30, %v1057_v25 }
 0x17e   : > { %v1189_v33 = vadd.f32 %v3216_v23, %v1188_v28  ;;  %v1200_v34 = vrot.slane %v3221_v29, 4 }
 0x17f   : > { %v1195_v35 = vadd.f32 %v3218_v26, %v1194_v31  ;;  %v1206_v36 = vrot.slane %v3224_v32, 4 }
 0x180   : > { %v1190_v37 = vrot.slane %v1189_v33, 2  ;;  %v1201_v38 = vadd.f32 %v3221_v29, %v1200_v34 }
 0x181   : > { %v1196_v39 = vrot.slane %v1195_v35, 2  ;;  %v1207_v40 = vadd.f32 %v3224_v32, %v1206_v36 }
 0x182   : > { %v1191_v41 = vadd.f32 %v1190_v37, %v1189_v33  ;;  %v1202_v42 = vrot.slane %v1201_v38, 2 }
 0x183   : > { %v1197_v43 = vadd.f32 %v1196_v39, %v1195_v35  ;;  %v1208_v44 = vrot.slane %v1207_v40, 2 }
 0x184   : > { %v1192_v45 = vrot.slane %v1191_v41, 1  ;;  %v1203_v46 = vadd.f32 %v1202_v42, %v1201_v38  ;;  %v2753_v42 = vmov 1966171168  }
 0x185   : > { %v1198_v47 = vrot.slane %v1197_v43, 1  ;;  %v1209_v48 = vadd.f32 %v1208_v44, %v1207_v40 }
 0x186   : > { %v1193_v49 = vadd.f32 %v1192_v45, %v1191_v41  ;;  %v1204_v50 = vrot.slane %v1203_v46, 1 }
 0x187   : > { %v1199_v51 = vadd.f32 %v1198_v47, %v1197_v43  ;;  %v1210_v52 = vrot.slane %v1209_v48, 1  ;;  %v1267_v43 = vunpack.c.l.s4 %v2753_v42 }
 0x188   : > { %v3232_v53 = vmul.f32 0.125, %v1193_v49  ;;  %v1205_v54 = vadd.f32 %v1204_v50, %v1203_v46 }
 0x189   : > { %v3234_v55 = vmul.f32 0.125, %v1199_v51  ;;  %v1211_v56 = vadd.f32 %v1210_v52, %v1209_v48  ;;  %v1268_v44 = vunpack.c.0.s8 %v1267_v43 }
 0x18a   : > { %v1217_v57 = vsub.f32 %v3216_v23, %v3232_v53  ;;  %v3238_v58 = vmul.f32 0.125, %v1205_v54  ;;  %v295_v54 = vld [vmem:[%s3428_s6 + $0x2] sm:$0x3] }
 0x18b   : > { %v1218_v59 = vsub.f32 %v3218_v26, %v3234_v55  ;;  %v3242_v60 = vmul.f32 0.125, %v1211_v56  ;;  %v1271_v46 = vsub.s32 %v1268_v44, %v3203_v13 }
 0x18c   : > { %v1221_v61 = vmul.f32 %v1217_v57, %v1217_v57  ;;  %v1219_v62 = vsub.f32 %v3221_v29, %v3238_v58 }
 0x18d   : > { %v1222_v63 = vmul.f32 %v1218_v59, %v1218_v59  ;;  %v1220_v0 = vsub.f32 %v3224_v32, %v3242_v60 }
 0x18e   : > { %v1225_v1 = vrot.slane %v1221_v61, 4  ;;  %v1223_v2 = vmul.f32 %v1219_v62, %v1219_v62 }
 0x18f   : > { %v1231_v3 = vrot.slane %v1222_v63, 4  ;;  %v1224_v4 = vmul.f32 %v1220_v0, %v1220_v0 }
 0x190   : > { %v1226_v5 = vadd.f32 %v1225_v1, %v1221_v61  ;;  %v1237_v6 = vrot.slane %v1223_v2, 4 }
 0x191   : > { %v1232_v7 = vadd.f32 %v1231_v3, %v1222_v63  ;;  %v1243_v8 = vrot.slane %v1224_v4, 4 }
 0x192   : > { %v1227_v9 = vrot.slane %v1226_v5, 2  ;;  %v1238_v10 = vadd.f32 %v1237_v6, %v1223_v2 }
 0x193   : > { %v1233_v11 = vrot.slane %v1232_v7, 2  ;;  %v1244_v12 = vadd.f32 %v1243_v8, %v1224_v4 }
 0x194   : > { %v1228_v15 = vadd.f32 %v1227_v9, %v1226_v5  ;;  %v1239_v17 = vrot.slane %v1238_v10, 2 }
 0x195   : > { %v1234_v18 = vadd.f32 %v1233_v11, %v1232_v7  ;;  %v1245_v19 = vrot.slane %v1244_v12, 2 }
 0x196   : > { %v1229_v20 = vrot.slane %v1228_v15, 1  ;;  %v1240_v21 = vadd.f32 %v1239_v17, %v1238_v10 }
 0x197   : > { %v1235_v22 = vrot.slane %v1234_v18, 1  ;;  %v1246_v24 = vadd.f32 %v1245_v19, %v1244_v12 }
 0x198   : > { %v1230_v25 = vadd.f32 %v1229_v20, %v1228_v15  ;;  %v1241_v27 = vrot.slane %v1240_v21, 1 }
 0x199   : > { %v1236_v28 = vadd.f32 %v1235_v22, %v1234_v18  ;;  %v1247_v30 = vrot.slane %v1246_v24, 1 }
 0x19a   : > { %v1249_v31 = vmul.f32 0.125, %v1230_v25  ;;  %v1242_v33 = vadd.f32 %v1241_v27, %v1240_v21 }
 0x19b   : > { %v1250_v34 = vmul.f32 0.125, %v1236_v28  ;;  %v1248_v35 = vadd.f32 %v1247_v30, %v1246_v24 }
 0x19c   : > { %v1253_v36 = vadd.f32 1e-05, %v1249_v31  ;;  %v1251_v37 = vmul.f32 0.125, %v1242_v33  ;;  %v2700_v31 = vld [vmem:[%s3425_s3] sm:$0xff]   ;;  %v2754_v33 = vmov 0.0  }
 0x19d   : > { %v1254_v38 = vadd.f32 1e-05, %v1250_v34  ;;  %v1252_v39 = vmul.f32 0.125, %v1248_v35  ;;  %2417 = vmatprep.subr.bf16.mxu1 %v2754_v33  ;;  %v2702_v34 = vld [vmem:[%s3425_s3 + $0x10] sm:$0xff]   ;;  %v2703_v35 = vld [vmem:[%s3425_s3 + $0x18] sm:$0xff]  }
 0x19e   : > { %2724 = vrsqrt.f32 %v1253_v36  ;;  %v1255_v40 = vadd.f32 1e-05, %v1251_v37  ;;  %v2704_v36 = vld [vmem:[%s3425_s3 + $0x20] sm:$0xff]   ;;  %v2705_v37 = vld [vmem:[%s3425_s3 + $0x28] sm:$0xff]  }
 0x19f   : > { %2726 = vrsqrt.f32 %v1254_v38  ;;  %v1256_v41 = vadd.f32 1e-05, %v1252_v39  ;;  %v2706_v38 = vld [vmem:[%s3425_s3 + $0x30] sm:$0xff]   ;;  %v2707_v39 = vld [vmem:[%s3425_s3 + $0x38] sm:$0xff]  }
 0x1a0   : > { %2728 = vrsqrt.f32 %v1255_v40 }
 0x1a1   : > { %2730 = vrsqrt.f32 %v1256_v41  ;;  %v2322_v41 = vld [vmem:[%s3428_s6 + $0x6] ss:$0 sm:$0xff] }
 0x1a8   : > { %v2725_v45 = vpop.eup %2724 }
 0x1a9   : > { %v2727_v47 = vpop.eup %2726 }
 0x1aa   : > { %v2729_v48 = vpop.eup %2728  ;;  %v1265_v49 = vcombine.low %v2725_v45, %v2727_v47 }
 0x1ab   : > { %v2731_v50 = vpop.eup %2730 }
 0x1ac   : > { %v1272_v51 = vrot.slane %v1265_v49, %v1271_v46  ;;  %v1280_v52 = vcombine.low %v2729_v48, %v2731_v50 }
 0x1ae   : > { %v1279_v56 = vrot.slane %v1272_v51, %v1271_v46  ;;  %v1287_v57 = vrot.slane %v1280_v52, %v1271_v46 }
 0x1b0   : > { %v1294_v59 = vrot.slane %v1287_v57, %v1271_v46  ;;  %v1297_v61 = vmul.f32 %v1279_v56, %v295_v54 }
 0x1b2   : > { %v1298_v62 = vmul.f32 %v1294_v59, %v295_v54  ;;  %v1304_v63 = vrot.slane %v1297_v61, %v3206_v14  ;;  %v1308_v0 = vrot.slane %v1297_v61, %v3212_v16 }
 0x1b4   : > { %v1312_v13 = vrot.slane %v1298_v62, %v3206_v14  ;;  %v1316_v1 = vrot.slane %v1298_v62, %v3212_v16  ;;  %v1321_v2 = vmul.f32 %v1304_v63, %v3232_v53  ;;  %v1322_v3 = vmul.f32 %v1308_v0, %v3234_v55  ;;  %v296_v53 = vld [vmem:[%s3428_s6 + $0x4] sm:$0x3] }
 0x1b5   : > { %v1364_v4 = vmul.f32 %v3218_v26, %v1308_v0  ;;  %v1363_v5 = vmul.f32 %v3216_v23, %v1304_v63 }
 0x1b6   : > { %v1323_v6 = vmul.f32 %v1312_v13, %v3238_v58  ;;  %v1324_v7 = vmul.f32 %v1316_v1, %v3242_v60  ;;  %v1329_v8 = vcombine.low %v1321_v2, %v1322_v3  ;;  %v1366_v9 = vmul.f32 %v3224_v32, %v1316_v1 }
 0x1b7   : > { %v1365_v10 = vmul.f32 %v3221_v29, %v1312_v13 }
 0x1b8   : > { %v1336_v11 = vrot.slane %v1329_v8, %v1271_v46  ;;  %v1344_v12 = vcombine.low %v1323_v6, %v1324_v7 }
 0x1ba   : > { %v1343_v55 = vrot.slane %v1336_v11, %v1271_v46  ;;  %v1351_v15 = vrot.slane %v1344_v12, %v1271_v46 }
 0x1bc   : > { %v1358_v26 = vrot.slane %v1351_v15, %v1271_v46  ;;  %v1361_v17 = vsub.f32 %v296_v53, %v1343_v55 }
 0x1be   : > { %v1362_v23 = vsub.f32 %v296_v53, %v1358_v26  ;;  %v1376_v58 = vrot.slane %v1361_v17, %v3212_v16  ;;  %v1372_v60 = vrot.slane %v1361_v17, %v3206_v14 }
 0x1c0   : > { %v1384_v18 = vrot.slane %v1362_v23, %v3212_v16  ;;  %v1390_v32 = vadd.f32 %v1376_v58, %v1364_v4  ;;  %v1380_v29 = vrot.slane %v1362_v23, %v3206_v14  ;;  %v1389_v19 = vadd.f32 %v1372_v60, %v1363_v5  ;;  %v2701_v16 = vld [vmem:[%s3425_s3 + $0x8] sm:$0xff]  }
 0x1c2   : > { %v1392_v20 = vadd.f32 %v1384_v18, %v1366_v9  ;;  %v1391_v21 = vadd.f32 %v1380_v29, %v1365_v10  ;;  %v1394_v22 = vmax.f32 %v1390_v32, 0.0  ;;  %v1393_v25 = vmax.f32 %v1389_v19, 0.0  ;;  %v1400_v32 = vld [vmem:[%s3428_s6 + $0x7] sm:$0x1] }
 0x1c4   : > { %v1396_v24 = vmax.f32 %v1392_v20, 0.0  ;;  %v1395_v27 = vmax.f32 %v1391_v21, 0.0  ;;  %v1401_v21 = vld [vmem:[%s3428_s6 + $0x8] sm:$0x1] }
 0x1c6   : > { %v1398_v28 = vpack.c.bf16 %v1396_v24, %v1394_v22  ;;  %v1397_v30 = vpack.c.bf16 %v1395_v27, %v1393_v25 }
 0x1c8   : > { %1568 = vmatprep.mubr.bf16.mxu1 %v1398_v28 }
 0x1c9   : > { %1569 = vmatmul.mubr.bf16.vlgmr.msra.gmra.mrb[4].mxu1 %v1397_v30 }
 0x1ca   : > { %2418 = vmatpush3.bf16.msra.mxu1 %v2700_v31  ;;  %2433 = vmatprep.mubr.msk.bf16.mxu1 %vm2755_vm0, %v2754_v33 }
 0x1cb   : > { %2419 = vmatprep.subr.bf16.mxu1 %v2754_v33 }
 0x1ce   : > { %2420 = vmatpush3.bf16.msra.mxu1 %v2701_v16 }
 0x1cf   : > { %2421 = vmatprep.subr.bf16.mxu1 %v2754_v33 }
 0x1d2   : > { %2422 = vmatpush3.bf16.msra.mxu1 %v2702_v34 }
 0x1d3   : > { %2423 = vmatprep.subr.bf16.mxu1 %v2754_v33 }
 0x1d6   : > { %2424 = vmatpush3.bf16.msra.mxu1 %v2703_v35 }
 0x1d7   : > { %2425 = vmatprep.subr.bf16.mxu1 %v2754_v33 }
 0x1da   : > { %2426 = vmatpush3.bf16.msra.mxu1 %v2704_v36 }
 0x1db   : > { %2427 = vmatprep.subr.bf16.mxu1 %v2754_v33 }
 0x1de   : > { %2428 = vmatpush3.bf16.msra.mxu1 %v2705_v37 }
 0x1df   : > { %2429 = vmatprep.subr.bf16.mxu1 %v2754_v33 }
 0x1e2   : > { %2430 = vmatpush3.bf16.msra.mxu1 %v2706_v38 }
 0x1e3   : > { %2431 = vmatprep.subr.bf16.mxu1 %v2754_v33 }
 0x1e6   : > { %2432 = vmatpush3.bf16.msra.mxu1 %v2707_v39 }
 0x1e7   : > { %2437 = vmatprep.subr.bf16.mxu1 %v2754_v33 }
 0x29c   : > { %v2384_v40 = vpop.f32.mrb[4].mxu1 }
 0x29d   : > { %v2385_v42 = vpop.f32.mrb[5].mxu1 }
 0x29e   : > { %v2386_v43 = vadd.f32 %v2385_v42, %v2384_v40  ;;  %v2387_v44 = vpop.f32.mrb[6].mxu1  ;;  %v2708_v42 = vld [vmem:[%s3426_s4] sm:$0xff]  }
 0x29f   : > { %v2388_v45 = vpop.f32.mrb[7].mxu1 }
 0x2a0   : > { %v1571_v46 = vadd.f32 %v2386_v43, %v2322_v41  ;;  %v2389_v47 = vadd.f32 %v2388_v45, %v2387_v44  ;;  %v2709_v43 = vld [vmem:[%s3426_s4 + $0x8] sm:$0xff]   ;;  %v2710_v44 = vld [vmem:[%s3426_s4 + $0x10] sm:$0xff]   ;;  %v2711_v45 = vld [vmem:[%s3426_s4 + $0x18] sm:$0xff]  }
 0x2a2   : > { %v1577_v48 = vrot.slane %v1571_v46, 4  ;;  %v1574_v49 = vadd.f32 %v2389_v47, %v2322_v41  ;;  %v2713_v47 = vld [vmem:[%s3426_s4 + $0x28] sm:$0xff]  }
 0x2a4   : > { %v1578_v50 = vadd.f32 %v1577_v48, %v1571_v46  ;;  %v1583_v51 = vrot.slane %v1574_v49, 4  ;;  %v2714_v48 = vld [vmem:[%s3426_s4 + $0x30] sm:$0xff]  }
 0x2a6   : > { %v1579_v52 = vrot.slane %v1578_v50, 2  ;;  %v1584_v54 = vadd.f32 %v1583_v51, %v1574_v49 }
 0x2a8   : > { %v1580_v56 = vadd.f32 %v1579_v52, %v1578_v50  ;;  %v1585_v57 = vrot.slane %v1584_v54, 2  ;;  %v2339_v50 = vld [vmem:[%s3428_s6 + $0x9] ss:$0 sm:$0xff] }
 0x2aa   : > { %v1581_v59 = vrot.slane %v1580_v56, 1  ;;  %v1586_v61 = vadd.f32 %v1585_v57, %v1584_v54 }
 0x2ac   : > { %v1582_v62 = vadd.f32 %v1581_v59, %v1580_v56  ;;  %v1587_v63 = vrot.slane %v1586_v61, 1 }
 0x2ae   : > { %v1589_v0 = vmul.f32 0.125, %v1582_v62  ;;  %v1588_v13 = vadd.f32 %v1587_v63, %v1586_v61 }
 0x2b0   : > { %v1591_v1 = vsub.f32 %v1571_v46, %v1589_v0  ;;  %v1590_v2 = vmul.f32 0.125, %v1588_v13 }
 0x2b2   : > { %v1593_v3 = vmul.f32 %v1591_v1, %v1591_v1  ;;  %v1592_v4 = vsub.f32 %v1574_v49, %v1590_v2 }
 0x2b4   : > { %v1595_v5 = vrot.slane %v1593_v3, 4  ;;  %v1594_v6 = vmul.f32 %v1592_v4, %v1592_v4 }
 0x2b6   : > { %v1596_v7 = vadd.f32 %v1595_v5, %v1593_v3  ;;  %v1601_v8 = vrot.slane %v1594_v6, 4 }
 0x2b8   : > { %v1597_v9 = vrot.slane %v1596_v7, 2  ;;  %v1602_v10 = vadd.f32 %v1601_v8, %v1594_v6 }
 0x2ba   : > { %v1598_v11 = vadd.f32 %v1597_v9, %v1596_v7  ;;  %v1603_v12 = vrot.slane %v1602_v10, 2 }
 0x2bc   : > { %v1599_v53 = vrot.slane %v1598_v11, 1  ;;  %v1604_v55 = vadd.f32 %v1603_v12, %v1602_v10 }
 0x2be   : > { %v1600_v15 = vadd.f32 %v1599_v53, %v1598_v11  ;;  %v1605_v26 = vrot.slane %v1604_v55, 1 }
 0x2c0   : > { %v1607_v17 = vmul.f32 0.125, %v1600_v15  ;;  %v1606_v23 = vadd.f32 %v1605_v26, %v1604_v55 }
 0x2c2   : > { %v1609_v58 = vadd.f32 1e-05, %v1607_v17  ;;  %v1608_v60 = vmul.f32 0.125, %v1606_v23 }
 0x2c4   : > { %2732 = vrsqrt.f32 %v1609_v58  ;;  %v1610_v18 = vadd.f32 1e-05, %v1608_v60 }
 0x2c6   : > { %2734 = vrsqrt.f32 %v1610_v18 }
 0x2ce   : > { %v2733_v29 = vpop.eup %2732 }
 0x2cf   : > { %v1613_v19 = vmul.f32 %v2733_v29, %v1400_v32 }
 0x2d0   : > { %v2735_v20 = vpop.eup %2734 }
 0x2d1   : > { %v1615_v22 = vmul.f32 %v1613_v19, %v1589_v0  ;;  %v1624_v24 = vrot.slane %v1613_v19, %v3206_v14  ;;  %v1614_v25 = vmul.f32 %v2735_v20, %v1400_v32 }
 0x2d3   : > { %v1616_v27 = vmul.f32 %v1614_v25, %v1590_v2  ;;  %v1628_v28 = vrot.slane %v1614_v25, %v3206_v14  ;;  %v1617_v30 = vsub.f32 %v1401_v21, %v1615_v22  ;;  %v1631_v31 = vmul.f32 %v1624_v24, %v1571_v46  ;;  %v2712_v46 = vld [vmem:[%s3426_s4 + $0x20] sm:$0xff]  }
 0x2d5   : > { %v1618_v16 = vsub.f32 %v1401_v21, %v1616_v27  ;;  %v1638_v34 = vrot.slane %v1617_v30, %v3206_v14  ;;  %v1632_v35 = vmul.f32 %v1628_v28, %v1574_v49  ;;  %v2715_v49 = vld [vmem:[%s3426_s4 + $0x38] sm:$0xff]   ;;  %v1651_v27 = vld [vmem:[%s3428_s6 + $0xa] sm:$0x1] }
 0x2d7   : > { %v1642_v36 = vrot.slane %v1618_v16, %v3206_v14  ;;  %v1645_v37 = vadd.f32 %v1638_v34, %v1631_v31  ;;  %v1652_v16 = vld [vmem:[%s3428_s6 + $0xb] sm:$0x1] }
 0x2d9   : > { %v1646_v38 = vadd.f32 %v1642_v36, %v1632_v35  ;;  %v1647_v39 = vmax.f32 %v1645_v37, 0.0 }
 0x2db   : > { %v1648_v40 = vmax.f32 %v1646_v38, 0.0 }
 0x2dd   : > { %v1649_v41 = vpack.c.bf16 %v1648_v40, %v1647_v39 }
 0x2df   : > { %2434 = vmatmul.mubr.bf16.vlgmr.msra.gmra.mrb[8].mxu1 %v1649_v41 }
 0x2e0   : > { %2453 = vmatprep.mubr.msk.bf16.mxu1 %vm2755_vm0, %v2754_v33  ;;  %2438 = vmatpush3.bf16.msra.mxu1 %v2708_v42 }
 0x2e1   : > { %2439 = vmatprep.subr.bf16.mxu1 %v2754_v33 }
 0x2e4   : > { %2440 = vmatpush3.bf16.msra.mxu1 %v2709_v43 }
 0x2e5   : > { %2441 = vmatprep.subr.bf16.mxu1 %v2754_v33 }
 0x2e8   : > { %2442 = vmatpush3.bf16.msra.mxu1 %v2710_v44 }
 0x2e9   : > { %2443 = vmatprep.subr.bf16.mxu1 %v2754_v33 }
 0x2ec   : > { %2444 = vmatpush3.bf16.msra.mxu1 %v2711_v45 }
 0x2ed   : > { %2445 = vmatprep.subr.bf16.mxu1 %v2754_v33 }
 0x2f0   : > { %2446 = vmatpush3.bf16.msra.mxu1 %v2712_v46 }
 0x2f1   : > { %2447 = vmatprep.subr.bf16.mxu1 %v2754_v33 }
 0x2f4   : > { %2448 = vmatpush3.bf16.msra.mxu1 %v2713_v47 }
 0x2f5   : > { %2449 = vmatprep.subr.bf16.mxu1 %v2754_v33 }
 0x2f8   : > { %2450 = vmatpush3.bf16.msra.mxu1 %v2714_v48 }
 0x2f9   : > { %2451 = vmatprep.subr.bf16.mxu1 %v2754_v33 }
 0x2fc   : > { %2452 = vmatpush3.bf16.msra.mxu1 %v2715_v49 }
 0x2fd   : > { %2457 = vmatprep.subr.bf16.mxu1 %v2754_v33 }
 0x3b2   : > { %v1757_v51 = vpop.f32.mrb[8].mxu1 }
 0x3b3   : > { %v1758_v52 = vadd.f32 %v2339_v50, %v1757_v51  ;;  %v2435_v54 = vpop.f32.mrb[9].mxu1  ;;  %v2717_v51 = vld [vmem:[%s3427_s5 + $0x8] sm:$0xff]  }
 0x3b4   : > { %v1760_v56 = vpop.f32.mrb[10].mxu1  ;;  %v2719_v54 = vld [vmem:[%s3427_s5 + $0x18] sm:$0xff]  }
 0x3b5   : > { %v1764_v57 = vrot.slane %v1758_v52, 4  ;;  %v1761_v59 = vadd.f32 %v2339_v50, %v1760_v56  ;;  %v2436_v61 = vpop.f32.mrb[11].mxu1  ;;  %v2716_v50 = vld [vmem:[%s3427_s5] sm:$0xff]  }
 0x3b6   : > { %v2720_v56 = vld [vmem:[%s3427_s5 + $0x20] sm:$0xff]   ;;  %v2723_v61 = vld [vmem:[%s3427_s5 + $0x38] sm:$0xff]  }
 0x3b7   : > { %v1765_v62 = vadd.f32 %v1764_v57, %v1758_v52  ;;  %v1770_v63 = vrot.slane %v1761_v59, 4  ;;  %v2721_v57 = vld [vmem:[%s3427_s5 + $0x28] sm:$0xff]  }
 0x3b9   : > { %v1766_v0 = vrot.slane %v1765_v62, 2  ;;  %v1771_v13 = vadd.f32 %v1770_v63, %v1761_v59 }
 0x3bb   : > { %v1767_v1 = vadd.f32 %v1766_v0, %v1765_v62  ;;  %v1772_v2 = vrot.slane %v1771_v13, 2  ;;  %v2348_v62 = vld [vmem:[%s3428_s6 + $0xc] ss:$0 sm:$0xff] }
 0x3bd   : > { %v1768_v3 = vrot.slane %v1767_v1, 1  ;;  %v1773_v4 = vadd.f32 %v1772_v2, %v1771_v13 }
 0x3bf   : > { %v1769_v5 = vadd.f32 %v1768_v3, %v1767_v1  ;;  %v1774_v6 = vrot.slane %v1773_v4, 1 }
 0x3c1   : > { %v1776_v7 = vmul.f32 0.125, %v1769_v5  ;;  %v1775_v8 = vadd.f32 %v1774_v6, %v1773_v4 }
 0x3c3   : > { %v1778_v9 = vsub.f32 %v1758_v52, %v1776_v7  ;;  %v1777_v10 = vmul.f32 0.125, %v1775_v8 }
 0x3c5   : > { %v1780_v11 = vmul.f32 %v1778_v9, %v1778_v9  ;;  %v1779_v12 = vsub.f32 %v1761_v59, %v1777_v10 }
 0x3c7   : > { %v1782_v53 = vrot.slane %v1780_v11, 4  ;;  %v1781_v55 = vmul.f32 %v1779_v12, %v1779_v12 }
 0x3c9   : > { %v1783_v15 = vadd.f32 %v1782_v53, %v1780_v11  ;;  %v1788_v26 = vrot.slane %v1781_v55, 4 }
 0x3cb   : > { %v1784_v17 = vrot.slane %v1783_v15, 2  ;;  %v1789_v23 = vadd.f32 %v1788_v26, %v1781_v55 }
 0x3cd   : > { %v1785_v58 = vadd.f32 %v1784_v17, %v1783_v15  ;;  %v1790_v60 = vrot.slane %v1789_v23, 2 }
 0x3cf   : > { %v1786_v18 = vrot.slane %v1785_v58, 1  ;;  %v1791_v32 = vadd.f32 %v1790_v60, %v1789_v23 }
 0x3d1   : > { %v1787_v29 = vadd.f32 %v1786_v18, %v1785_v58  ;;  %v1792_v19 = vrot.slane %v1791_v32, 1 }
 0x3d3   : > { %v1794_v20 = vmul.f32 0.125, %v1787_v29  ;;  %v1793_v21 = vadd.f32 %v1792_v19, %v1791_v32 }
 0x3d5   : > { %v1796_v22 = vadd.f32 1e-05, %v1794_v20  ;;  %v1795_v24 = vmul.f32 0.125, %v1793_v21 }
 0x3d7   : > { %2736 = vrsqrt.f32 %v1796_v22  ;;  %v1797_v25 = vadd.f32 1e-05, %v1795_v24 }
 0x3d9   : > { %2738 = vrsqrt.f32 %v1797_v25 }
 0x3e1   : > { %v2737_v28 = vpop.eup %2736 }
 0x3e2   : > { %v1800_v30 = vmul.f32 %v2737_v28, %v1651_v27 }
 0x3e3   : > { %v2739_v31 = vpop.eup %2738 }
 0x3e4   : > { %v1802_v34 = vmul.f32 %v1800_v30, %v1776_v7  ;;  %v1811_v35 = vrot.slane %v1800_v30, %v3206_v14  ;;  %v1801_v36 = vmul.f32 %v2739_v31, %v1651_v27 }
 0x3e6   : > { %v1803_v37 = vmul.f32 %v1801_v36, %v1777_v10  ;;  %v1815_v38 = vrot.slane %v1801_v36, %v3206_v14  ;;  %v1804_v39 = vsub.f32 %v1652_v16, %v1802_v34  ;;  %v1818_v40 = vmul.f32 %v1811_v35, %v1758_v52  ;;  %v2718_v52 = vld [vmem:[%s3427_s5 + $0x10] sm:$0xff]   ;;  %v1838_v36 = vld [vmem:[%s3428_s6 + $0xd] sm:$0x1] }
 0x3e8   : > { %v1805_v41 = vsub.f32 %v1652_v16, %v1803_v37  ;;  %v1825_v42 = vrot.slane %v1804_v39, %v3206_v14  ;;  %v1819_v43 = vmul.f32 %v1815_v38, %v1761_v59  ;;  %v2722_v59 = vld [vmem:[%s3427_s5 + $0x30] sm:$0xff]  }
 0x3ea   : > { %v1829_v44 = vrot.slane %v1805_v41, %v3206_v14  ;;  %v1832_v45 = vadd.f32 %v1825_v42, %v1818_v40  ;;  %v1839_v40 = vld [vmem:[%s3428_s6 + $0xe] sm:$0x1] }
 0x3ec   : > { %v1833_v46 = vadd.f32 %v1829_v44, %v1819_v43  ;;  %v1834_v47 = vmax.f32 %v1832_v45, 0.0 }
 0x3ee   : > { %v1835_v48 = vmax.f32 %v1833_v46, 0.0 }
 0x3f0   : > { %v1836_v49 = vpack.c.bf16 %v1835_v48, %v1834_v47 }
 0x3f2   : > { %2454 = vmatmul.mubr.bf16.vlgmr.msra.gmra.mrb[12].mxu1 %v1836_v49 }
 0x3f3   : > { %2473 = vmatprep.mubr.msk.bf16.mxu1 %vm2755_vm0, %v2754_v33  ;;  %2458 = vmatpush3.bf16.msra.mxu1 %v2716_v50 }
 0x3f4   : > { %2459 = vmatprep.subr.bf16.mxu1 %v2754_v33 }
 0x3f7   : > { %2460 = vmatpush3.bf16.msra.mxu1 %v2717_v51 }
 0x3f8   : > { %2461 = vmatprep.subr.bf16.mxu1 %v2754_v33 }
 0x3fb   : > { %2462 = vmatpush3.bf16.msra.mxu1 %v2718_v52 }
 0x3fc   : > { %2463 = vmatprep.subr.bf16.mxu1 %v2754_v33 }
 0x3ff   : > { %2464 = vmatpush3.bf16.msra.mxu1 %v2719_v54 }
 0x400   : > { %2465 = vmatprep.subr.bf16.mxu1 %v2754_v33 }
 0x403   : > { %2466 = vmatpush3.bf16.msra.mxu1 %v2720_v56 }
 0x404   : > { %2467 = vmatprep.subr.bf16.mxu1 %v2754_v33 }
 0x407   : > { %2468 = vmatpush3.bf16.msra.mxu1 %v2721_v57 }
 0x408   : > { %2469 = vmatprep.subr.bf16.mxu1 %v2754_v33 }
 0x40b   : > { %2470 = vmatpush3.bf16.msra.mxu1 %v2722_v59 }
 0x40c   : > { %2471 = vmatprep.subr.bf16.mxu1 %v2754_v33 }
 0x40f   : > { %2472 = vmatpush3.bf16.msra.mxu1 %v2723_v61  ;;  %v2357_v61 = vld [vmem:[%s3428_s6 + $0xf] ss:$0 sm:$0xff] }
 0x4c5   : > { %v1944_v63 = vpop.f32.mrb[12].mxu1 }
 0x4c6   : > { %v1945_v0 = vadd.f32 %v2348_v62, %v1944_v63  ;;  %v2455_v13 = vpop.f32.mrb[13].mxu1 }
 0x4c7   : > { %v1947_v1 = vpop.f32.mrb[14].mxu1 }
 0x4c8   : > { %v1951_v2 = vrot.slane %v1945_v0, 4  ;;  %v1948_v3 = vadd.f32 %v2348_v62, %v1947_v1  ;;  %v2456_v4 = vpop.f32.mrb[15].mxu1 }
 0x4ca   : > { %v1952_v5 = vadd.f32 %v1951_v2, %v1945_v0  ;;  %v1957_v6 = vrot.slane %v1948_v3, 4 }
 0x4cc   : > { %v1953_v7 = vrot.slane %v1952_v5, 2  ;;  %v1958_v8 = vadd.f32 %v1957_v6, %v1948_v3 }
 0x4ce   : > { %v1954_v9 = vadd.f32 %v1953_v7, %v1952_v5  ;;  %v1959_v10 = vrot.slane %v1958_v8, 2 }
 0x4d0   : > { %v1955_v11 = vrot.slane %v1954_v9, 1  ;;  %v1960_v33 = vadd.f32 %v1959_v10, %v1958_v8 }
 0x4d2   : > { %v1956_v12 = vadd.f32 %v1955_v11, %v1954_v9  ;;  %v1961_v53 = vrot.slane %v1960_v33, 1 }
 0x4d4   : > { %v1963_v55 = vmul.f32 0.125, %v1956_v12  ;;  %v1962_v15 = vadd.f32 %v1961_v53, %v1960_v33 }
 0x4d6   : > { %v1965_v26 = vsub.f32 %v1945_v0, %v1963_v55  ;;  %v1964_v17 = vmul.f32 0.125, %v1962_v15 }
 0x4d8   : > { %v1967_v23 = vmul.f32 %v1965_v26, %v1965_v26  ;;  %v1966_v58 = vsub.f32 %v1948_v3, %v1964_v17 }
 0x4da   : > { %v1969_v60 = vrot.slane %v1967_v23, 4  ;;  %v1968_v18 = vmul.f32 %v1966_v58, %v1966_v58 }
 0x4dc   : > { %v1970_v32 = vadd.f32 %v1969_v60, %v1967_v23  ;;  %v1975_v29 = vrot.slane %v1968_v18, 4 }
 0x4de   : > { %v1971_v19 = vrot.slane %v1970_v32, 2  ;;  %v1976_v20 = vadd.f32 %v1975_v29, %v1968_v18 }
 0x4e0   : > { %v1972_v21 = vadd.f32 %v1971_v19, %v1970_v32  ;;  %v1977_v22 = vrot.slane %v1976_v20, 2 }
 0x4e2   : > { %v1973_v24 = vrot.slane %v1972_v21, 1  ;;  %v1978_v25 = vadd.f32 %v1977_v22, %v1976_v20 }
 0x4e4   : > { %v1974_v27 = vadd.f32 %v1973_v24, %v1972_v21  ;;  %v1979_v28 = vrot.slane %v1978_v25, 1 }
 0x4e6   : > { %v1981_v30 = vmul.f32 0.125, %v1974_v27  ;;  %v1980_v31 = vadd.f32 %v1979_v28, %v1978_v25 }
 0x4e8   : > { %v1983_v16 = vadd.f32 1e-05, %v1981_v30  ;;  %v1982_v34 = vmul.f32 0.125, %v1980_v31 }
 0x4ea   : > { %2740 = vrsqrt.f32 %v1983_v16  ;;  %v1984_v35 = vadd.f32 1e-05, %v1982_v34 }
 0x4ec   : > { %2742 = vrsqrt.f32 %v1984_v35 }
 0x4f4   : > { %v2741_v37 = vpop.eup %2740 }
 0x4f5   : > { %v1987_v38 = vmul.f32 %v2741_v37, %v1838_v36 }
 0x4f6   : > { %v2743_v39 = vpop.eup %2742 }
 0x4f7   : > { %v1989_v41 = vmul.f32 %v1987_v38, %v1963_v55  ;;  %v1998_v42 = vrot.slane %v1987_v38, %v3206_v14  ;;  %v1988_v43 = vmul.f32 %v2743_v39, %v1838_v36 }
 0x4f9   : > { %v1990_v44 = vmul.f32 %v1988_v43, %v1964_v17  ;;  %v2002_v45 = vrot.slane %v1988_v43, %v3206_v14  ;;  %v1991_v46 = vsub.f32 %v1839_v40, %v1989_v41  ;;  %v2005_v47 = vmul.f32 %v1998_v42, %v1945_v0 }
 0x4fb   : > { %v1992_v48 = vsub.f32 %v1839_v40, %v1990_v44  ;;  %v2012_v49 = vrot.slane %v1991_v46, %v3206_v14  ;;  %v2006_v50 = vmul.f32 %v2002_v45, %v1948_v3 }
 0x4fd   : > { %v2016_v51 = vrot.slane %v1992_v48, %v3206_v14  ;;  %v2019_v52 = vadd.f32 %v2012_v49, %v2005_v47 }
 0x4ff   : > { %v2020_v54 = vadd.f32 %v2016_v51, %v2006_v50  ;;  %v2021_v56 = vmax.f32 %v2019_v52, 0.0 }
 0x501   : > { %v2022_v57 = vmax.f32 %v2020_v54, 0.0 }
 0x503   : > { %v2023_v59 = vpack.c.bf16 %v2022_v57, %v2021_v56 }
 0x505   : > { %2474 = vmatmul.mubr.bf16.vlgmr.msra.gmra.mrb[16].mxu1 %v2023_v59 }
 0x5d8   : > { %v2129_v62 = vpop.f32.mrb[16].mxu1 }
 0x5d9   : > { %v2130_v63 = vadd.f32 %v2357_v61, %v2129_v62  ;;  %v2475_v0 = vpop.f32.mrb[17].mxu1 }
 0x5da   : > { %v2132_v13 = vpop.f32.mrb[18].mxu1 }
 0x5db   : > { %2136 = vst [vmem:[%s283_s15] sm:$0xff] %v2130_v63  ;;  %v2133_v14 = vadd.f32 %v2357_v61, %v2132_v13  ;;  %v2476_v1 = vpop.f32.mrb[19].mxu1 }
 0x5dd   : > { %2137 = vst [vmem:[%s283_s15 + $0x8] sm:$0xff] %v2133_v14 }
 0x5de PF: > { %s17_s24 = sadd.s32 1, %s2750_s24  }
 0x5df   : > { %p14_p4 = scmp.ge.s32.totalorder %s17_s24, 4  }
 0x5e1   :  { %16 = sbr.rel (!%p14_p4) target bundleno = 1 (0x1), region = 78 }

</bundles_post_ra>
